<compile_context>
chip_gen: v5e
topology: v5e:2x2
jax: 0.10.0
libtpu: 0.0.40
codegen_flags: <defaults>
</compile_context>

<pallas_src>
import functools
import math

import jax
import jax.numpy as jnp
import numpy as np
from jax.experimental import pallas as pl
from jax.experimental.pallas import tpu as pltpu

_HI = jax.lax.Precision.HIGHEST


# ----------------------------------------------------------------------------
# Pallas kernel: one tile of TB nodes, all target irreps fused.
# Layouts (lanes = channels C everywhere):
#   x        : [TB, I, C]              ir_mul node features
#   A3 table : [E*I, I*I*sumD, C]      rows (q, p, j), leading (e, r)
#   A2 table : [E,   I*I*sumD, C]      rows (q, p, j)
#   A1 table : [E,   I*sumD,   C]      rows (p, j)
#   wlt      : [R, C, C]               Wlin_r / sqrt(C)
#   sc / out : [sumD, TB, C]           j-leading, node on sublanes (dense)
# ----------------------------------------------------------------------------
def _product_basis_kernel(*refs, Ds, I, TB, use_sc):
    sumD = sum(Ds)
    PJ = I * sumD                                   # rows of u / per-q slab of t

    idx_ref, x_ref, a3_ref, a2_ref, a1_ref, wlt_ref = refs[:6]
    pos = 6
    sc_ref = None
    if use_sc:
        sc_ref = refs[pos]
        pos += 1
    out_ref = refs[pos]
    pos += 1
    v_refs = refs[pos:pos + sumD]                   # sumD scratches, each [TB, C]

    base = pl.program_id(0) * TB

    # ---- symmetric contraction, correlation 3 -> 2 -> 1 (VPU work) ---------
    # Element-dependent terms are gathered in-kernel from the small
    # VMEM-resident tables; no per-node HBM gather stream.
    @pl.loop(0, TB)
    def _(n):
        e = idx_ref[base + n]                       # element id (SMEM scalar)
        x_n = x_ref[n]                              # [I, C] ir_mul components

        t = a2_ref[e]                               # [I*PJ, C]   rows (q, p, j)
        for r in range(I):                          # corr 3 -> 2
            t = t + a3_ref[e * I + r] * x_n[r:r + 1, :]

        u = a1_ref[e]                               # [PJ, C]     rows (p, j)
        for q in range(I):                          # corr 2 -> 1
            u = u + t[q * PJ:(q + 1) * PJ, :] * x_n[q:q + 1, :]

        v = u[0:sumD, :] * x_n[0:1, :]
        for p in range(1, I):                       # corr 1 -> 0
            v = v + u[p * sumD:(p + 1) * sumD, :] * x_n[p:p + 1, :]

        for j in range(sumD):                       # stash row n of plane j
            v_refs[j][pl.ds(n, 1), :] = v[j:j + 1, :]

    # ---- equivariant Linear: one [TB, C] @ [C, C] matmul per output row ----
    # (batched over the whole node tile; dense lane-wide stores into out_ref)
    off = 0
    for r, D in enumerate(Ds):
        w = wlt_ref[r]                              # [C, C] = Wlin_r / sqrt(C)
        for d in range(D):
            j = off + d
            y = jnp.dot(v_refs[j][...], w, precision=_HI,
                        preferred_element_type=jnp.float32)
            if sc_ref is not None:
                y = y + sc_ref[j]
            out_ref[j] = y.astype(out_ref.dtype)
        off += D


# ----------------------------------------------------------------------------
# One-time constant preparation (per parameter set) - hoisted element terms.
# ----------------------------------------------------------------------------
def precompute_constants(params, *, C, I):
    irreps = params["irreps"]
    Ds = tuple(ir["D"] for ir in irreps)
    sumD = sum(Ds)

    # Channel-last element tables; j = (irrep, d) innermost on the row axis,
    # the component to be contracted next outermost.
    A3 = jnp.concatenate(
        [jnp.einsum("dpqrk,ekc->erqpdc", ir["U3"], ir["W3"], precision=_HI)
         for ir in irreps], axis=4)                 # [E, r, q, p, sumD, C]
    A2 = jnp.concatenate(
        [jnp.einsum("dpqk,ekc->eqpdc", ir["U2"], ir["W2"], precision=_HI)
         for ir in irreps], axis=3)                 # [E, q, p, sumD, C]
    A1 = jnp.concatenate(
        [jnp.einsum("dpk,ekc->epdc", ir["U1"], ir["W1"], precision=_HI)
         for ir in irreps], axis=2)                 # [E, p, sumD, C]
    E = A3.shape[0]
    # Kept f32: tables are VMEM-resident (read from HBM once per call), so
    # bf16 would not reduce the hot stream but would cost accuracy.
    A3 = A3.reshape(E * I, I * I * sumD, C).astype(jnp.float32)
    A2 = A2.reshape(E, I * I * sumD, C).astype(jnp.float32)
    A1 = A1.reshape(E, I * sumD, C).astype(jnp.float32)

    # cuet.Linear internal shared weights: per-irrep channel mix, 1/sqrt(fan_in)
    wlt = (jnp.stack([ir["Wlin"] for ir in irreps], axis=0)
           / math.sqrt(C)).astype(jnp.float32)      # [R, C, C]
    return dict(Ds=Ds, C=C, I=I, A3=A3, A2=A2, A1=A1, wlt=wlt)


# ----------------------------------------------------------------------------
# Forward wrapper (mirrors EquivariantProductBasisBlock.forward)
# ----------------------------------------------------------------------------
def equivariant_product_basis_block(node_feats, sc, node_attrs, prep, *,
                                    use_sc=True, layout="mul_ir",
                                    tile_nodes=128):
    if layout == "mul_ir":
        N, C, I = node_feats.shape
        x = jnp.swapaxes(node_feats, 1, 2)          # -> ir_mul [N, I, C]
    else:
        N, I, C = node_feats.shape
        x = node_feats
    assert C == prep["C"] and I == prep["I"]
    Ds = prep["Ds"]
    sumD = sum(Ds)

    # torch.nonzero(node_attrs)[:, 1] for strictly one-hot attrs.
    idx = jnp.argmax(node_attrs, axis=1).astype(jnp.int32)

    # Node-tile size: multiple of 8; keep >= 2 tiles when possible so the
    # single "parallel" grid axis can split across v7x's two TensorCores.
    TB = max(8, -(-tile_nodes // 8) * 8)
    while TB > 8 and -(-N // TB) < 2:
        TB //= 2
    NP = -(-N // TB) * TB
    pad = NP - N

    x = x.astype(jnp.float32)
    if pad:
        x = jnp.pad(x, ((0, pad), (0, 0), (0, 0)))
        idx = jnp.pad(idx, (0, pad))

    have_sc = use_sc and sc is not None

    args = [idx, x, prep["A3"], prep["A2"], prep["A1"], prep["wlt"]]
    in_specs = [
        pl.BlockSpec((TB, I, C), lambda i, idx_ref: (i, 0, 0)),        # x
        pl.BlockSpec(prep["A3"].shape, lambda i, idx_ref: (0, 0, 0)),  # resident
        pl.BlockSpec(prep["A2"].shape, lambda i, idx_ref: (0, 0, 0)),  # resident
        pl.BlockSpec(prep["A1"].shape, lambda i, idx_ref: (0, 0, 0)),  # resident
        pl.BlockSpec(prep["wlt"].shape, lambda i, idx_ref: (0, 0, 0)), # resident
    ]
    if have_sc:
        parts, off = [], 0
        for D in Ds:                                 # mul_ir flat -> [sumD, N, C]
            s_r = sc[:, off:off + C * D].reshape(N, C, D)
            parts.append(jnp.transpose(s_r, (2, 0, 1)))
            off += C * D
        sc_jl = jnp.concatenate(parts, axis=0).astype(jnp.float32)
        if pad:
            sc_jl = jnp.pad(sc_jl, ((0, 0), (0, pad), (0, 0)))
        args.append(sc_jl)
        in_specs.append(pl.BlockSpec((sumD, TB, C),
                                     lambda i, idx_ref: (0, i, 0)))

    kern = functools.partial(_product_basis_kernel, Ds=Ds, I=I, TB=TB,
                             use_sc=have_sc)
    out = pl.pallas_call(
        kern,
        out_shape=jax.ShapeDtypeStruct((sumD, NP, C), jnp.float32),
        grid_spec=pltpu.PrefetchScalarGridSpec(
            num_scalar_prefetch=1,
            grid=(NP // TB,),
            in_specs=in_specs,
            out_specs=pl.BlockSpec((sumD, TB, C),
                                   lambda i, idx_ref: (0, i, 0)),
            scratch_shapes=[pltpu.VMEM((TB, C), jnp.float32)
                            for _ in range(sumD)]),
        compiler_params=pltpu.CompilerParams(
            dimension_semantics=("parallel",),
            vmem_limit_bytes=64 * 1024 * 1024),
    )(*args)

    # back to the module's mul_ir output layout: concat over irreps of (c, d)
    out = out[:, :N, :]                              # [sumD, N, C]
    pieces, off = [], 0
    for D in Ds:
        blk = out[off:off + D]                       # [D, N, C]
        pieces.append(jnp.transpose(blk, (1, 2, 0)).reshape(N, C * D))
        off += D
    return jnp.concatenate(pieces, axis=-1)


# ----------------------------------------------------------------------------
# Deterministic parameter initialization (shapes per module __init__)
# ----------------------------------------------------------------------------
def init_params(key, *, C, num_elements, irrep_dims=(1, 3),
                path_counts=((5, 3, 2), (7, 4, 2))):
    # TODO(synk): the U tensors stand in for e3nn's U_matrix_real (generalized
    # O3 Clebsch-Gordan coefficients used by cuet.SymmetricContraction); they
    # are synthesized deterministically since e3nn/cuequivariance is unavailable.
    I = sum(irrep_dims)
    irreps = []
    for (D, (K3, K2, K1)) in zip(irrep_dims, path_counts):
        key, *ks = jax.random.split(key, 8)
        irreps.append(dict(
            D=D,
            U3=0.2 * jax.random.normal(ks[0], (D, I, I, I, K3), jnp.float32),
            U2=0.2 * jax.random.normal(ks[1], (D, I, I, K2), jnp.float32),
            U1=0.2 * jax.random.normal(ks[2], (D, I, K1), jnp.float32),
            W3=jax.random.normal(ks[3], (num_elements, K3, C), jnp.float32) / math.sqrt(K3 * C),
            W2=jax.random.normal(ks[4], (num_elements, K2, C), jnp.float32) / math.sqrt(K2 * C),
            W1=jax.random.normal(ks[5], (num_elements, K1, C), jnp.float32) / math.sqrt(K1 * C),
            Wlin=jax.random.normal(ks[6], (C, C), jnp.float32),
        ))
    return dict(irreps=irreps)


# ----------------------------------------------------------------------------
# Pure-JAX reference (same math, einsum form) for correctness checking
# ----------------------------------------------------------------------------
def reference_forward(node_feats, sc, node_attrs, params, *, C, I,
                      use_sc=True, layout="mul_ir"):
    N = node_feats.shape[0]
    nf = jnp.swapaxes(node_feats, 1, 2) if layout == "mul_ir" else node_feats
    flat = nf.reshape(N, -1)
    idx = jnp.argmax(node_attrs, axis=1)
    x = jnp.transpose(flat.reshape(N, I, C), (0, 2, 1))           # [N, C, I]
    outs = []
    for ir in params["irreps"]:
        w3, w2, w1 = ir["W3"][idx], ir["W2"][idx], ir["W1"][idx]
        out = jnp.einsum("dpqrk,nkc,ncr->ncdpq", ir["U3"], w3, x, precision=_HI)
        out = out + jnp.einsum("dpqk,nkc->ncdpq", ir["U2"], w2, precision=_HI)
        out = jnp.einsum("ncdpq,ncq->ncdp", out, x, precision=_HI)
        out = out + jnp.einsum("dpk,nkc->ncdp", ir["U1"], w1, precision=_HI)
        out = jnp.einsum("ncdp,ncp->ncd", out, x, precision=_HI)
        y = jnp.einsum("ncd,ce->ned", out, ir["Wlin"], precision=_HI) / math.sqrt(C)
        outs.append(y.reshape(N, -1))
    res = jnp.concatenate(outs, axis=-1)
    if use_sc and sc is not None:
        res = res + sc
    return res


if __name__ == "__main__":
    key = jax.random.PRNGKey(0)
    N, C = 200, 128              # nodes (non-multiple of the tile), channels
    num_elements = 3             # config.num_elements
    irrep_dims = (1, 3)          # target irreps: C x 0e + C x 1o
    I = sum(irrep_dims)          # node_feats irreps: C x 0e + C x 1o -> 4 comps
    total = C * sum(irrep_dims)  # flattened output width

    kp, kf, ka, ks = jax.random.split(key, 4)
    params = init_params(kp, C=C, num_elements=num_elements,
                         irrep_dims=irrep_dims)
    prep = precompute_constants(params, C=C, I=I)

    node_feats = jax.random.normal(kf, (N, C, I), jnp.float32)
    elem_idx = jax.random.randint(ka, (N,), 0, num_elements)
    node_attrs = jax.nn.one_hot(elem_idx, num_elements, dtype=jnp.float32)
    sc = jax.random.normal(ks, (N, total), jnp.float32)

    out = equivariant_product_basis_block(node_feats, sc, node_attrs, prep,
                                          use_sc=True, layout="mul_ir",
                                          tile_nodes=64)
    out = jax.block_until_ready(out)
    ref = reference_forward(node_feats, sc, node_attrs, params, C=C, I=I,
                            use_sc=True)
    assert out.shape == (N, total), out.shape
    np.testing.assert_allclose(np.asarray(out), np.asarray(ref),
                               rtol=1e-3, atol=1e-4)

    # no-residual path: sc operand (and its DMA / add) is skipped entirely
    out_nosc = equivariant_product_basis_block(node_feats, None, node_attrs,
                                               prep, use_sc=False,
                                               layout="mul_ir", tile_nodes=64)
    out_nosc = jax.block_until_ready(out_nosc)
    ref_nosc = reference_forward(node_feats, None, node_attrs, params,
                                 C=C, I=I, use_sc=False)
    np.testing.assert_allclose(np.asarray(out_nosc), np.asarray(ref_nosc),
                               rtol=1e-3, atol=1e-4)

    print("KERNEL_OK")
</pallas_src>

<mosaic_0001>
module attributes {stable_mosaic.version = 11 : i64} {
  func.func @_product_basis_kernel(%arg0: i32, %arg1: memref<256xi32, #tpu.memory_space<smem>>, %arg2: memref<64x4x128xf32, #tpu.memory_space<vmem>>, %arg3: memref<12x64x128xf32, #tpu.memory_space<vmem>>, %arg4: memref<3x64x128xf32, #tpu.memory_space<vmem>>, %arg5: memref<3x16x128xf32, #tpu.memory_space<vmem>>, %arg6: memref<2x128x128xf32, #tpu.memory_space<vmem>>, %arg7: memref<4x64x128xf32, #tpu.memory_space<vmem>>, %arg8: memref<4x64x128xf32, #tpu.memory_space<vmem>>, %arg9: memref<64x128xf32, #tpu.memory_space<vmem>>, %arg10: memref<64x128xf32, #tpu.memory_space<vmem>>, %arg11: memref<64x128xf32, #tpu.memory_space<vmem>>, %arg12: memref<64x128xf32, #tpu.memory_space<vmem>>) attributes {dimension_semantics = [#tpu.dimension_semantics<parallel>], iteration_bounds = array<i64: 4>, scalar_prefetch = 1 : i64, scratch_operands = 4 : i64, tpu.core_type = #tpu.core_type<tc>, window_params = [{transform_indices = @transform_0, window_bounds = array<i64: 64, 4, 128>}, {pipeline_mode = #tpu.pipeline_mode<synchronous>, transform_indices = @transform_1, window_bounds = array<i64: 12, 64, 128>}, {pipeline_mode = #tpu.pipeline_mode<synchronous>, transform_indices = @transform_2, window_bounds = array<i64: 3, 64, 128>}, {pipeline_mode = #tpu.pipeline_mode<synchronous>, transform_indices = @transform_3, window_bounds = array<i64: 3, 16, 128>}, {pipeline_mode = #tpu.pipeline_mode<synchronous>, transform_indices = @transform_4, window_bounds = array<i64: 2, 128, 128>}, {transform_indices = @transform_5, window_bounds = array<i64: 4, 64, 128>}, {transform_indices = @transform_6, window_bounds = array<i64: 4, 64, 128>}]} {
    %c64_i32 = arith.constant 64 : i32
    %0 = arith.muli %arg0, %c64_i32 : i32
    %c0_i32 = arith.constant 0 : i32
    %c64_i32_0 = arith.constant 64 : i32
    %1 = arith.addi %c0_i32, %c64_i32_0 : i32
    %c1_i32 = arith.constant 1 : i32
    scf.for %arg13 = %c0_i32 to %1 step %c1_i32  : i32 {
      %c1_i32_39 = arith.constant 1 : i32
      %38 = arith.muli %arg13, %c1_i32_39 : i32
      %c0_i32_40 = arith.constant 0 : i32
      %39 = arith.addi %c0_i32_40, %38 : i32
      %40 = arith.addi %0, %39 : i32
      %41 = arith.index_cast %40 : i32 to index
      %42 = memref.load %arg1[%41] : memref<256xi32, #tpu.memory_space<smem>>
      %43 = arith.index_cast %39 : i32 to index
      %c0_41 = arith.constant 0 : index
      %c0_42 = arith.constant 0 : index
      %44 = vector.load %arg2[%43, %c0_41, %c0_42] : memref<64x4x128xf32, #tpu.memory_space<vmem>>, vector<1x4x128xf32>
      %45 = vector.shape_cast %44 : vector<1x4x128xf32> to vector<4x128xf32>
      %46 = arith.index_cast %42 : i32 to index
      %c0_43 = arith.constant 0 : index
      %c0_44 = arith.constant 0 : index
      %47 = vector.load %arg4[%46, %c0_43, %c0_44] : memref<3x64x128xf32, #tpu.memory_space<vmem>>, vector<1x64x128xf32>
      %48 = vector.shape_cast %47 : vector<1x64x128xf32> to vector<64x128xf32>
      %c4_i32 = arith.constant 4 : i32
      %49 = arith.muli %42, %c4_i32 : i32
      %c0_i32_45 = arith.constant 0 : i32
      %50 = arith.addi %49, %c0_i32_45 : i32
      %51 = arith.index_cast %50 : i32 to index
      %c0_46 = arith.constant 0 : index
      %c0_47 = arith.constant 0 : index
      %52 = vector.load %arg3[%51, %c0_46, %c0_47] : memref<12x64x128xf32, #tpu.memory_space<vmem>>, vector<1x64x128xf32>
      %53 = vector.shape_cast %52 : vector<1x64x128xf32> to vector<64x128xf32>
      %54 = vector.extract_strided_slice %45 {offsets = [0, 0], sizes = [1, 128], strides = [1, 1]} : vector<4x128xf32> to vector<1x128xf32>
      %55 = vector.broadcast %54 : vector<1x128xf32> to vector<64x128xf32>
      %56 = arith.mulf %53, %55 : vector<64x128xf32>
      %57 = arith.addf %48, %56 : vector<64x128xf32>
      %c4_i32_48 = arith.constant 4 : i32
      %58 = arith.muli %42, %c4_i32_48 : i32
      %c1_i32_49 = arith.constant 1 : i32
      %59 = arith.addi %58, %c1_i32_49 : i32
      %60 = arith.index_cast %59 : i32 to index
      %c0_50 = arith.constant 0 : index
      %c0_51 = arith.constant 0 : index
      %61 = vector.load %arg3[%60, %c0_50, %c0_51] : memref<12x64x128xf32, #tpu.memory_space<vmem>>, vector<1x64x128xf32>
      %62 = vector.shape_cast %61 : vector<1x64x128xf32> to vector<64x128xf32>
      %63 = vector.extract_strided_slice %45 {offsets = [1, 0], sizes = [1, 128], strides = [1, 1]} : vector<4x128xf32> to vector<1x128xf32>
      %64 = vector.broadcast %63 : vector<1x128xf32> to vector<64x128xf32>
      %65 = arith.mulf %62, %64 : vector<64x128xf32>
      %66 = arith.addf %57, %65 : vector<64x128xf32>
      %c4_i32_52 = arith.constant 4 : i32
      %67 = arith.muli %42, %c4_i32_52 : i32
      %c2_i32 = arith.constant 2 : i32
      %68 = arith.addi %67, %c2_i32 : i32
      %69 = arith.index_cast %68 : i32 to index
      %c0_53 = arith.constant 0 : index
      %c0_54 = arith.constant 0 : index
      %70 = vector.load %arg3[%69, %c0_53, %c0_54] : memref<12x64x128xf32, #tpu.memory_space<vmem>>, vector<1x64x128xf32>
      %71 = vector.shape_cast %70 : vector<1x64x128xf32> to vector<64x128xf32>
      %72 = vector.extract_strided_slice %45 {offsets = [2, 0], sizes = [1, 128], strides = [1, 1]} : vector<4x128xf32> to vector<1x128xf32>
      %73 = vector.broadcast %72 : vector<1x128xf32> to vector<64x128xf32>
      %74 = arith.mulf %71, %73 : vector<64x128xf32>
      %75 = arith.addf %66, %74 : vector<64x128xf32>
      %c4_i32_55 = arith.constant 4 : i32
      %76 = arith.muli %42, %c4_i32_55 : i32
      %c3_i32 = arith.constant 3 : i32
      %77 = arith.addi %76, %c3_i32 : i32
      %78 = arith.index_cast %77 : i32 to index
      %c0_56 = arith.constant 0 : index
      %c0_57 = arith.constant 0 : index
      %79 = vector.load %arg3[%78, %c0_56, %c0_57] : memref<12x64x128xf32, #tpu.memory_space<vmem>>, vector<1x64x128xf32>
      %80 = vector.shape_cast %79 : vector<1x64x128xf32> to vector<64x128xf32>
      %81 = vector.extract_strided_slice %45 {offsets = [3, 0], sizes = [1, 128], strides = [1, 1]} : vector<4x128xf32> to vector<1x128xf32>
      %82 = vector.broadcast %81 : vector<1x128xf32> to vector<64x128xf32>
      %83 = arith.mulf %80, %82 : vector<64x128xf32>
      %84 = arith.addf %75, %83 : vector<64x128xf32>
      %85 = arith.index_cast %42 : i32 to index
      %c0_58 = arith.constant 0 : index
      %c0_59 = arith.constant 0 : index
      %86 = vector.load %arg5[%85, %c0_58, %c0_59] : memref<3x16x128xf32, #tpu.memory_space<vmem>>, vector<1x16x128xf32>
      %87 = vector.shape_cast %86 : vector<1x16x128xf32> to vector<16x128xf32>
      %88 = vector.extract_strided_slice %84 {offsets = [0, 0], sizes = [16, 128], strides = [1, 1]} : vector<64x128xf32> to vector<16x128xf32>
      %89 = vector.extract_strided_slice %45 {offsets = [0, 0], sizes = [1, 128], strides = [1, 1]} : vector<4x128xf32> to vector<1x128xf32>
      %90 = vector.broadcast %89 : vector<1x128xf32> to vector<16x128xf32>
      %91 = arith.mulf %88, %90 : vector<16x128xf32>
      %92 = arith.addf %87, %91 : vector<16x128xf32>
      %93 = vector.extract_strided_slice %84 {offsets = [16, 0], sizes = [16, 128], strides = [1, 1]} : vector<64x128xf32> to vector<16x128xf32>
      %94 = vector.extract_strided_slice %45 {offsets = [1, 0], sizes = [1, 128], strides = [1, 1]} : vector<4x128xf32> to vector<1x128xf32>
      %95 = vector.broadcast %94 : vector<1x128xf32> to vector<16x128xf32>
      %96 = arith.mulf %93, %95 : vector<16x128xf32>
      %97 = arith.addf %92, %96 : vector<16x128xf32>
      %98 = vector.extract_strided_slice %84 {offsets = [32, 0], sizes = [16, 128], strides = [1, 1]} : vector<64x128xf32> to vector<16x128xf32>
      %99 = vector.extract_strided_slice %45 {offsets = [2, 0], sizes = [1, 128], strides = [1, 1]} : vector<4x128xf32> to vector<1x128xf32>
      %100 = vector.broadcast %99 : vector<1x128xf32> to vector<16x128xf32>
      %101 = arith.mulf %98, %100 : vector<16x128xf32>
      %102 = arith.addf %97, %101 : vector<16x128xf32>
      %103 = vector.extract_strided_slice %84 {offsets = [48, 0], sizes = [16, 128], strides = [1, 1]} : vector<64x128xf32> to vector<16x128xf32>
      %104 = vector.extract_strided_slice %45 {offsets = [3, 0], sizes = [1, 128], strides = [1, 1]} : vector<4x128xf32> to vector<1x128xf32>
      %105 = vector.broadcast %104 : vector<1x128xf32> to vector<16x128xf32>
      %106 = arith.mulf %103, %105 : vector<16x128xf32>
      %107 = arith.addf %102, %106 : vector<16x128xf32>
      %108 = vector.extract_strided_slice %107 {offsets = [0, 0], sizes = [4, 128], strides = [1, 1]} : vector<16x128xf32> to vector<4x128xf32>
      %109 = vector.extract_strided_slice %45 {offsets = [0, 0], sizes = [1, 128], strides = [1, 1]} : vector<4x128xf32> to vector<1x128xf32>
      %110 = vector.broadcast %109 : vector<1x128xf32> to vector<4x128xf32>
      %111 = arith.mulf %108, %110 : vector<4x128xf32>
      %112 = vector.extract_strided_slice %107 {offsets = [4, 0], sizes = [4, 128], strides = [1, 1]} : vector<16x128xf32> to vector<4x128xf32>
      %113 = vector.extract_strided_slice %45 {offsets = [1, 0], sizes = [1, 128], strides = [1, 1]} : vector<4x128xf32> to vector<1x128xf32>
      %114 = vector.broadcast %113 : vector<1x128xf32> to vector<4x128xf32>
      %115 = arith.mulf %112, %114 : vector<4x128xf32>
      %116 = arith.addf %111, %115 : vector<4x128xf32>
      %117 = vector.extract_strided_slice %107 {offsets = [8, 0], sizes = [4, 128], strides = [1, 1]} : vector<16x128xf32> to vector<4x128xf32>
      %118 = vector.extract_strided_slice %45 {offsets = [2, 0], sizes = [1, 128], strides = [1, 1]} : vector<4x128xf32> to vector<1x128xf32>
      %119 = vector.broadcast %118 : vector<1x128xf32> to vector<4x128xf32>
      %120 = arith.mulf %117, %119 : vector<4x128xf32>
      %121 = arith.addf %116, %120 : vector<4x128xf32>
      %122 = vector.extract_strided_slice %107 {offsets = [12, 0], sizes = [4, 128], strides = [1, 1]} : vector<16x128xf32> to vector<4x128xf32>
      %123 = vector.extract_strided_slice %45 {offsets = [3, 0], sizes = [1, 128], strides = [1, 1]} : vector<4x128xf32> to vector<1x128xf32>
      %124 = vector.broadcast %123 : vector<1x128xf32> to vector<4x128xf32>
      %125 = arith.mulf %122, %124 : vector<4x128xf32>
      %126 = arith.addf %121, %125 : vector<4x128xf32>
      %127 = vector.extract_strided_slice %126 {offsets = [0, 0], sizes = [1, 128], strides = [1, 1]} : vector<4x128xf32> to vector<1x128xf32>
      %128 = arith.index_cast %39 : i32 to index
      %c0_60 = arith.constant 0 : index
      %129 = vector.load %arg9[%128, %c0_60] : memref<64x128xf32, #tpu.memory_space<vmem>>, vector<1x128xf32>
      tpu.vector_store %arg9[%128, %c0_60], %127 {strides = array<i32>} : memref<64x128xf32, #tpu.memory_space<vmem>>, vector<1x128xf32>,
      %130 = vector.extract_strided_slice %126 {offsets = [1, 0], sizes = [1, 128], strides = [1, 1]} : vector<4x128xf32> to vector<1x128xf32>
      %131 = arith.index_cast %39 : i32 to index
      %c0_61 = arith.constant 0 : index
      %132 = vector.load %arg10[%131, %c0_61] : memref<64x128xf32, #tpu.memory_space<vmem>>, vector<1x128xf32>
      tpu.vector_store %arg10[%131, %c0_61], %130 {strides = array<i32>} : memref<64x128xf32, #tpu.memory_space<vmem>>, vector<1x128xf32>,
      %133 = vector.extract_strided_slice %126 {offsets = [2, 0], sizes = [1, 128], strides = [1, 1]} : vector<4x128xf32> to vector<1x128xf32>
      %134 = arith.index_cast %39 : i32 to index
      %c0_62 = arith.constant 0 : index
      %135 = vector.load %arg11[%134, %c0_62] : memref<64x128xf32, #tpu.memory_space<vmem>>, vector<1x128xf32>
      tpu.vector_store %arg11[%134, %c0_62], %133 {strides = array<i32>} : memref<64x128xf32, #tpu.memory_space<vmem>>, vector<1x128xf32>,
      %136 = vector.extract_strided_slice %126 {offsets = [3, 0], sizes = [1, 128], strides = [1, 1]} : vector<4x128xf32> to vector<1x128xf32>
      %137 = arith.index_cast %39 : i32 to index
      %c0_63 = arith.constant 0 : index
      %138 = vector.load %arg12[%137, %c0_63] : memref<64x128xf32, #tpu.memory_space<vmem>>, vector<1x128xf32>
      tpu.vector_store %arg12[%137, %c0_63], %136 {strides = array<i32>} : memref<64x128xf32, #tpu.memory_space<vmem>>, vector<1x128xf32>,
    }
    %c64_i32_1 = arith.constant 64 : i32
    %c0 = arith.constant 0 : index
    %c0_2 = arith.constant 0 : index
    %c0_3 = arith.constant 0 : index
    %2 = vector.load %arg6[%c0, %c0_2, %c0_3] : memref<2x128x128xf32, #tpu.memory_space<vmem>>, vector<1x128x128xf32>
    %3 = vector.shape_cast %2 : vector<1x128x128xf32> to vector<128x128xf32>
    %c0_4 = arith.constant 0 : index
    %c0_5 = arith.constant 0 : index
    %4 = vector.load %arg9[%c0_4, %c0_5] : memref<64x128xf32, #tpu.memory_space<vmem>>, vector<64x128xf32>
    %cst = arith.constant dense<0.000000e+00> : vector<64x128xf32>
    %5 = tpu.matmul %4, %3, %cst {dimension_numbers = #tpu.dot_dimension_numbers<[1], [0], [0], [1], [0, 0, 1, 1], [], []>, precision = #tpu.contract_precision<fp32>} : vector<64x128xf32>, vector<128x128xf32>, vector<64x128xf32> -> vector<64x128xf32>
    %c0_6 = arith.constant 0 : index
    %c0_7 = arith.constant 0 : index
    %c0_8 = arith.constant 0 : index
    %6 = vector.load %arg7[%c0_6, %c0_7, %c0_8] : memref<4x64x128xf32, #tpu.memory_space<vmem>>, vector<1x64x128xf32>
    %7 = vector.shape_cast %6 : vector<1x64x128xf32> to vector<64x128xf32>
    %8 = arith.addf %5, %7 : vector<64x128xf32>
    %c0_9 = arith.constant 0 : index
    %c0_10 = arith.constant 0 : index
    %c0_11 = arith.constant 0 : index
    %9 = vector.load %arg8[%c0_9, %c0_10, %c0_11] : memref<4x64x128xf32, #tpu.memory_space<vmem>>, vector<1x64x128xf32>
    %10 = vector.shape_cast %9 : vector<1x64x128xf32> to vector<64x128xf32>
    %11 = vector.shape_cast %8 : vector<64x128xf32> to vector<1x64x128xf32>
    tpu.vector_store %arg8[%c0_9, %c0_10, %c0_11], %11 {strides = array<i32>} : memref<4x64x128xf32, #tpu.memory_space<vmem>>, vector<1x64x128xf32>,
    %c1 = arith.constant 1 : index
    %c0_12 = arith.constant 0 : index
    %c0_13 = arith.constant 0 : index
    %12 = vector.load %arg6[%c1, %c0_12, %c0_13] : memref<2x128x128xf32, #tpu.memory_space<vmem>>, vector<1x128x128xf32>
    %13 = vector.shape_cast %12 : vector<1x128x128xf32> to vector<128x128xf32>
    %c0_14 = arith.constant 0 : index
    %c0_15 = arith.constant 0 : index
    %14 = vector.load %arg10[%c0_14, %c0_15] : memref<64x128xf32, #tpu.memory_space<vmem>>, vector<64x128xf32>
    %cst_16 = arith.constant dense<0.000000e+00> : vector<64x128xf32>
    %15 = tpu.matmul %14, %13, %cst_16 {dimension_numbers = #tpu.dot_dimension_numbers<[1], [0], [0], [1], [0, 0, 1, 1], [], []>, precision = #tpu.contract_precision<fp32>} : vector<64x128xf32>, vector<128x128xf32>, vector<64x128xf32> -> vector<64x128xf32>
    %c1_17 = arith.constant 1 : index
    %c0_18 = arith.constant 0 : index
    %c0_19 = arith.constant 0 : index
    %16 = vector.load %arg7[%c1_17, %c0_18, %c0_19] : memref<4x64x128xf32, #tpu.memory_space<vmem>>, vector<1x64x128xf32>
    %17 = vector.shape_cast %16 : vector<1x64x128xf32> to vector<64x128xf32>
    %18 = arith.addf %15, %17 : vector<64x128xf32>
    %c1_20 = arith.constant 1 : index
    %c0_21 = arith.constant 0 : index
    %c0_22 = arith.constant 0 : index
    %19 = vector.load %arg8[%c1_20, %c0_21, %c0_22] : memref<4x64x128xf32, #tpu.memory_space<vmem>>, vector<1x64x128xf32>
    %20 = vector.shape_cast %19 : vector<1x64x128xf32> to vector<64x128xf32>
    %21 = vector.shape_cast %18 : vector<64x128xf32> to vector<1x64x128xf32>
    tpu.vector_store %arg8[%c1_20, %c0_21, %c0_22], %21 {strides = array<i32>} : memref<4x64x128xf32, #tpu.memory_space<vmem>>, vector<1x64x128xf32>,
    %c0_23 = arith.constant 0 : index
    %c0_24 = arith.constant 0 : index
    %22 = vector.load %arg11[%c0_23, %c0_24] : memref<64x128xf32, #tpu.memory_space<vmem>>, vector<64x128xf32>
    %cst_25 = arith.constant dense<0.000000e+00> : vector<64x128xf32>
    %23 = tpu.matmul %22, %13, %cst_25 {dimension_numbers = #tpu.dot_dimension_numbers<[1], [0], [0], [1], [0, 0, 1, 1], [], []>, precision = #tpu.contract_precision<fp32>} : vector<64x128xf32>, vector<128x128xf32>, vector<64x128xf32> -> vector<64x128xf32>
    %c2 = arith.constant 2 : index
    %c0_26 = arith.constant 0 : index
    %c0_27 = arith.constant 0 : index
    %24 = vector.load %arg7[%c2, %c0_26, %c0_27] : memref<4x64x128xf32, #tpu.memory_space<vmem>>, vector<1x64x128xf32>
    %25 = vector.shape_cast %24 : vector<1x64x128xf32> to vector<64x128xf32>
    %26 = arith.addf %23, %25 : vector<64x128xf32>
    %c2_28 = arith.constant 2 : index
    %c0_29 = arith.constant 0 : index
    %c0_30 = arith.constant 0 : index
    %27 = vector.load %arg8[%c2_28, %c0_29, %c0_30] : memref<4x64x128xf32, #tpu.memory_space<vmem>>, vector<1x64x128xf32>
    %28 = vector.shape_cast %27 : vector<1x64x128xf32> to vector<64x128xf32>
    %29 = vector.shape_cast %26 : vector<64x128xf32> to vector<1x64x128xf32>
    tpu.vector_store %arg8[%c2_28, %c0_29, %c0_30], %29 {strides = array<i32>} : memref<4x64x128xf32, #tpu.memory_space<vmem>>, vector<1x64x128xf32>,
    %c0_31 = arith.constant 0 : index
    %c0_32 = arith.constant 0 : index
    %30 = vector.load %arg12[%c0_31, %c0_32] : memref<64x128xf32, #tpu.memory_space<vmem>>, vector<64x128xf32>
    %cst_33 = arith.constant dense<0.000000e+00> : vector<64x128xf32>
    %31 = tpu.matmul %30, %13, %cst_33 {dimension_numbers = #tpu.dot_dimension_numbers<[1], [0], [0], [1], [0, 0, 1, 1], [], []>, precision = #tpu.contract_precision<fp32>} : vector<64x128xf32>, vector<128x128xf32>, vector<64x128xf32> -> vector<64x128xf32>
    %c3 = arith.constant 3 : index
    %c0_34 = arith.constant 0 : index
    %c0_35 = arith.constant 0 : index
    %32 = vector.load %arg7[%c3, %c0_34, %c0_35] : memref<4x64x128xf32, #tpu.memory_space<vmem>>, vector<1x64x128xf32>
    %33 = vector.shape_cast %32 : vector<1x64x128xf32> to vector<64x128xf32>
    %34 = arith.addf %31, %33 : vector<64x128xf32>
    %c3_36 = arith.constant 3 : index
    %c0_37 = arith.constant 0 : index
    %c0_38 = arith.constant 0 : index
    %35 = vector.load %arg8[%c3_36, %c0_37, %c0_38] : memref<4x64x128xf32, #tpu.memory_space<vmem>>, vector<1x64x128xf32>
    %36 = vector.shape_cast %35 : vector<1x64x128xf32> to vector<64x128xf32>
    %37 = vector.shape_cast %34 : vector<64x128xf32> to vector<1x64x128xf32>
    tpu.vector_store %arg8[%c3_36, %c0_37, %c0_38], %37 {strides = array<i32>} : memref<4x64x128xf32, #tpu.memory_space<vmem>>, vector<1x64x128xf32>,
    return
  }
  func.func @transform_0(%arg0: i32, %arg1: memref<256xi32, #tpu.memory_space<smem>>) -> (i32, i32, i32) {
    %c0_i32 = arith.constant 0 : i32
    %c0_i32_0 = arith.constant 0 : i32
    %c0_i32_1 = arith.constant 0 : i32
    return %arg0, %c0_i32, %c0_i32_0 : i32, i32, i32
  }
  func.func @transform_1(%arg0: i32, %arg1: memref<256xi32, #tpu.memory_space<smem>>) -> (i32, i32, i32) {
    %c0_i32 = arith.constant 0 : i32
    %c0_i32_0 = arith.constant 0 : i32
    %c0_i32_1 = arith.constant 0 : i32
    %c0_i32_2 = arith.constant 0 : i32
    return %c0_i32, %c0_i32_0, %c0_i32_1 : i32, i32, i32
  }
  func.func @transform_2(%arg0: i32, %arg1: memref<256xi32, #tpu.memory_space<smem>>) -> (i32, i32, i32) {
    %c0_i32 = arith.constant 0 : i32
    %c0_i32_0 = arith.constant 0 : i32
    %c0_i32_1 = arith.constant 0 : i32
    %c0_i32_2 = arith.constant 0 : i32
    return %c0_i32, %c0_i32_0, %c0_i32_1 : i32, i32, i32
  }
  func.func @transform_3(%arg0: i32, %arg1: memref<256xi32, #tpu.memory_space<smem>>) -> (i32, i32, i32) {
    %c0_i32 = arith.constant 0 : i32
    %c0_i32_0 = arith.constant 0 : i32
    %c0_i32_1 = arith.constant 0 : i32
    %c0_i32_2 = arith.constant 0 : i32
    return %c0_i32, %c0_i32_0, %c0_i32_1 : i32, i32, i32
  }
  func.func @transform_4(%arg0: i32, %arg1: memref<256xi32, #tpu.memory_space<smem>>) -> (i32, i32, i32) {
    %c0_i32 = arith.constant 0 : i32
    %c0_i32_0 = arith.constant 0 : i32
    %c0_i32_1 = arith.constant 0 : i32
    %c0_i32_2 = arith.constant 0 : i32
    return %c0_i32, %c0_i32_0, %c0_i32_1 : i32, i32, i32
  }
  func.func @transform_5(%arg0: i32, %arg1: memref<256xi32, #tpu.memory_space<smem>>) -> (i32, i32, i32) {
    %c0_i32 = arith.constant 0 : i32
    %c0_i32_0 = arith.constant 0 : i32
    %c0_i32_1 = arith.constant 0 : i32
    return %c0_i32, %arg0, %c0_i32_0 : i32, i32, i32
  }
  func.func @transform_6(%arg0: i32, %arg1: memref<256xi32, #tpu.memory_space<smem>>) -> (i32, i32, i32) {
    %c0_i32 = arith.constant 0 : i32
    %c0_i32_0 = arith.constant 0 : i32
    %c0_i32_1 = arith.constant 0 : i32
    return %c0_i32, %arg0, %c0_i32_0 : i32, i32, i32
  }
}

</mosaic_0001>

<bundles_post_ra>
// kernel: tpu_custom_call.1
= control target key start
LH: loop header
LB: loop body
LE: loop exit
PB: predicated region body
PF: predicated region fallthrough
CT: control target
= control target key end

     0   :  { %s3623_s27 = smov [#allocation7]   ;;  %s5468_s0 = inlined_call_operand.hbm [shape: s32[256], index: 0, kind: input, shape index: {}]   ;;  %s5469_s1 = inlined_call_operand.hbm [shape: f32[256,4,128], index: 1, kind: input, shape index: {}]   ;;  %s5470_s2 = inlined_call_operand.hbm [shape: f32[12,64,128], index: 2, kind: input, shape index: {}]   ;;  %s5471_s3 = inlined_call_operand.hbm [shape: f32[3,64,128], index: 3, kind: input, shape index: {}]   ;;  %s5472_s4 = inlined_call_operand.hbm [shape: f32[3,16,128], index: 4, kind: input, shape index: {}]   ;;  %s5473_s5 = inlined_call_operand.hbm [shape: f32[2,128,128], index: 5, kind: input, shape index: {}]   ;;  %s5474_s6 = inlined_call_operand.hbm [shape: f32[4,256,128], index: 6, kind: input, shape index: {}]   ;;  %s5475_s7 = inlined_call_operand.hbm [shape: f32[4,256,128], index: 7, kind: output, shape index: {}]  }
   0x1   :  { %5607 = sst [smem:[#allocation86_spill]] %s5470_s2  ;;  %s13_s26 = sshll.u32 %s5468_s0, 4  ;;  %s14_s26 = int_to_ptr.hbm [resolvable:$true] %s13_s26 }
   0x2   :  { %5608 = sst [smem:[#allocation87_spill]] %s5472_s4 }
   0x3   :  { %16 = dma.hbm_to_smem %s14_s26, 32, %s3623_s27, [#allocation6] }
   0x4   :  { %3581 = dma.done.wait [#allocation6], 32 }
   0x5   :  { %3582 = vsyncadd [#allocation6], 4294967264 }
   0x6   :  { %19 = sfence }
   0x7   :  { %20 = vsyncpa [#allocation9], 0 }
   0x8   :  { %22 = vsyncpa [#allocation9 + $0x1], 0 }
   0x9   :  { %23 = vsyncpa [#allocation12], 0 }
   0xa   :  { %24 = vsyncpa [#allocation15], 0 }
   0xb   :  { %25 = vsyncpa [#allocation18], 0 }
   0xc   :  { %27 = vsyncpa [#allocation18 + $0x1], 0 }
   0xd   :  { %28 = vsyncpa [#allocation10], 0 }
   0xe   :  { %30 = vsyncpa [#allocation10 + $0x1], 0  ;;  %s3686_s28 = smov 0   ;;  %s3688_s29 = smov 0  }
   0xf   :  { %s3690_s30 = smov 0   ;;  %s3692_s0 = smov 0  }
  0x10 LB: > { %s3707_s8 = sadd.s32 4294967295, %s3617_s0   ;;  %s3161_s9 = sadd.s32 4294967294, %s3617_s0   ;;  %s3617_s0 = sphi %s3692_s0, %s5790_s0   ;;  %s3613_s30 = sphi %s3690_s30, %s5794_s30   ;;  %s3609_s29 = sphi %s3688_s29, %s5793_s29   ;;  %s3605_s28 = sphi %s3686_s28, %s5792_s28  }
  0x11   : > { %s3711_s10 = sadd.s32 1, %s3617_s0   ;;  %s43_s11 = sadd.s32 1, %s3613_s30 }
  0x12   : > { %5609 = sst [smem:[#allocation31_spill]] %s3711_s10  ;;  %s40_s12 = ssub.s32 %s3617_s0, %s3711_s10 }
  0x13   : > { %p50_p0 = scmp.ne.s32.totalorder %s3613_s30, %s3609_s29  ;;  %p41_p1 = scmp.eq.s32.totalorder %s40_s12, 0 }
  0x14   : > { %p51_p2 = scmp.eq.s32.totalorder %s3617_s0, 0  ;;  %p56_p3 = scmp.ne.s32.totalorder %s3609_s29, %s3605_s28 }
  0x15   : > { %p57_p4 = scmp.eq.s32.totalorder %s3707_s8, 0  ;;  %p190_p7 = scmp.eq.s32.totalorder %s3707_s8, 3 }
  0x16   : > { %s3723_s13 = scalar_select %p41_p1, %s3613_s30, %s43_s11  }
  0x17   : > { %p3725_p5 = por %p51_p2, %p50_p0  ;;  %p3731_p6 = por %p57_p4, %p56_p3 }
  0x18   : > { %5610 = sst [smem:[#allocation32_spill]] %s3723_s13  ;;  %p196_p8 = scmp.eq.s32.totalorder %s3161_s9, 3 }
  0x19   : > { %p3162_p9 = scmp.ge.s32.totalorder %s3617_s0, 1  ;;  %p203_p10 = scmp.lt.s32.totalorder %s3617_s0, 5 }
  0x1a   : > { %p3738_p11 = por %p190_p7, %p50_p0  ;;  %p3742_p12 = por %p196_p8, %p56_p3 }
  0x1b   : > { %p3746_p13 = pnand %p3162_p9, %p203_p10  ;;  %s5616_s2 = sld [smem:[#allocation86_spill]] }
  0x1c   : > { %s3624_s22 = smov [#allocation11]   ;;  %s5618_s4 = sld [smem:[#allocation87_spill]] }
  0x1d   : > { %p3315_p1 = pneg %p3746_p13  ;;  %s216_s23 = sshll.u32 %s3624_s22, 4  ;;  %s217_s23 = int_to_ptr.vmem [resolvable:$true] %s216_s23 }
  0x1e   : > { %s3625_s9 = smov 128   ;;  %s3626_s11 = smov 8  }
  0x1f   : > { %p3757_p0 = pnand %p3315_p1, %p57_p4  ;;  %s228_s20 = sshll.u32 %s5471_s3, 4  ;;  %s229_s20 = int_to_ptr.hbm [resolvable:$true] %s228_s20 }
  0x20   : > { %s3627_s22 = smov [#allocation14]   ;;  %s3628_s25 = smov [#allocation13]  }
  0x21   : > { %s214_s21 = sshll.u32 %s5616_s2, 4  ;;  %s244_s2 = sshll.u32 %s3627_s22, 4  ;;  %s215_s21 = int_to_ptr.hbm [resolvable:$true] %s214_s21  ;;  %s245_s2 = int_to_ptr.vmem [resolvable:$true] %s244_s2 }
  0x22   : > { %s242_s27 = sshll.u32 %s5618_s4, 4  ;;  %s230_s26 = sshll.u32 %s3628_s25, 4  ;;  %s243_s27 = int_to_ptr.hbm [resolvable:$true] %s242_s27  ;;  %s231_s26 = int_to_ptr.vmem [resolvable:$true] %s230_s26 }
  0x23   : > { %3318 = dma.hbm_to_vmem [thread:$0]  (!%p3757_p0), %s215_s21, 12288, %s217_s23, [#allocation12], %s3625_s9, %s3625_s9, %s3626_s11  }
  0x24   : > { %3324 = dma.hbm_to_vmem [thread:$0]  (!%p3757_p0), %s243_s27, 768, %s245_s2, [#allocation15], %s3625_s9, %s3625_s9, %s3626_s11  }
  0x25   : > { %s256_s10 = sshll.u32 %s5473_s5, 4  ;;  %s3629_s21 = smov [#allocation16]   ;;  %s257_s10 = int_to_ptr.hbm [resolvable:$true] %s256_s10 }
  0x26   : > { %3321 = dma.hbm_to_vmem [thread:$0]  (!%p3757_p0), %s229_s20, 3072, %s231_s26, [#allocation12], %s3625_s9, %s3625_s9, %s3626_s11  }
  0x27   : > { %s258_s23 = sshll.u32 %s3629_s21, 4  ;;  %p3167_p2 = scmp.ge.s32.totalorder %s3617_s0, 4  ;;  %s259_s23 = int_to_ptr.vmem [resolvable:$true] %s258_s23 }
  0x28   : > { %3327 = dma.hbm_to_vmem [thread:$0]  (!%p3757_p0), %s257_s10, 4096, %s259_s23, [#allocation15], %s3625_s9, %s3625_s9, %s3626_s11  }
  0x29   : > { %268 = sbr.rel (%p3167_p2) target bundleno = 71 (0x47), region = 32  ;;  %s3780_s2 = sand.u32 (!%p3167_p2), 1, %s3613_s30  }
  0x2a   : > { %s3273_s4 = sshll.u32 (!%p3167_p2), %s3617_s0, 8  ;;  %s3168_s13 = sshll.u32 (!%p3167_p2), %s3780_s2, 8 }
  0x2b   : > { %s281_s19 = scalar_lea.hbm (!%p3167_p2), %s5469_s1, %s3273_s4  ;;  %s276_s22 = scalar_lea.vmem (!%p3167_p2), [#allocation8], %s3168_s13 }
  0x2c   : > { %s282_s20 = sshll.u32 (!%p3167_p2), %s281_s19, 4  ;;  %s284_s24 = sshll.u32 (!%p3167_p2), %s276_s22, 4  ;;  %s283_s20 = int_to_ptr.hbm [resolvable:$true] %s282_s20  ;;  %s285_s24 = int_to_ptr.vmem [resolvable:$true] %s284_s24 }
  0x2d   : > { %s273_s10 = scalar_lea.sflag (!%p3167_p2), [#allocation9], %s3780_s2  ;;  %s3533_s9 = sshra.s32 (!%p3167_p2), %s283_s20, 4  ;;  %s3534_s9 = int_to_ptr.hbm [resolvable:$true] %s3533_s9 }
  0x2e   : > { %s3535_s11 = scalar_lea.hbm %s3534_s9, 256  ;;  %s3539_s21 = scalar_lea.hbm %s5469_s1, 1024 }
  0x2f   : > { %p3536_p3 = scmp.ne.s32.totalorder %s3534_s9, %s3535_s11  ;;  %p3540_p9 = scmp.lt.s32.totalorder %s3534_s9, %s5469_s1 }
  0x30   : > { %p3541_p10 = scmp.lt.s32.totalorder %s3539_s21, %s3535_s11 }
  0x31   : > { %p3537_p7 = pnand %p3536_p3, %p3725_p5 }
  0x32   : > { %p3542_p1 = por %p3541_p10, %p3540_p9 }
  0x33   : > { %p3538_p8 = pneg %p3537_p7 }
  0x35   : > { %p3543_p0 = pnand %p3542_p1, %p3538_p8 }
  0x37   : > { %3546 = shalt.err (!%p3543_p0)
}
  0x38   : > { %s3630_s4 = smov 64   ;;  %s3631_s12 = smov 4  }
  0x39   : > { %3288 = dma.hbm_to_vmem [thread:$0]  (%p3725_p5), %s283_s20, 4096, %s285_s24, %s273_s10, %s3630_s4, %s3630_s4, %s3631_s12  }
  0x3a   : > { %s3274_s19 = sshll.u32 %s3617_s0, 6  ;;  %s298_s22 = scalar_lea.vmem [#allocation17], %s3168_s13 }
  0x3b   : > { %s318_s25 = sshll.u32 %s298_s22, 4  ;;  %s303_s26 = scalar_lea.hbm %s5474_s6, %s3274_s19  ;;  %s319_s25 = int_to_ptr.vmem [resolvable:$true] %s318_s25 }
  0x3c   : > { %s3289_s21 = scalar_select %p3725_p5, [#allocation0], [#allocation24] }
  0x3d   : > { %s316_s24 = sshll.u32 %s303_s26, 4  ;;  %s3632_s10 = smov 4096   ;;  %s317_s24 = int_to_ptr.hbm [resolvable:$true] %s316_s24 }
  0x3e   : > { %s308_s20 = sld [smem:[%s3289_s21]]   ;;  %s3633_s23 = smov 1024  }
  0x3f   : > { %3290 = sst [smem:[#allocation21]] (%p3725_p5), %s3632_s10  ;;  %s3634_s13 = smov 8  }
  0x40   : > { %3291 = sst [smem:[#allocation21 + $0x1]] (%p3725_p5), %s3633_s23  ;;  %s3635_s27 = smov 128  }
  0x41   : > { %3292 = sst [smem:[#allocation21 + $0x2]] (%p3725_p5), %s3634_s13  ;;  %s295_s19 = scalar_lea.sflag [#allocation18], %s3780_s2 }
  0x42   : > { %3293 = sst [smem:[#allocation21 + $0x3]] (%p3725_p5), %s3635_s27  ;;  %s3636_s22 = smov [#allocation20]  }
  0x43   : > { %3294 = sst [smem:[#allocation21 + $0x4]] (%p3725_p5), %s3635_s27 }
  0x44   : > { %s3174_s4 = sshll.u32 %s308_s20, 26  ;;  %3295 = sst [smem:[#allocation21 + $0x5]] (%p3725_p5), %s3634_s13 }
  0x45   : > { %s3175_s12 = sadd.s32 134217728, %s3174_s4 }
  0x46   : > { %3296 = dma.general (%p3725_p5), %s317_s24, 4096, %s319_s25, %s295_s19, %s3636_s22, [#allocation21], %s3175_s12, 0  }
  0x47 PF: > { %343 = sbr.rel (%p3746_p13) target bundleno = 688 (0x2b0), region = 44 }
  0x4c   : > { %s3822_s9 = sand.u32 1, %s3609_s29  }
  0x4d   : > { %s3825_s11 = sshll.u32 %s3822_s9, 8  ;;  %s346_s26 = scalar_lea.sflag [#allocation9], %s3822_s9 }
  0x4e   : > { %s349_s21 = scalar_lea.vmem [#allocation8], %s3825_s11 }
  0x4f   : > { %3584 = dma.done.wait (%p3731_p6), %s346_s26, 4096  }
  0x50   : > { %3586 = vsyncadd (%p3731_p6), %s346_s26, 4294963200 }
  0x51   : > { %3588 = dma.done.wait (%p57_p4), [#allocation12], 15360  }
  0x52   : > { %3590 = vsyncadd (%p57_p4), [#allocation12], 4294951936 }
  0x53   : > { %3592 = dma.done.wait (%p57_p4), [#allocation15], 4864  }
  0x54   : > { %3594 = vsyncadd (%p57_p4), [#allocation15], 4294962432  ;;  %s376_s14 = scalar_lea.sflag [#allocation18], %s3822_s9  ;;  %s3843_s18 = scalar_lea.vmem [#allocation17], %s3825_s11 }
  0x55   : > { %3596 = dma.done.wait (%p3731_p6), %s376_s14, 4096  }
  0x56   : > { %3598 = vsyncadd (%p3731_p6), %s376_s14, 4294963200  ;;  %s3184_s2 = sshll.u32 %s3707_s8, 6  ;;  %s3851_s25 = scalar_lea.vmem [#allocation19], %s3825_s11 }
  0x57   : > { %s3853_s20 = smov 0  }
  0x58 LB: >> { %s424_s24 = sadd.s32 %s3621_s20, %s3184_s2  ;;  %s3185_s15 = sshll.u32 %s3621_s20, 2  ;;  %s3621_s20 = sphi %s3853_s20, %s423_s20  }
  0x59   : >> { %s3862_s10 = sld [smem:[#allocation7 + %s424_s24]]  ;;  %s427_s23 = scalar_lea.vmem %s349_s21, %s3185_s15 [#allocation8] }
  0x5a   : >> { %v428_v0 = vld [vmem:[%s427_s23] sm:$0xf]  ;;  %s584_s26 = scalar_lea.vmem [#allocation2], %s3621_s20  ;;  %s586_s14 = scalar_lea.vmem [#allocation3], %s3621_s20 }
  0x5b   : >> { %v3868_v1 = vperm.slane %v428_v0, 0  ;;  %v3877_v15 = vperm.slane %v428_v0, 1  ;;  %v3879_v16 = vperm.slane %v428_v0, 2  ;;  %v3887_v23 = vperm.slane %v428_v0, 3  ;;  %s588_s24 = scalar_lea.vmem [#allocation4], %s3621_s20  ;;  %s590_s15 = scalar_lea.vmem [#allocation5], %s3621_s20 }
  0x5c   : >> { %s423_s20 = sadd.s32 1, %s3621_s20  }
  0x5d   : >> { %p420_p4 = scmp.ge.s32.totalorder %s423_s20, 64  }
  0x5e   : > { %s2960_s11 = scalar_lea.sflag (%p420_p4), [#allocation10], %s3822_s9 }
  0x5f   : >> { %s3186_s13 = sshll.u32 %s3862_s10, 6  ;;  %s3275_s27 = sshll.u32 %s3862_s10, 8 }
  0x60   : >> { %s430_s4 = scalar_lea.vmem [#allocation13], %s3186_s13  ;;  %s3870_s12 = scalar_lea.vmem [#allocation11], %s3275_s27 }
  0x61   : >> { %v431_v2 = vld [vmem:[%s430_s4] sm:$0xff]  ;;  %v432_v3 = vld [vmem:[%s430_s4 + $0x8] sm:$0xff]  ;;  %v433_v4 = vld [vmem:[%s430_s4 + $0x10] sm:$0xff]  ;;  %s3219_s19 = sshll.u32 %s3862_s10, 4 }
  0x62   : >> { %v434_v5 = vld [vmem:[%s430_s4 + $0x18] sm:$0xff]  ;;  %v435_v6 = vld [vmem:[%s430_s4 + $0x20] sm:$0xff]  ;;  %v436_v7 = vld [vmem:[%s430_s4 + $0x28] sm:$0xff]  ;;  %s552_s22 = scalar_lea.vmem [#allocation14], %s3219_s19 }
  0x63   : >> { %v437_v8 = vld [vmem:[%s430_s4 + $0x30] sm:$0xff]  ;;  %v442_v9 = vld [vmem:[%s3870_s12] sm:$0xff]  ;;  %v438_v10 = vld [vmem:[%s430_s4 + $0x38] sm:$0xff] }
  0x64   : >> { %v443_v11 = vld [vmem:[%s3870_s12 + $0x8] sm:$0xff]  ;;  %v444_v12 = vld [vmem:[%s3870_s12 + $0x10] sm:$0xff]  ;;  %v445_v13 = vld [vmem:[%s3870_s12 + $0x18] sm:$0xff]  ;;  %v451_v14 = vmul.f32 %v3868_v1, %v442_v9 }
  0x65   : >> { %v446_v17 = vld [vmem:[%s3870_s12 + $0x20] sm:$0xff]  ;;  %v447_v18 = vld [vmem:[%s3870_s12 + $0x28] sm:$0xff]  ;;  %v448_v19 = vld [vmem:[%s3870_s12 + $0x30] sm:$0xff]  ;;  %v452_v20 = vmul.f32 %v3868_v1, %v443_v11  ;;  %v453_v21 = vmul.f32 %v3868_v1, %v444_v12  ;;  %v454_v22 = vmul.f32 %v3868_v1, %v445_v13 }
  0x66   : >> { %v449_v24 = vld [vmem:[%s3870_s12 + $0x38] sm:$0xff]  ;;  %v455_v25 = vmul.f32 %v3868_v1, %v446_v17  ;;  %v456_v26 = vmul.f32 %v3868_v1, %v447_v18  ;;  %v457_v27 = vmul.f32 %v3868_v1, %v448_v19  ;;  %v459_v28 = vadd.f32 %v451_v14, %v431_v2  ;;  %v3191_v29 = vld [vmem:[%s3870_s12 + $0x40] sm:$0xff]  ;;  %v3192_v30 = vld [vmem:[%s3870_s12 + $0x48] sm:$0xff] }
  0x67   : >> { %v458_v31 = vmul.f32 %v3868_v1, %v449_v24  ;;  %v460_v32 = vadd.f32 %v452_v20, %v432_v3  ;;  %v461_v33 = vadd.f32 %v453_v21, %v433_v4  ;;  %v462_v34 = vadd.f32 %v454_v22, %v434_v5  ;;  %v3193_v35 = vld [vmem:[%s3870_s12 + $0x50] sm:$0xff]  ;;  %v3194_v36 = vld [vmem:[%s3870_s12 + $0x58] sm:$0xff]  ;;  %v3195_v37 = vld [vmem:[%s3870_s12 + $0x60] sm:$0xff] }
  0x68   : >> { %v463_v38 = vadd.f32 %v455_v25, %v435_v6  ;;  %v464_v39 = vadd.f32 %v456_v26, %v436_v7  ;;  %v465_v40 = vadd.f32 %v457_v27, %v437_v8  ;;  %v3196_v41 = vld [vmem:[%s3870_s12 + $0x68] sm:$0xff]  ;;  %v3197_v42 = vld [vmem:[%s3870_s12 + $0x70] sm:$0xff]  ;;  %v3198_v43 = vld [vmem:[%s3870_s12 + $0x78] sm:$0xff]  ;;  %v479_v44 = vmul.f32 %v3191_v29, %v3877_v15 }
  0x69   : >> { %v466_v45 = vadd.f32 %v458_v31, %v438_v10  ;;  %v480_v46 = vmul.f32 %v3192_v30, %v3877_v15  ;;  %v481_v47 = vmul.f32 %v3193_v35, %v3877_v15  ;;  %v482_v48 = vmul.f32 %v3194_v36, %v3877_v15  ;;  %v3201_v49 = vld [vmem:[%s3870_s12 + $0x80] sm:$0xff]  ;;  %v3202_v50 = vld [vmem:[%s3870_s12 + $0x88] sm:$0xff]  ;;  %v3203_v55 = vld [vmem:[%s3870_s12 + $0x90] sm:$0xff] }
  0x6a   : >> { %v483_v51 = vmul.f32 %v3195_v37, %v3877_v15  ;;  %v484_v52 = vmul.f32 %v3196_v41, %v3877_v15  ;;  %v485_v53 = vmul.f32 %v3197_v42, %v3877_v15  ;;  %v486_v54 = vmul.f32 %v3198_v43, %v3877_v15  ;;  %v3204_v56 = vld [vmem:[%s3870_s12 + $0x98] sm:$0xff]  ;;  %v3205_v57 = vld [vmem:[%s3870_s12 + $0xa0] sm:$0xff]  ;;  %v3206_v62 = vld [vmem:[%s3870_s12 + $0xa8] sm:$0xff] }
  0x6b   : >> { %v487_v58 = vadd.f32 %v479_v44, %v459_v28  ;;  %v488_v59 = vadd.f32 %v480_v46, %v460_v32  ;;  %v489_v60 = vadd.f32 %v481_v47, %v461_v33  ;;  %v490_v61 = vadd.f32 %v482_v48, %v462_v34  ;;  %v3207_v63 = vld [vmem:[%s3870_s12 + $0xb0] sm:$0xff]  ;;  %v3208_v0 = vld [vmem:[%s3870_s12 + $0xb8] sm:$0xff]  ;;  %v3211_v10 = vld [vmem:[%s3870_s12 + $0xc0] sm:$0xff] }
  0x6c   : >> { %v491_v2 = vadd.f32 %v483_v51, %v463_v38  ;;  %v492_v3 = vadd.f32 %v484_v52, %v464_v39  ;;  %v493_v4 = vadd.f32 %v485_v53, %v465_v40  ;;  %v494_v5 = vadd.f32 %v486_v54, %v466_v45  ;;  %v3212_v11 = vld [vmem:[%s3870_s12 + $0xc8] sm:$0xff]  ;;  %v3213_v18 = vld [vmem:[%s3870_s12 + $0xd0] sm:$0xff]  ;;  %v3214_v19 = vld [vmem:[%s3870_s12 + $0xd8] sm:$0xff] }
  0x6d   : >> { %v507_v6 = vmul.f32 %v3201_v49, %v3879_v16  ;;  %v508_v7 = vmul.f32 %v3202_v50, %v3879_v16  ;;  %v509_v8 = vmul.f32 %v3203_v55, %v3879_v16  ;;  %v510_v9 = vmul.f32 %v3204_v56, %v3879_v16  ;;  %v3215_v20 = vld [vmem:[%s3870_s12 + $0xe0] sm:$0xff]  ;;  %v3216_v26 = vld [vmem:[%s3870_s12 + $0xe8] sm:$0xff]  ;;  %v3217_v27 = vld [vmem:[%s3870_s12 + $0xf0] sm:$0xff] }
  0x6e   : >> { %v511_v12 = vmul.f32 %v3205_v57, %v3879_v16  ;;  %v512_v13 = vmul.f32 %v3206_v62, %v3879_v16  ;;  %v513_v14 = vmul.f32 %v3207_v63, %v3879_v16  ;;  %v514_v17 = vmul.f32 %v3208_v0, %v3879_v16  ;;  %v3218_v28 = vld [vmem:[%s3870_s12 + $0xf8] sm:$0xff]  ;;  %v553_v49 = vld [vmem:[%s552_s22] sm:$0xff]  ;;  %v554_v50 = vld [vmem:[%s552_s22 + $0x8] sm:$0xff] }
  0x6f   : >> { %v515_v21 = vadd.f32 %v507_v6, %v487_v58  ;;  %v516_v22 = vadd.f32 %v508_v7, %v488_v59  ;;  %v517_v24 = vadd.f32 %v509_v8, %v489_v60  ;;  %v518_v25 = vadd.f32 %v510_v9, %v490_v61 }
  0x70   : >> { %v519_v29 = vadd.f32 %v511_v12, %v491_v2  ;;  %v520_v30 = vadd.f32 %v512_v13, %v492_v3  ;;  %v521_v31 = vadd.f32 %v513_v14, %v493_v4  ;;  %v522_v32 = vadd.f32 %v514_v17, %v494_v5  ;;  %v604_v17 = vld [vmem:[#allocation16 + $0x60] sm:$0xff] (%p420_p4) }
  0x71   : >> { %v535_v33 = vmul.f32 %v3211_v10, %v3887_v23  ;;  %v536_v34 = vmul.f32 %v3212_v11, %v3887_v23  ;;  %v537_v35 = vmul.f32 %v3213_v18, %v3887_v23  ;;  %v538_v36 = vmul.f32 %v3214_v19, %v3887_v23  ;;  %v603_v18 = vld [vmem:[#allocation16 + $0x58] sm:$0xff] (%p420_p4)  ;;  %v602_v19 = vld [vmem:[#allocation16 + $0x50] sm:$0xff] (%p420_p4) }
  0x72   : >> { %v539_v37 = vmul.f32 %v3215_v20, %v3887_v23  ;;  %v540_v38 = vmul.f32 %v3216_v26, %v3887_v23  ;;  %v541_v39 = vmul.f32 %v3217_v27, %v3887_v23  ;;  %v542_v40 = vmul.f32 %v3218_v28, %v3887_v23 }
  0x73   : >> { %v543_v41 = vadd.f32 %v535_v33, %v515_v21  ;;  %v544_v42 = vadd.f32 %v536_v34, %v516_v22  ;;  %v545_v43 = vadd.f32 %v537_v35, %v517_v24  ;;  %v546_v44 = vadd.f32 %v538_v36, %v518_v25  ;;  %v601_v24 = vld [vmem:[#allocation16 + $0x48] sm:$0xff] (%p420_p4)  ;;  %v600_v25 = vld [vmem:[#allocation16 + $0x40] sm:$0xff] (%p420_p4) }
  0x74   : >> { %v547_v45 = vadd.f32 %v539_v37, %v519_v29  ;;  %v548_v46 = vadd.f32 %v540_v38, %v520_v30  ;;  %v549_v47 = vadd.f32 %v541_v39, %v521_v31  ;;  %v550_v48 = vadd.f32 %v542_v40, %v522_v32  ;;  %v599_v30 = vld [vmem:[#allocation16 + $0x38] sm:$0xff] (%p420_p4)  ;;  %v598_v38 = vld [vmem:[#allocation16 + $0x30] sm:$0xff] (%p420_p4) }
  0x75   : >> { %v555_v51 = vmul.f32 %v543_v41, %v3868_v1  ;;  %v556_v52 = vmul.f32 %v544_v42, %v3868_v1  ;;  %v559_v53 = vmul.f32 %v545_v43, %v3877_v15  ;;  %v560_v54 = vmul.f32 %v546_v44, %v3877_v15 }
  0x76   : >> { %v563_v57 = vmul.f32 %v547_v45, %v3879_v16  ;;  %v564_v58 = vmul.f32 %v548_v46, %v3879_v16  ;;  %v567_v61 = vmul.f32 %v549_v47, %v3887_v23  ;;  %v568_v62 = vmul.f32 %v550_v48, %v3887_v23  ;;  %v597_v48 = vld [vmem:[#allocation16 + $0x28] sm:$0xff] (%p420_p4) }
  0x77   : >> { %v557_v55 = vadd.f32 %v555_v51, %v553_v49  ;;  %v558_v56 = vadd.f32 %v556_v52, %v554_v50  ;;  %v3968_v20 = vand.u32 (%p420_p4), 4294901760, %v604_v17  ;;  %v3970_v21 = vand.u32 (%p420_p4), 4294901760, %v603_v18 }
  0x78   : > { %v3972_v22 = vand.u32 (%p420_p4), 4294901760, %v602_v19  ;;  %v3985_v29 = vand.u32 (%p420_p4), 4294901760, %v601_v24  ;;  %v4001_v37 = vand.u32 (%p420_p4), 4294901760, %v600_v25  ;;  %v4005_v40 = vand.u32 (%p420_p4), 4294901760, %v599_v30 }
  0x79   : >> { %v561_v59 = vadd.f32 %v559_v53, %v557_v55  ;;  %v562_v60 = vadd.f32 %v560_v54, %v558_v56  ;;  %v3988_v31 = vsub.f32 (%p420_p4), %v604_v17, %v3968_v20  ;;  %v3991_v32 = vsub.f32 (%p420_p4), %v603_v18, %v3970_v21  ;;  %v596_v55 = vld [vmem:[#allocation16 + $0x20] sm:$0xff] (%p420_p4) }
  0x7a   : > { %v3994_v33 = vsub.f32 (%p420_p4), %v602_v19, %v3972_v22  ;;  %v4008_v41 = vsub.f32 (%p420_p4), %v601_v24, %v3985_v29  ;;  %v4023_v46 = vand.u32 (%p420_p4), 4294901760, %v598_v38  ;;  %v4032_v52 = vsub.f32 (%p420_p4), %v600_v25, %v4001_v37  ;;  %v592_v25 = vld [vmem:[#allocation16] sm:$0xff] (%p420_p4) }
  0x7b   : >> { %v565_v63 = vadd.f32 %v563_v57, %v561_v59  ;;  %v566_v0 = vadd.f32 %v564_v58, %v562_v60  ;;  %v5487_v39 = vand.u32 (%p420_p4), 4294901760, %v3988_v31  ;;  %v5486_v45 = vand.u32 (%p420_p4), 4294901760, %v3991_v32 }
  0x7c   : > { %v5485_v47 = vand.u32 (%p420_p4), 4294901760, %v3994_v33  ;;  %v5483_v53 = vand.u32 (%p420_p4), 4294901760, %v4008_v41  ;;  %v4037_v54 = vsub.f32 (%p420_p4), %v599_v30, %v4005_v40  ;;  %v4043_v58 = vand.u32 (%p420_p4), 4294901760, %v597_v48 }
  0x7d   : >> { %v569_v2 = vadd.f32 %v567_v61, %v565_v63  ;;  %v570_v3 = vadd.f32 %v568_v62, %v566_v0  ;;  %v742_v51 = vsub.f32 (%p420_p4), %v3988_v31, %v5487_v39  ;;  %v748_v57 = vsub.f32 (%p420_p4), %v3991_v32, %v5486_v45  ;;  %v595_v61 = vld [vmem:[#allocation16 + $0x18] sm:$0xff] (%p420_p4) }
  0x7e   : > { %v754_v59 = vsub.f32 (%p420_p4), %v3994_v33, %v5485_v47  ;;  %v4051_v60 = vsub.f32 (%p420_p4), %v598_v38, %v4023_v46  ;;  %v4054_v63 = vand.u32 (%p420_p4), 4294901760, %v596_v55  ;;  %v5482_v0 = vand.u32 (%p420_p4), 4294901760, %v4032_v52 }
  0x7f   : >> { %v571_v4 = vmul.f32 %v569_v2, %v3868_v1  ;;  %v572_v5 = vmul.f32 %v569_v2, %v3877_v15  ;;  %v579_v6 = vmul.f32 %v570_v3, %v3887_v23  ;;  %v577_v8 = vmul.f32 %v570_v3, %v3879_v16  ;;  %v607_v1 = vld [vmem:[#allocation16 + $0x78] sm:$0xff] (%p420_p4)  ;;  %v606_v15 = vld [vmem:[#allocation16 + $0x70] sm:$0xff] (%p420_p4)  ;;  %v605_v16 = vld [vmem:[#allocation16 + $0x68] sm:$0xff] (%p420_p4) }
  0x80   : > { %v3962_v23 = vand.u32 (%p420_p4), 4294901760, %v607_v1  ;;  %v3964_v13 = vand.u32 (%p420_p4), 4294901760, %v606_v15  ;;  %v3966_v14 = vand.u32 (%p420_p4), 4294901760, %v605_v16  ;;  %v743_v62 = vand.u32 (%p420_p4), 4294901760, %v742_v51 }
  0x81   : >> { %v574_v7 = vrot.slane %v572_v5, 4  ;;  %v581_v10 = vrot.slane %v579_v6, 4  ;;  %v760_v2 = vsub.f32 (%p420_p4), %v4008_v41, %v5483_v53  ;;  %v5481_v3 = vand.u32 (%p420_p4), 4294901760, %v4037_v54  ;;  %v1202_v53 = vld [vmem:[#allocation16 + $0xd8] sm:$0xff] (%p420_p4) }
  0x82   : > { %625 = vmatpush.msra.mxu0 (%p420_p4), %v3962_v23  ;;  %v3976_v26 = vsub.f32 (%p420_p4), %v607_v1, %v3962_v23  ;;  %v3979_v27 = vsub.f32 (%p420_p4), %v606_v15, %v3964_v13  ;;  %940 = vmatpush.msra.mxu3 (%p420_p4), %v3962_v23  ;;  %v3983_v28 = vsub.f32 (%p420_p4), %v605_v16, %v3966_v14  ;;  %v749_v6 = vand.u32 (%p420_p4), 4294901760, %v748_v57 }
  0x83   : >> { %v576_v9 = vadd.f32 %v574_v7, %v571_v4  ;;  %v594_v4 = vld [vmem:[#allocation16 + $0x10] sm:$0xff] (%p420_p4)  ;;  %v4064_v7 = vand.u32 (%p420_p4), 4294901760, %v595_v61  ;;  %v766_v1 = vsub.f32 (%p420_p4), %v4032_v52, %v5482_v0  ;;  %v4079_v16 = vsub.f32 (%p420_p4), %v596_v55, %v4054_v63 }
  0x84   : > { %627 = vmatpush.msra.mxu0 (%p420_p4), %v3964_v13  ;;  %852 = vmatpush.msra.mxu2 (%p420_p4), %v3976_v26  ;;  %v5491_v34 = vand.u32 (%p420_p4), 4294901760, %v3976_v26  ;;  %v5490_v35 = vand.u32 (%p420_p4), 4294901760, %v3979_v27  ;;  %v5488_v36 = vand.u32 (%p420_p4), 4294901760, %v3983_v28  ;;  %v4076_v15 = vand.u32 (%p420_p4), 4294901760, %v594_v4 }
  0x85   : >> { %v578_v11 = vadd.f32 %v577_v8, %v576_v9  ;;  %942 = vmatpush.msra.mxu3 (%p420_p4), %v3964_v13  ;;  %v4067_v8 = vsub.f32 (%p420_p4), %v597_v48, %v4043_v58  ;;  %v593_v9 = vld [vmem:[#allocation16 + $0x8] sm:$0xff] (%p420_p4)  ;;  %v761_v18 = vand.u32 (%p420_p4), 4294901760, %v760_v2  ;;  %v772_v19 = vsub.f32 (%p420_p4), %v4037_v54, %v5481_v3  ;;  %v1205_v48 = vld [vmem:[#allocation16 + $0xf0] sm:$0xff] (%p420_p4) }
  0x86   : > { %629 = vmatpush.msra.mxu0 (%p420_p4), %v3966_v14  ;;  %855 = vmatpush.msra.mxu2 (%p420_p4), %v3979_v27  ;;  %v724_v42 = vsub.f32 (%p420_p4), %v3976_v26, %v5491_v34  ;;  %v730_v43 = vsub.f32 (%p420_p4), %v3979_v27, %v5490_v35  ;;  %v736_v44 = vsub.f32 (%p420_p4), %v3983_v28, %v5488_v36  ;;  %v4088_v24 = vand.u32 (%p420_p4), 4294901760, %v593_v9  ;;  %v1201_v34 = vld [vmem:[#allocation16 + $0xd0] sm:$0xff] (%p420_p4) }
  0x87   : >> { %v583_v12 = vadd.f32 %v581_v10, %v578_v11  ;;  %944 = vmatpush.msra.mxu3 (%p420_p4), %v3966_v14  ;;  %v755_v10 = vand.u32 (%p420_p4), 4294901760, %v754_v59  ;;  %v5480_v11 = vand.u32 (%p420_p4), 4294901760, %v4051_v60  ;;  %v5478_v30 = vand.u32 (%p420_p4), 4294901760, %v4067_v8 }
  0x88   : > { %422 = sbr.rel (!%p420_p4) target bundleno = 88 (0x58), region = 153  ;;  %631 = vmatpush.msra.mxu0 (%p420_p4), %v3968_v20  ;;  %v725_v49 = vand.u32 (%p420_p4), 4294901760, %v724_v42  ;;  %858 = vmatpush.msra.mxu2 (%p420_p4), %v3983_v28  ;;  %v731_v50 = vand.u32 (%p420_p4), 4294901760, %v730_v43  ;;  %v737_v56 = vand.u32 (%p420_p4), 4294901760, %v736_v44  ;;  %5620 = vst [vmem:[#allocation34_spill] sm:$0xff] (%p420_p4), %v4088_v24  ;;  %v4093_v38 = vsub.f32 (%p420_p4), %v595_v61, %v4064_v7 }
  0x89   : >> { %585 = vst [vmem:[%s584_s26] sm:$0x1] %v583_v12  ;;  %946 = vmatpush.msra.mxu3 (%p420_p4), %v3968_v20  ;;  %v4106_v51 = vand.u32 (%p420_p4), 4294901760, %v592_v25  ;;  %v5479_v55 = vand.u32 (%p420_p4), 4294901760, %v4079_v16  ;;  %v773_v57 = vand.u32 (%p420_p4), 4294901760, %v772_v19  ;;  %v784_v2 = vsub.f32 (%p420_p4), %v4067_v8, %v5478_v30  ;;  %v1203_v30 = vld [vmem:[#allocation16 + $0xe0] sm:$0xff] (%p420_p4) }
  0x8a   : >> { %587 = vst [vmem:[%s586_s14 - $0x1] sm:$0x2] %v583_v12  ;;  %633 = vmatpush.msra.mxu0 (%p420_p4), %v3970_v21  ;;  %726 = vmatpush.msra.mxu1 (%p420_p4), %v725_v49  ;;  %v778_v49 = vsub.f32 (%p420_p4), %v4051_v60, %v5480_v11  ;;  %v4187_v35 = vand.u32 (%p420_p4), 4294901760, %v1202_v53 }
  0x8b   : >> { %589 = vst [vmem:[%s588_s24 - $0x2] sm:$0x4] %v583_v12  ;;  %861 = vmatpush.msra.mxu2 (%p420_p4), %v3988_v31  ;;  %948 = vmatpush.msra.mxu3 (%p420_p4), %v3970_v21 }
  0x8c   : >> { %591 = vst [vmem:[%s590_s15 - $0x3] sm:$0x8] %v583_v12  ;;  %635 = vmatpush.msra.mxu0 (%p420_p4), %v3972_v22  ;;  %732 = vmatpush.msra.mxu1 (%p420_p4), %v731_v50  ;;  %v1206_v12 = vld [vmem:[#allocation16 + $0xf8] sm:$0xff] (%p420_p4)  ;;  %v767_v50 = vand.u32 (%p420_p4), 4294901760, %v766_v1  ;;  %v779_v1 = vand.u32 (%p420_p4), 4294901760, %v778_v49 }
  0x8d   : > { %864 = vmatpush.msra.mxu2 %v3991_v32  ;;  %950 = vmatpush.msra.mxu3 %v3972_v22  ;;  %v4098_v43 = vand.u32 4294901760, %v1206_v12  ;;  %5621 = vst [vmem:[#allocation35_spill] sm:$0xff] %v4106_v51 }
  0x8e   : > { %637 = vmatpush.msra.mxu0 %v3985_v29  ;;  %738 = vmatpush.msra.mxu1 %v737_v56  ;;  %v4110_v56 = vsub.f32 %v594_v4, %v4076_v15  ;;  %v5484_v4 = vand.u32 4294901760, %v4093_v38 }
  0x8f   : > { %867 = vmatpush.msra.mxu2 %v3994_v33  ;;  %952 = vmatpush.msra.mxu3 %v3985_v29 }
  0x90   : > { %v608_v5 = vld [vmem:[#allocation2] sm:$0xff]  ;;  %639 = vmatpush.msra.mxu0 %v4001_v37  ;;  %744 = vmatpush.msra.mxu1 %v743_v62  ;;  %v609_v44 = vld [vmem:[#allocation2 + $0x8] sm:$0xff]  ;;  %v4117_v62 = vand.u32 4294901760, %v1205_v48  ;;  %v5489_v19 = vand.u32 4294901760, %v4110_v56  ;;  %v610_v0 = vld [vmem:[#allocation2 + $0x10] sm:$0xff] }
  0x91   : > { %v4081_v17 = vand.u32 4294901760, %v608_v5  ;;  %870 = vmatpush.msra.mxu2 %v4008_v41  ;;  %954 = vmatpush.msra.mxu3 %v4001_v37  ;;  %v4115_v61 = vand.u32 4294901760, %v609_v44 }
  0x92   : > { %641 = vmatpush.msra.mxu0 %v4005_v40  ;;  %750 = vmatpush.msra.mxu1 %v749_v6  ;;  %v4128_v6 = vsub.f32 %v1206_v12, %v4098_v43  ;;  %v4141_v12 = vsub.f32 %v1205_v48, %v4117_v62  ;;  %v796_v48 = vsub.f32 %v4093_v38, %v5484_v4 }
  0x93   : > { %5619 = vst [vmem:[#allocation33_spill] sm:$0xff] %v4081_v17  ;;  %v4096_v42 = vsub.f32 %v608_v5, %v4081_v17  ;;  %873 = vmatpush.msra.mxu2 %v4032_v52  ;;  %956 = vmatpush.msra.mxu3 %v4005_v40  ;;  %v4125_v5 = vsub.f32 %v593_v9, %v4088_v24 }
  0x94   : > { %643 = vmatpush.msra.mxu0 %v4023_v46  ;;  %756 = vmatpush.msra.mxu1 %v755_v10  ;;  %5622 = vst [vmem:[#allocation36_spill] sm:$0xff] %v4115_v61  ;;  %v1204_v10 = vld [vmem:[#allocation16 + $0xe8] sm:$0xff]  ;;  %v4138_v9 = vsub.f32 %v592_v25, %v4106_v51  ;;  %v785_v25 = vand.u32 4294901760, %v784_v2  ;;  %v4159_v3 = vand.u32 4294901760, %v4128_v6  ;;  %v802_v2 = vsub.f32 %v4110_v56, %v5489_v19 }
  0x95   : > { %876 = vmatpush.msra.mxu2 %v4037_v54  ;;  %958 = vmatpush.msra.mxu3 %v4023_v46  ;;  %v5493_v59 = vand.u32 4294901760, %v4096_v42  ;;  %5623 = vst [vmem:[#allocation37_spill] sm:$0xff] %v4128_v6  ;;  %v5492_v11 = vand.u32 4294901760, %v4125_v5  ;;  %v4171_v47 = vand.u32 4294901760, %v4141_v12 }
  0x96   : > { %645 = vmatpush.msra.mxu0 %v4043_v58  ;;  %762 = vmatpush.msra.mxu1 %v761_v18  ;;  %v790_v18 = vsub.f32 %v4079_v16, %v5479_v55  ;;  %5624 = vst [vmem:[#allocation38_spill] sm:$0xff] %v4138_v9  ;;  %v4151_v55 = vand.u32 4294901760, %v1204_v10  ;;  %v5498_v4 = vand.u32 4294901760, %v4138_v9 }
  0x97   : > { %879 = vmatpush.msra.mxu2 %v4051_v60  ;;  %960 = vmatpush.msra.mxu3 %v4043_v58  ;;  %5625 = vst [vmem:[#allocation39_spill] sm:$0xff] %v4141_v12  ;;  %v659_v49 = vsub.f32 %v4096_v42, %v5493_v59  ;;  %v808_v19 = vsub.f32 %v4125_v5, %v5492_v11  ;;  %v1200_v59 = vld [vmem:[#allocation16 + $0xc8] sm:$0xff] }
  0x98   : > { %647 = vmatpush.msra.mxu0 %v4054_v63  ;;  %768 = vmatpush.msra.mxu1 %v767_v50  ;;  %v4149_v50 = vsub.f32 %v609_v44, %v4115_v61  ;;  %5626 = vst [vmem:[#allocation40_spill] sm:$0xff] %v4159_v3  ;;  %v4163_v44 = vand.u32 4294901760, %v1203_v30  ;;  %v4177_v36 = vsub.f32 %v1204_v10, %v4151_v55 }
  0x99   : > { %882 = vmatpush.msra.mxu2 %v4067_v8  ;;  %962 = vmatpush.msra.mxu3 %v4054_v63  ;;  %5627 = vst [vmem:[#allocation41_spill] sm:$0xff] %v4171_v47  ;;  %v660_v45 = vand.u32 4294901760, %v659_v49  ;;  %v1324_v49 = vsub.f32 %v4128_v6, %v4159_v3  ;;  %v1330_v11 = vsub.f32 %v4141_v12, %v4171_v47  ;;  %v4210_v3 = vand.u32 4294901760, %v1201_v34 }
  0x9a   : > { %649 = vmatpush.msra.mxu0 %v4064_v7  ;;  %774 = vmatpush.msra.mxu1 %v773_v57  ;;  %v791_v57 = vand.u32 4294901760, %v790_v18  ;;  %v5501_v39 = vand.u32 4294901760, %v4149_v50  ;;  %5628 = vst [vmem:[#allocation42_spill] sm:$0xff] %v4177_v36  ;;  %v797_v18 = vand.u32 4294901760, %v796_v48  ;;  %v4192_v10 = vsub.f32 %v1203_v30, %v4163_v44 }
  0x9b   : > { %885 = vmatpush.msra.mxu2 %v4079_v16  ;;  %964 = vmatpush.msra.mxu3 %v4064_v7  ;;  %v814_v48 = vsub.f32 %v4138_v9, %v5498_v4  ;;  %v4205_v6 = vand.u32 4294901760, %v4177_v36  ;;  %v809_v4 = vand.u32 4294901760, %v808_v19  ;;  %v4216_v12 = vsub.f32 %v1202_v53, %v4187_v35 }
  0x9c   : > { %651 = vmatpush.msra.mxu0 %v4076_v15  ;;  %780 = vmatpush.msra.mxu1 %v779_v1  ;;  %v4179_v1 = vand.u32 4294901760, %v610_v0  ;;  %5630 = vst [vmem:[#allocation44_spill] sm:$0xff] %v4192_v10  ;;  %v667_v30 = vsub.f32 %v4149_v50, %v5501_v39  ;;  %v5634_v39 = vand.u32 4294901760, %v4096_v42  ;;  %v4224_v47 = vand.u32 4294901760, %v1200_v59 }
  0x9d   : > { %888 = vmatpush.msra.mxu2 %v4093_v38  ;;  %966 = vmatpush.msra.mxu3 %v4076_v15  ;;  %5631 = vst [vmem:[#allocation45_spill] sm:$0xff] %v4205_v6  ;;  %v815_v19 = vand.u32 4294901760, %v814_v48  ;;  %v5637_v53 = vand.u32 4294901760, %v3976_v26  ;;  %v1198_v48 = vld [vmem:[#allocation16 + $0xb8] sm:$0xff]  ;;  %v5640_v26 = vand.u32 4294901760, %v3979_v27 }
  0x9e   : > { %5629 = vst [vmem:[#allocation43_spill] sm:$0xff] %v4179_v1  ;;  %653 = vmatpush.msra.mxu0 %v4088_v24  ;;  %786 = vmatpush.msra.mxu1 %v785_v25  ;;  %v803_v25 = vand.u32 4294901760, %v802_v2  ;;  %v611_v2 = vld [vmem:[#allocation2 + $0x18] sm:$0xff] }
  0x9f   : > { %891 = vmatpush.msra.mxu2 %v4110_v56  ;;  %968 = vmatpush.msra.mxu3 %v4088_v24  ;;  %5633 = vst [vmem:[#allocation47_spill] sm:$0xff] %v4216_v12  ;;  %v1199_v24 = vld [vmem:[#allocation16 + $0xc0] sm:$0xff] }
  0xa0   : > { %655 = vmatpush.msra.mxu0 %v4106_v51  ;;  %792 = vmatpush.msra.mxu1 %v791_v57  ;;  %v4208_v57 = vsub.f32 %v610_v0, %v4179_v1  ;;  %v4222_v0 = vand.u32 4294901760, %v4192_v10 }
  0xa1   : > { %661 = vmatmul.f32.vlgmr.msra.gmra.mxu0 %v660_v45  ;;  %894 = vmatpush.msra.mxu2 %v4125_v5  ;;  %v4213_v45 = vand.u32 4294901760, %v1324_v49  ;;  %v4229_v49 = vand.u32 4294901760, %v611_v2 }
  0xa2   : > { %798 = vmatpush.msra.mxu1 %v797_v18  ;;  %970 = vmatpush.msra.mxu3 %v4106_v51  ;;  %5635 = vst [vmem:[#allocation48_spill] sm:$0xff] %v4222_v0  ;;  %v4227_v18 = vand.u32 4294901760, %v1330_v11  ;;  %v1336_v51 = vsub.f32 %v4177_v36, %v4205_v6  ;;  %v4242_v11 = vand.u32 4294901760, %v4216_v12 }
  0xa3   : > { %5632 = vst [vmem:[#allocation46_spill] sm:$0xff] %v4213_v45  ;;  %897 = vmatpush.msra.mxu2 %v4138_v9  ;;  %974 = vmatmul.f32.vlgmr.msra.gmra.mxu3 %v5634_v39  ;;  %v668_v39 = vand.u32 4294901760, %v667_v30  ;;  %v5509_v9 = vand.u32 4294901760, %v4208_v57  ;;  %v1342_v30 = vsub.f32 %v4192_v10, %v4222_v0 }
  0xa4   : > { %804 = vmatpush.msra.mxu1 %v803_v25  ;;  %900 = vmatmul.f32.vlgmr.msra.gmra.mxu2 %v4096_v42  ;;  %5636 = vst [vmem:[#allocation49_spill] sm:$0xff] %v4227_v18  ;;  %v4238_v25 = vsub.f32 %v1201_v34, %v4210_v3  ;;  %v4244_v42 = vand.u32 4294901760, %v1199_v24  ;;  %v4252_v34 = vsub.f32 %v1200_v59, %v4224_v47  ;;  %v4267_v59 = vand.u32 4294901760, %v1198_v48 }
  0xa5   : > { %1225 = vmatpush.msrb.mxu2 %v4098_v43  ;;  %1023 = vmatpush.msrb.mxu0 %v5637_v53  ;;  %5639 = vst [vmem:[#allocation51_spill] sm:$0xff] %v4242_v11  ;;  %v4259_v53 = vand.u32 4294901760, %v1336_v51  ;;  %v675_v27 = vsub.f32 %v4208_v57, %v5509_v9  ;;  %v5646_v9 = vand.u32 4294901760, %v3983_v28 }
  0xa6   : > { %5638 = vst [vmem:[#allocation50_spill] sm:$0xff] %v4238_v25  ;;  %810 = vmatpush.msra.mxu1 %v809_v4  ;;  %1326 = vmatpush.msrb.mxu3 %v4213_v45  ;;  %v4256_v4 = vsub.f32 %v611_v2, %v4229_v49  ;;  %v1348_v2 = vsub.f32 %v4216_v12, %v4242_v11  ;;  %v4280_v45 = vand.u32 4294901760, %v1342_v30  ;;  %v1196_v12 = vld [vmem:[#allocation16 + $0xa8] sm:$0xff] }
  0xa7   : > { %1227 = vmatpush.msrb.mxu2 %v4117_v62  ;;  %1027 = vmatpush.msrb.mxu0 %v5640_v26  ;;  %5641 = vst [vmem:[#allocation52_spill] sm:$0xff] %v4252_v34  ;;  %v4265_v26 = vand.u32 4294901760, %v4238_v25  ;;  %v4274_v51 = vsub.f32 %v1199_v24, %v4244_v42  ;;  %v4297_v30 = vsub.f32 %v1198_v48, %v4267_v59 }
  0xa8   : > { %816 = vmatpush.msra.mxu1 %v815_v19  ;;  %1332 = vmatpush.msrb.mxu3 %v4227_v18  ;;  %5642 = vst [vmem:[#allocation53_spill] sm:$0xff] %v4259_v53  ;;  %v1197_v19 = vld [vmem:[#allocation16 + $0xb0] sm:$0xff]  ;;  %v5645_v18 = vand.u32 4294901760, %v4149_v50 }
  0xa9   : > { %669 = vmatmul.f32.gmra.mxu0 %v668_v39  ;;  %818 = vmatmul.f32.vlgmr.msra.gmra.mxu1 %v4081_v17  ;;  %5643 = vst [vmem:[#allocation54_spill] sm:$0xff] %v4265_v26  ;;  %v612_v39 = vld [vmem:[#allocation2 + $0x20] sm:$0xff]  ;;  %v4283_v17 = vand.u32 4294901760, %v4252_v34  ;;  %v1354_v28 = vsub.f32 %v4238_v25, %v4265_v26  ;;  %v4305_v24 = vand.u32 4294901760, %v4274_v51 }
  0xaa   : > { %1118 = vmatpush.msrb.mxu1 %v3962_v23  ;;  %1229 = vmatpush.msrb.mxu2 %v4151_v55  ;;  %5644 = vst [vmem:[#allocation55_spill] sm:$0xff] %v4274_v51  ;;  %v4285_v23 = vand.u32 4294901760, %v1197_v19 }
  0xab   : > { %980 = vmatmul.f32.gmra.mxu3 %v5645_v18  ;;  %1031 = vmatpush.msrb.mxu0 %v5646_v9  ;;  %5647 = vst [vmem:[#allocation56_spill] sm:$0xff] %v4280_v45  ;;  %v676_v18 = vand.u32 4294901760, %v675_v27  ;;  %v4294_v9 = vand.u32 4294901760, %v612_v39  ;;  %v4307_v27 = vand.u32 4294901760, %v1196_v12  ;;  %v1360_v48 = vsub.f32 %v4252_v34, %v4283_v17  ;;  %v613_v34 = vld [vmem:[#allocation2 + $0x28] sm:$0xff] }
  0xac   : > { %5648 = vst [vmem:[#allocation57_spill] sm:$0xff] %v4283_v17  ;;  %905 = vmatmul.f32.gmra.mxu2 %v4149_v50  ;;  %1120 = vmatpush.msrb.mxu1 %v3964_v13  ;;  %v5650_v13 = vand.u32 4294901760, %v3988_v31  ;;  %v4302_v50 = vand.u32 4294901760, %v1348_v2  ;;  %v5655_v31 = vand.u32 4294901760, %v4256_v4 }
  0xad   : > { %1338 = vmatpush.msrb.mxu3 %v4259_v53  ;;  %1231 = vmatpush.msrb.mxu2 %v4163_v44  ;;  %5649 = vst [vmem:[#allocation58_spill] sm:$0xff] %v4297_v30  ;;  %v4314_v53 = vsub.f32 %v1197_v19, %v4285_v23  ;;  %v4329_v19 = vand.u32 4294901760, %v4297_v30 }
  0xae   : > { %1122 = vmatpush.msrb.mxu1 %v3966_v14  ;;  %1035 = vmatpush.msrb.mxu0 %v5650_v13  ;;  %5651 = vst [vmem:[#allocation59_spill] sm:$0xff] %v4302_v50  ;;  %v5654_v14 = vand.u32 4294901760, %v3991_v32  ;;  %v683_v2 = vsub.f32 %v4256_v4, %v5655_v31  ;;  %v4323_v13 = vand.u32 4294901760, %v1354_v28  ;;  %v1366_v32 = vsub.f32 %v4274_v51, %v4305_v24 }
  0xaf   : > { %5652 = vst [vmem:[#allocation60_spill] sm:$0xff] %v4305_v24  ;;  %1344 = vmatpush.msrb.mxu3 %v4280_v45  ;;  %1233 = vmatpush.msrb.mxu2 %v4187_v35  ;;  %v4326_v45 = vsub.f32 %v612_v39, %v4294_v9  ;;  %v5660_v39 = vand.u32 4294901760, %v4208_v57  ;;  %v4346_v31 = vand.u32 4294901760, %v4314_v53 }
  0xb0   : > { %5653 = vst [vmem:[#allocation61_spill] sm:$0xff] %v4314_v53  ;;  %1124 = vmatpush.msrb.mxu1 %v3968_v20  ;;  %1039 = vmatpush.msrb.mxu0 %v5654_v14  ;;  %v1195_v20 = vld [vmem:[#allocation16 + $0xa0] sm:$0xff]  ;;  %v4343_v14 = vand.u32 4294901760, %v1360_v48  ;;  %v1372_v48 = vsub.f32 %v4297_v30, %v4329_v19 }
  0xb1   : > { %677 = vmatmul.f32.gmra.mxu0 %v676_v18  ;;  %822 = vmatmul.f32.gmra.mxu1 %v4115_v61  ;;  %5656 = vst [vmem:[#allocation62_spill] sm:$0xff] %v4323_v13  ;;  %v4336_v18 = vsub.f32 %v1196_v12, %v4307_v27  ;;  %v4338_v28 = vand.u32 4294901760, %v1195_v20  ;;  %v4351_v12 = vand.u32 4294901760, %v613_v34  ;;  %v1194_v61 = vld [vmem:[#allocation16 + $0x98] sm:$0xff] }
  0xb2   : > { %5657 = vst [vmem:[#allocation63_spill] sm:$0xff] %v4329_v19  ;;  %1350 = vmatpush.msrb.mxu3 %v4302_v50  ;;  %1126 = vmatpush.msrb.mxu1 %v3970_v21  ;;  %v684_v21 = vand.u32 4294901760, %v683_v2  ;;  %v5663_v50 = vand.u32 4294901760, %v3994_v33  ;;  %v5666_v33 = vand.u32 4294901760, %v4008_v41  ;;  %v5670_v41 = vand.u32 4294901760, %v4032_v52 }
  0xb3   : > { %5658 = vst [vmem:[#allocation64_spill] sm:$0xff] %v4336_v18  ;;  %986 = vmatmul.f32.gmra.mxu3 %v5660_v39  ;;  %1235 = vmatpush.msrb.mxu2 %v4210_v3  ;;  %v4359_v51 = vsub.f32 %v1195_v20, %v4338_v28  ;;  %v4369_v2 = vand.u32 4294901760, %v4336_v18  ;;  %v1193_v39 = vld [vmem:[#allocation16 + $0x90] sm:$0xff] }
  0xb4   : > { %5659 = vst [vmem:[#allocation65_spill] sm:$0xff] %v4338_v28  ;;  %910 = vmatmul.f32.gmra.mxu2 %v4208_v57  ;;  %1043 = vmatpush.msrb.mxu0 %v5663_v50  ;;  %v4361_v57 = vand.u32 4294901760, %v1194_v61  ;;  %v4366_v50 = vand.u32 4294901760, %v1366_v32  ;;  %v4382_v32 = vsub.f32 %v613_v34, %v4351_v12  ;;  %v614_v34 = vld [vmem:[#allocation2 + $0x30] sm:$0xff] }
  0xb5   : > { %5661 = vst [vmem:[#allocation66_spill] sm:$0xff] %v4343_v14  ;;  %1356 = vmatpush.msrb.mxu3 %v4323_v13  ;;  %1128 = vmatpush.msrb.mxu1 %v3972_v22  ;;  %v1378_v22 = vsub.f32 %v4314_v53, %v4346_v31  ;;  %v4393_v13 = vand.u32 4294901760, %v4359_v51  ;;  %v1192_v53 = vld [vmem:[#allocation16 + $0x88] sm:$0xff]  ;;  %v1384_v52 = vsub.f32 %v4336_v18, %v4369_v2 }
  0xb6   : > { %5662 = vst [vmem:[#allocation67_spill] sm:$0xff] %v4346_v31  ;;  %1237 = vmatpush.msrb.mxu2 %v4224_v47  ;;  %1047 = vmatpush.msrb.mxu0 %v5666_v33  ;;  %v4376_v20 = vsub.f32 %v1194_v61, %v4361_v57  ;;  %v4384_v33 = vand.u32 4294901760, %v1193_v39  ;;  %v4390_v61 = vand.u32 4294901760, %v1372_v48  ;;  %v5676_v48 = vand.u32 4294901760, %v4256_v4 }
  0xb7   : > { %5664 = vst [vmem:[#allocation68_spill] sm:$0xff] %v4359_v51  ;;  %1362 = vmatpush.msrb.mxu3 %v4343_v14  ;;  %1130 = vmatpush.msrb.mxu1 %v3985_v29  ;;  %v5672_v29 = vand.u32 4294901760, %v4326_v45 }
  0xb8   : > { %5665 = vst [vmem:[#allocation69_spill] sm:$0xff] %v4361_v57  ;;  %1239 = vmatpush.msrb.mxu2 %v4244_v42  ;;  %1051 = vmatpush.msrb.mxu0 %v5670_v41  ;;  %v4402_v41 = vand.u32 4294901760, %v1192_v53 }
  0xb9   : > { %5667 = vst [vmem:[#allocation70_spill] sm:$0xff] %v4366_v50  ;;  %685 = vmatmul.f32.gmra.mxu0 %v684_v21  ;;  %826 = vmatmul.f32.gmra.mxu1 %v4179_v1  ;;  %v691_v14 = vsub.f32 %v4326_v45, %v5672_v29  ;;  %v4400_v21 = vsub.f32 %v1193_v39, %v4384_v33  ;;  %v4407_v29 = vand.u32 4294901760, %v1378_v22  ;;  %v5679_v1 = vand.u32 4294901760, %v4037_v54 }
  0xba   : > { %5668 = vst [vmem:[#allocation71_spill] sm:$0xff] %v4369_v2  ;;  %1368 = vmatpush.msrb.mxu3 %v4366_v50  ;;  %1132 = vmatpush.msrb.mxu1 %v4001_v37  ;;  %v4410_v50 = vand.u32 4294901760, %v4376_v20  ;;  %v1191_v37 = vld [vmem:[#allocation16 + $0x80] sm:$0xff]  ;;  %v698_v39 = vand.u32 4294901760, %v4382_v32  ;;  %v4420_v22 = vand.u32 4294901760, %v614_v34  ;;  %v4425_v31 = vsub.f32 %v1192_v53, %v4402_v41 }
  0xbb   : > { %5669 = vst [vmem:[#allocation72_spill] sm:$0xff] %v4376_v20  ;;  %992 = vmatmul.f32.gmra.mxu3 %v5676_v48  ;;  %1241 = vmatpush.msrb.mxu2 %v4267_v59  ;;  %v4416_v18 = vand.u32 4294901760, %v1191_v37  ;;  %v692_v2 = vand.u32 4294901760, %v691_v14  ;;  %v1390_v48 = vsub.f32 %v4359_v51, %v4393_v13  ;;  %v5682_v54 = vand.u32 4294901760, %v4051_v60 }
  0xbc   : > { %5671 = vst [vmem:[#allocation73_spill] sm:$0xff] %v4384_v33  ;;  %915 = vmatmul.f32.gmra.mxu2 %v4256_v4  ;;  %1055 = vmatpush.msrb.mxu0 %v5679_v1  ;;  %v4430_v1 = vand.u32 4294901760, %v1384_v52  ;;  %v4433_v4 = vand.u32 4294901760, %v4400_v21  ;;  %v5686_v60 = vand.u32 4294901760, %v4067_v8  ;;  %v699_v14 = vsub.f32 %v4382_v32, %v698_v39 }
  0xbd   : > { %5673 = vst [vmem:[#allocation74_spill] sm:$0xff] %v4393_v13  ;;  %1374 = vmatpush.msrb.mxu3 %v4390_v61  ;;  %1134 = vmatpush.msrb.mxu1 %v4005_v40  ;;  %v1396_v40 = vsub.f32 %v4376_v20, %v4410_v50  ;;  %v4440_v53 = vsub.f32 %v1191_v37, %v4416_v18  ;;  %v615_v37 = vld [vmem:[#allocation2 + $0x38] sm:$0xff] }
  0xbe   : > { %5674 = vst [vmem:[#allocation75_spill] sm:$0xff] %v4400_v21  ;;  %1243 = vmatpush.msrb.mxu2 %v4285_v23  ;;  %1059 = vmatpush.msrb.mxu0 %v5682_v54  ;;  %v705_v52 = vsub.f32 %v614_v34, %v4420_v22  ;;  %v4448_v54 = vand.u32 4294901760, %v1390_v48  ;;  %v1402_v8 = vsub.f32 %v4400_v21, %v4433_v4  ;;  %v5690_v48 = vand.u32 4294901760, %v4079_v16 }
  0xbf   : > { %5675 = vst [vmem:[#allocation76_spill] sm:$0xff] %v4402_v41  ;;  %1380 = vmatpush.msrb.mxu3 %v4407_v29  ;;  %1136 = vmatpush.msrb.mxu1 %v4023_v46  ;;  %v4451_v46 = vand.u32 4294901760, %v4425_v31  ;;  %v4463_v34 = vand.u32 4294901760, %v4440_v53 }
  0xc0   : > { %5677 = vst [vmem:[#allocation77_spill] sm:$0xff] %v4407_v29  ;;  %1245 = vmatpush.msrb.mxu2 %v4307_v27  ;;  %1063 = vmatpush.msrb.mxu0 %v5686_v60  ;;  %v4460_v60 = vand.u32 4294901760, %v1396_v40  ;;  %v4470_v29 = vand.u32 4294901760, %v615_v37 }
  0xc1   : > { %5678 = vst [vmem:[#allocation78_spill] sm:$0xff] %v4410_v50  ;;  %693 = vmatmul.f32.gmra.mxu0 %v692_v2  ;;  %830 = vmatmul.f32.gmra.mxu1 %v4229_v49  ;;  %v5688_v2 = vand.u32 4294901760, %v4326_v45  ;;  %v1408_v40 = vsub.f32 %v4425_v31, %v4451_v46  ;;  %v1414_v16 = vsub.f32 %v4440_v53, %v4463_v34 }
  0xc2   : > { %5680 = vst [vmem:[#allocation79_spill] sm:$0xff] %v4416_v18  ;;  %1386 = vmatpush.msrb.mxu3 %v4430_v1  ;;  %1138 = vmatpush.msrb.mxu1 %v4043_v58  ;;  %v700_v58 = vand.u32 4294901760, %v699_v14 }
  0xc3   : > { %5681 = vst [vmem:[#allocation80_spill] sm:$0xff] %v4425_v31  ;;  %998 = vmatmul.f32.gmra.mxu3 %v5688_v2  ;;  %1247 = vmatpush.msrb.mxu2 %v4338_v28  ;;  %v5691_v2 = vand.u32 4294901760, %v4093_v38  ;;  %v713_v38 = vsub.f32 %v615_v37, %v4470_v29  ;;  %v5694_v37 = vld [vmem:[#allocation34_spill] sm:$0xff] }
  0xc4   : > { %5683 = vst [vmem:[#allocation81_spill] sm:$0xff] %v4430_v1  ;;  %920 = vmatmul.f32.gmra.mxu2 %v4326_v45  ;;  %1067 = vmatpush.msrb.mxu0 %v5690_v48  ;;  %v706_v1 = vand.u32 4294901760, %v705_v52  ;;  %v4477_v45 = vand.u32 4294901760, %v1402_v8  ;;  %v4488_v8 = vand.u32 4294901760, %v1408_v40  ;;  %v1207_v40 = vld [vmem:[#allocation3] sm:$0xff] }
  0xc5   : > { %5684 = vst [vmem:[#allocation82_spill] sm:$0xff] %v4433_v4  ;;  %1392 = vmatpush.msrb.mxu3 %v4448_v54  ;;  %1140 = vmatpush.msrb.mxu1 %v4054_v63  ;;  %v5692_v63 = vand.u32 4294901760, %v4110_v56  ;;  %v5693_v56 = vand.u32 4294901760, %v4125_v5  ;;  %v5698_v5 = vld [vmem:[#allocation40_spill] sm:$0xff] }
  0xc6   : > { %5685 = vst [vmem:[#allocation83_spill] sm:$0xff] %v4440_v53  ;;  %1249 = vmatpush.msrb.mxu2 %v4361_v57  ;;  %1071 = vmatpush.msrb.mxu0 %v5691_v2  ;;  %v707_v14 = vsub.f32 %v705_v52, %v706_v1  ;;  %v5695_v2 = vld [vmem:[#allocation38_spill] sm:$0xff] }
  0xc7   : > { %5687 = vst [vmem:[#allocation84_spill] sm:$0xff] %v4451_v46  ;;  %1398 = vmatpush.msrb.mxu3 %v4460_v60  ;;  %1142 = vmatpush.msrb.mxu1 %v4064_v7  ;;  %v4493_v7 = vand.u32 4294901760, %v1414_v16 }
  0xc8   : > { %5689 = vst [vmem:[#allocation85_spill] sm:$0xff] %v4463_v34  ;;  %1251 = vmatpush.msrb.mxu2 %v4384_v33  ;;  %1075 = vmatpush.msrb.mxu0 %v5692_v63  ;;  %v708_v48 = vand.u32 4294901760, %v707_v14  ;;  %v5696_v63 = vand.u32 4294901760, %v5695_v2  ;;  %v5700_v14 = vld [vmem:[#allocation41_spill] sm:$0xff] }
  0xc9   : > { %701 = vmatmul.f32.gmra.mxu0 %v700_v58  ;;  %834 = vmatmul.f32.gmra.mxu1 %v4294_v9  ;;  %v714_v58 = vand.u32 4294901760, %v713_v38 }
  0xca   : > { %1404 = vmatpush.msrb.mxu3 %v4477_v45  ;;  %1144 = vmatpush.msrb.mxu1 %v4076_v15  ;;  %v5697_v15 = vld [vmem:[#allocation35_spill] sm:$0xff] }
  0xcb   : > { %1004 = vmatmul.f32.gmra.mxu3 %v698_v39  ;;  %1253 = vmatpush.msrb.mxu2 %v4402_v41  ;;  %v5699_v39 = vld [vmem:[#allocation37_spill] sm:$0xff]  ;;  %v715_v16 = vsub.f32 %v713_v38, %v714_v58 }
  0xcc   : > { %925 = vmatmul.f32.gmra.mxu2 %v4382_v32  ;;  %1079 = vmatpush.msrb.mxu0 %v5693_v56  ;;  %v4505_v32 = vand.u32 4294901760, %v1207_v40 }
  0xcd   : > { %1410 = vmatpush.msrb.mxu3 %v4488_v8  ;;  %1146 = vmatpush.msrb.mxu1 %v5694_v37  ;;  %v5701_v37 = vld [vmem:[#allocation39_spill] sm:$0xff]  ;;  %v716_v2 = vand.u32 4294901760, %v715_v16  ;;  %v1209_v16 = vld [vmem:[#allocation3 + $0x10] sm:$0xff] }
  0xce   : > { %1083 = vmatpush.msrb.mxu0 %v5696_v63  ;;  %1255 = vmatpush.msrb.mxu2 %v4416_v18  ;;  %v4514_v56 = vsub.f32 %v1207_v40, %v4505_v32 }
  0xcf   : > { %1416 = vmatpush.msrb.mxu3 %v4493_v7  ;;  %1148 = vmatpush.msrb.mxu1 %v5697_v15  ;;  %v5703_v15 = vld [vmem:[#allocation47_spill] sm:$0xff] }
  0xd0   : > { %1623 = vmatpush.msra.mxu2 %v5698_v5  ;;  %1452 = vmatpush.msra.mxu0 %v5699_v39 }
  0xd1   : > { %709 = vmatmul.f32.gmra.mxu0 %v708_v48  ;;  %838 = vmatmul.f32.gmra.mxu1 %v4351_v12  ;;  %v1208_v48 = vld [vmem:[#allocation3 + $0x8] sm:$0xff] }
  0xd2   : > { %1718 = vmatpush.msra.mxu3 %v4098_v43  ;;  %1540 = vmatpush.msra.mxu1 %v4098_v43 }
  0xd3   : > { %1010 = vmatmul.f32.gmra.mxu3 %v706_v1  ;;  %1627 = vmatpush.msra.mxu2 %v5700_v14  ;;  %v5548_v1 = vand.u32 4294901760, %v4514_v56  ;;  %v1211_v14 = vld [vmem:[#allocation3 + $0x20] sm:$0xff] }
  0xd4   : > { %930 = vmatmul.f32.gmra.mxu2 %v705_v52  ;;  %1455 = vmatpush.msra.mxu0 %v5701_v37  ;;  %v4524_v52 = vand.u32 4294901760, %v1208_v48 }
  0xd5   : > { %1720 = vmatpush.msra.mxu3 %v4117_v62  ;;  %1542 = vmatpush.msra.mxu1 %v4117_v62  ;;  %v1259_v40 = vsub.f32 %v4514_v56, %v5548_v1  ;;  %v5705_v1 = vld [vmem:[#allocation33_spill] sm:$0xff] }
  0xd6   : > { %1631 = vmatpush.msra.mxu2 %v4205_v6  ;;  %1458 = vmatpush.msra.mxu0 %v4177_v36  ;;  %v4536_v63 = vsub.f32 %v1208_v48, %v4524_v52  ;;  %v5704_v48 = vld [vmem:[#allocation52_spill] sm:$0xff] }
  0xd7   : > { %1722 = vmatpush.msra.mxu3 %v4151_v55  ;;  %1544 = vmatpush.msra.mxu1 %v4151_v55  ;;  %v5709_v6 = vld [vmem:[#allocation36_spill] sm:$0xff] }
  0xd8   : > { %1635 = vmatpush.msra.mxu2 %v4222_v0  ;;  %1461 = vmatpush.msra.mxu0 %v4192_v10  ;;  %5702 = vst [vmem:[#allocation34_spill] sm:$0xff] %v4536_v63  ;;  %v5708_v0 = vld [vmem:[#allocation61_spill] sm:$0xff] }
  0xd9   : > { %717 = vmatmul.f32.gmra.mxu0 %v716_v2  ;;  %842 = vmatmul.f32.gmra.mxu1 %v4420_v22  ;;  %v4546_v2 = vand.u32 4294901760, %v1209_v16 }
  0xda   : > { %1724 = vmatpush.msra.mxu3 %v4163_v44  ;;  %1546 = vmatpush.msra.mxu1 %v4163_v44 }
  0xdb   : > { %1016 = vmatmul.f32.gmra.mxu3 %v714_v58  ;;  %1639 = vmatpush.msra.mxu2 %v4242_v11  ;;  %v5555_v58 = vand.u32 4294901760, %v4536_v63  ;;  %v1210_v11 = vld [vmem:[#allocation3 + $0x18] sm:$0xff] }
  0xdc   : > { %935 = vmatmul.f32.gmra.mxu2 %v713_v38  ;;  %1464 = vmatpush.msra.mxu0 %v5703_v15  ;;  %v1260_v38 = vand.u32 4294901760, %v1259_v40 }
  0xdd   : > { %1726 = vmatpush.msra.mxu3 %v4187_v35  ;;  %1548 = vmatpush.msra.mxu1 %v4187_v35  ;;  %v1267_v40 = vsub.f32 %v4536_v63, %v5555_v58  ;;  %v5711_v63 = vld [vmem:[#allocation64_spill] sm:$0xff] }
  0xde   : > { %1643 = vmatpush.msra.mxu2 %v4265_v26  ;;  %1467 = vmatpush.msra.mxu0 %v4238_v25  ;;  %v5706_v26 = vld [vmem:[#allocation55_spill] sm:$0xff] }
  0xdf   : > { %1728 = vmatpush.msra.mxu3 %v4210_v3  ;;  %1550 = vmatpush.msra.mxu1 %v4210_v3 }
  0xe0   : > { %1647 = vmatpush.msra.mxu2 %v4283_v17  ;;  %1470 = vmatpush.msra.mxu0 %v5704_v48  ;;  %v4560_v17 = vsub.f32 %v1209_v16, %v4546_v2  ;;  %v4570_v16 = vand.u32 4294901760, %v1210_v11 }
  0xe1   : > { %846 = vmatmul.f32.gmra.mxu1 %v4470_v29  ;;  %1085 = vmatmul.f32.vlgmr.msrb.gmra.mxu0 %v5705_v1 }
  0xe2   : > { %1730 = vmatpush.msra.mxu3 %v4224_v47  ;;  %1552 = vmatpush.msra.mxu1 %v4224_v47  ;;  %v5566_v58 = vand.u32 4294901760, %v4560_v17 }
  0xe3   : > { %1418 = vmatmul.f32.vlgmr.msrb.gmra.mxu3 %v4505_v32  ;;  %1651 = vmatpush.msra.mxu2 %v4305_v24  ;;  %v5707_v24 = vld [vmem:[#allocation67_spill] sm:$0xff] }
  0xe4   : > { %1261 = vmatmul.f32.vlgmr.msrb.gmra.mxu2 %v1260_v38  ;;  %1473 = vmatpush.msra.mxu0 %v5706_v26  ;;  %v1268_v38 = vand.u32 4294901760, %v1267_v40  ;;  %v1275_v40 = vsub.f32 %v4560_v17, %v5566_v58  ;;  %v5712_v58 = vld [vmem:[#allocation43_spill] sm:$0xff] }
  0xe5   : > { %1732 = vmatpush.msra.mxu3 %v4244_v42  ;;  %1554 = vmatpush.msra.mxu1 %v4244_v42 }
  0xe6   : > { %1655 = vmatpush.msra.mxu2 %v4329_v19  ;;  %1476 = vmatpush.msra.mxu0 %v4297_v30  ;;  %v5710_v19 = vld [vmem:[#allocation71_spill] sm:$0xff] }
  0xe7   : > { %1734 = vmatpush.msra.mxu3 %v4267_v59  ;;  %1556 = vmatpush.msra.mxu1 %v4267_v59 }
  0xe8   : > { %1659 = vmatpush.msra.mxu2 %v5707_v24  ;;  %1479 = vmatpush.msra.mxu0 %v5708_v0  ;;  %v4584_v24 = vsub.f32 %v1210_v11, %v4570_v16  ;;  %v4594_v11 = vand.u32 4294901760, %v1211_v14 }
  0xe9   : > { %1089 = vmatmul.f32.gmra.mxu0 %v5709_v6  ;;  %1150 = vmatmul.f32.vlgmr.msrb.gmra.mxu1 %v5705_v1  ;;  %v1276_v1 = vand.u32 4294901760, %v1275_v40 }
  0xea   : > { %1736 = vmatpush.msra.mxu3 %v4285_v23  ;;  %1558 = vmatpush.msra.mxu1 %v4285_v23 }
  0xeb   : > { %1422 = vmatmul.f32.gmra.mxu3 %v4524_v52  ;;  %1663 = vmatpush.msra.mxu2 %v5710_v19 }
  0xec   : > { %1269 = vmatmul.f32.gmra.mxu2 %v1268_v38  ;;  %1482 = vmatpush.msra.mxu0 %v5711_v63  ;;  %v5571_v38 = vand.u32 4294901760, %v4584_v24 }
  0xed   : > { %1738 = vmatpush.msra.mxu3 %v4307_v27  ;;  %1560 = vmatpush.msra.mxu1 %v4307_v27 }
  0xee   : > { %1667 = vmatpush.msra.mxu2 %v4393_v13  ;;  %1485 = vmatpush.msra.mxu0 %v4359_v51  ;;  %v1283_v40 = vsub.f32 %v4584_v24, %v5571_v38  ;;  %v1212_v13 = vld [vmem:[#allocation3 + $0x28] sm:$0xff] }
  0xef   : > { %1740 = vmatpush.msra.mxu3 %v4338_v28  ;;  %1562 = vmatpush.msra.mxu1 %v4338_v28 }
  0xf0   : > { %1671 = vmatpush.msra.mxu2 %v4410_v50  ;;  %1488 = vmatpush.msra.mxu0 %v4376_v20  ;;  %v4608_v50 = vsub.f32 %v1211_v14, %v4594_v11  ;;  %v4618_v14 = vand.u32 4294901760, %v1212_v13 }
  0xf1   : > { %1093 = vmatmul.f32.gmra.mxu0 %v5712_v58  ;;  %1154 = vmatmul.f32.gmra.mxu1 %v5709_v6  ;;  %v1284_v6 = vand.u32 4294901760, %v1283_v40 }
  0xf2   : > { %1742 = vmatpush.msra.mxu3 %v4361_v57  ;;  %1564 = vmatpush.msra.mxu1 %v4361_v57  ;;  %v4632_v38 = vsub.f32 %v1212_v13, %v4618_v14 }
  0xf3   : > { %1426 = vmatmul.f32.gmra.mxu3 %v4546_v2  ;;  %1675 = vmatpush.msra.mxu2 %v4433_v4 }
  0xf4   : > { %1277 = vmatmul.f32.gmra.mxu2 %v1276_v1  ;;  %1491 = vmatpush.msra.mxu0 %v4400_v21  ;;  %v5575_v1 = vand.u32 4294901760, %v4608_v50 }
  0xf5   : > { %1744 = vmatpush.msra.mxu3 %v4384_v33  ;;  %1566 = vmatpush.msra.mxu1 %v4384_v33 }
  0xf6   : > { %1679 = vmatpush.msra.mxu2 %v4451_v46  ;;  %1494 = vmatpush.msra.mxu0 %v4425_v31  ;;  %v1291_v40 = vsub.f32 %v4608_v50, %v5575_v1  ;;  %v5581_v1 = vand.u32 4294901760, %v4632_v38  ;;  %v1214_v46 = vld [vmem:[#allocation3 + $0x38] sm:$0xff] }
  0xf7   : > { %1746 = vmatpush.msra.mxu3 %v4402_v41  ;;  %1568 = vmatpush.msra.mxu1 %v4402_v41 }
  0xf8   : > { %1497 = vmatpush.msra.mxu0 %v4440_v53  ;;  %1683 = vmatpush.msra.mxu2 %v4463_v34  ;;  %v1213_v34 = vld [vmem:[#allocation3 + $0x30] sm:$0xff] }
  0xf9   : > { %1097 = vmatmul.f32.gmra.mxu0 %v4229_v49  ;;  %1158 = vmatmul.f32.gmra.mxu1 %v5712_v58  ;;  %v5713_v58 = vld [vmem:[#allocation46_spill] sm:$0xff]  ;;  %v4642_v13 = vand.u32 4294901760, %v1213_v34 }
  0xfa   : > { %1748 = vmatpush.msra.mxu3 %v4416_v18  ;;  %1570 = vmatpush.msra.mxu1 %v4416_v18 }
  0xfb   : > { %1430 = vmatmul.f32.gmra.mxu3 %v4570_v16  ;;  %2036 = vmatpush.msrb.mxu2 %v5699_v39  ;;  %v1292_v39 = vand.u32 4294901760, %v1291_v40  ;;  %v1299_v40 = vsub.f32 %v4632_v38, %v5581_v1 }
  0xfc   : > { %1285 = vmatmul.f32.gmra.mxu2 %v1284_v6  ;;  %1809 = vmatpush.msrb.mxu0 %v4098_v43  ;;  %v5714_v6 = vld [vmem:[#allocation49_spill] sm:$0xff] }
  0xfd   : > { %2124 = vmatpush.msrb.mxu3 %v4098_v43  ;;  %1910 = vmatpush.msrb.mxu1 %v5713_v58 }
  0xfe   : > { %2039 = vmatpush.msrb.mxu2 %v5701_v37  ;;  %1811 = vmatpush.msrb.mxu0 %v4117_v62  ;;  %v5715_v37 = vld [vmem:[#allocation53_spill] sm:$0xff] }
  0xff   : > { %2126 = vmatpush.msrb.mxu3 %v4117_v62  ;;  %1916 = vmatpush.msrb.mxu1 %v5714_v6 }
 0x100   : > { %2042 = vmatpush.msrb.mxu2 %v4177_v36  ;;  %1813 = vmatpush.msrb.mxu0 %v4151_v55  ;;  %v4656_v36 = vsub.f32 %v1213_v34, %v4642_v13  ;;  %v4666_v34 = vand.u32 4294901760, %v1214_v46 }
 0x101   : > { %1101 = vmatmul.f32.gmra.mxu0 %v4294_v9  ;;  %1162 = vmatmul.f32.gmra.mxu1 %v4229_v49  ;;  %v5716_v49 = vld [vmem:[#allocation56_spill] sm:$0xff] }
 0x102   : > { %2128 = vmatpush.msrb.mxu3 %v4151_v55  ;;  %1922 = vmatpush.msrb.mxu1 %v5715_v37  ;;  %v5585_v1 = vand.u32 4294901760, %v4656_v36 }
 0x103   : > { %1434 = vmatmul.f32.gmra.mxu3 %v4594_v11  ;;  %2045 = vmatpush.msrb.mxu2 %v4192_v10  ;;  %v1300_v10 = vand.u32 4294901760, %v1299_v40 }
 0x104   : > { %1293 = vmatmul.f32.gmra.mxu2 %v1292_v39  ;;  %1815 = vmatpush.msrb.mxu0 %v4163_v44  ;;  %v5717_v39 = vld [vmem:[#allocation59_spill] sm:$0xff]  ;;  %v1307_v40 = vsub.f32 %v4656_v36, %v5585_v1 }
 0x105   : > { %2130 = vmatpush.msrb.mxu3 %v4163_v44  ;;  %1928 = vmatpush.msrb.mxu1 %v5716_v49 }
 0x106   : > { %2048 = vmatpush.msrb.mxu2 %v5703_v15  ;;  %1817 = vmatpush.msrb.mxu0 %v4187_v35  ;;  %v5718_v15 = vld [vmem:[#allocation62_spill] sm:$0xff] }
 0x107   : > { %2132 = vmatpush.msrb.mxu3 %v4187_v35  ;;  %1934 = vmatpush.msrb.mxu1 %v5717_v39 }
 0x108   : > { %2051 = vmatpush.msrb.mxu2 %v4238_v25  ;;  %1819 = vmatpush.msrb.mxu0 %v4210_v3  ;;  %v4680_v25 = vsub.f32 %v1214_v46, %v4666_v34 }
 0x109   : > { %1105 = vmatmul.f32.gmra.mxu0 %v4351_v12  ;;  %1166 = vmatmul.f32.gmra.mxu1 %v4294_v9  ;;  %v5719_v9 = vld [vmem:[#allocation66_spill] sm:$0xff] }
 0x10a   : > { %2134 = vmatpush.msrb.mxu3 %v4210_v3  ;;  %1940 = vmatpush.msrb.mxu1 %v5718_v15  ;;  %v5587_v1 = vand.u32 4294901760, %v4680_v25 }
 0x10b   : > { %1438 = vmatmul.f32.gmra.mxu3 %v4618_v14  ;;  %2054 = vmatpush.msrb.mxu2 %v5704_v48  ;;  %v1308_v48 = vand.u32 4294901760, %v1307_v40  ;;  %v5721_v40 = vld [vmem:[#allocation77_spill] sm:$0xff] }
 0x10c   : > { %1301 = vmatmul.f32.gmra.mxu2 %v1300_v10  ;;  %1821 = vmatpush.msrb.mxu0 %v4224_v47  ;;  %v5720_v10 = vld [vmem:[#allocation70_spill] sm:$0xff]  ;;  %v1315_v46 = vsub.f32 %v4680_v25, %v5587_v1 }
 0x10d   : > { %2136 = vmatpush.msrb.mxu3 %v4224_v47  ;;  %1946 = vmatpush.msrb.mxu1 %v5719_v9  ;;  %v5724_v1 = vld [vmem:[#allocation34_spill] sm:$0xff] }
 0x10e   : > { %2057 = vmatpush.msrb.mxu2 %v5706_v26  ;;  %1823 = vmatpush.msrb.mxu0 %v4244_v42 }
 0x10f   : > { %2138 = vmatpush.msrb.mxu3 %v4244_v42  ;;  %1952 = vmatpush.msrb.mxu1 %v5720_v10 }
 0x110   : > { %2060 = vmatpush.msrb.mxu2 %v4297_v30  ;;  %1825 = vmatpush.msrb.mxu0 %v4267_v59 }
 0x111   : > { %1109 = vmatmul.f32.gmra.mxu0 %v4420_v22  ;;  %1170 = vmatmul.f32.gmra.mxu1 %v4351_v12  ;;  %v5722_v12 = vld [vmem:[#allocation81_spill] sm:$0xff] }
 0x112   : > { %2140 = vmatpush.msrb.mxu3 %v4267_v59  ;;  %1958 = vmatpush.msrb.mxu1 %v4390_v61 }
 0x113   : > { %1442 = vmatmul.f32.gmra.mxu3 %v4642_v13  ;;  %2063 = vmatpush.msrb.mxu2 %v5708_v0  ;;  %v1316_v0 = vand.u32 4294901760, %v1315_v46 }
 0x114   : > { %1309 = vmatmul.f32.gmra.mxu2 %v1308_v48  ;;  %1827 = vmatpush.msrb.mxu0 %v4285_v23 }
 0x115   : > { %2142 = vmatpush.msrb.mxu3 %v4285_v23  ;;  %1964 = vmatpush.msrb.mxu1 %v5721_v40 }
 0x116   : > { %2066 = vmatpush.msrb.mxu2 %v5711_v63  ;;  %1829 = vmatpush.msrb.mxu0 %v4307_v27 }
 0x117   : > { %2144 = vmatpush.msrb.mxu3 %v4307_v27  ;;  %1970 = vmatpush.msrb.mxu1 %v5722_v12 }
 0x118   : > { %2069 = vmatpush.msrb.mxu2 %v4359_v51  ;;  %1831 = vmatpush.msrb.mxu0 %v4338_v28 }
 0x119   : > { %1113 = vmatmul.f32.gmra.mxu0 %v4470_v29  ;;  %1174 = vmatmul.f32.gmra.mxu1 %v4420_v22 }
 0x11a   : > { %2146 = vmatpush.msrb.mxu3 %v4338_v28  ;;  %1976 = vmatpush.msrb.mxu1 %v4448_v54 }
 0x11b   : > { %1446 = vmatmul.f32.gmra.mxu3 %v4666_v34  ;;  %2072 = vmatpush.msrb.mxu2 %v4376_v20 }
 0x11c   : > { %1317 = vmatmul.f32.gmra.mxu2 %v1316_v0  ;;  %1833 = vmatpush.msrb.mxu0 %v4361_v57 }
 0x11d   : > { %2148 = vmatpush.msrb.mxu3 %v4361_v57  ;;  %1982 = vmatpush.msrb.mxu1 %v4460_v60 }
 0x11e   : > { %v4719_v48 = vpop.f32.mrf.mxu0  ;;  %2075 = vmatpush.msrb.mxu2 %v4400_v21  ;;  %1835 = vmatpush.msrb.mxu0 %v4384_v33  ;;  %v5727_v21 = vld [vmem:[#allocation48_spill] sm:$0xff] }
 0x11f   : > { %2150 = vmatpush.msrb.mxu3 %v4384_v33  ;;  %1988 = vmatpush.msrb.mxu1 %v4477_v45 }
 0x120   : > { %2078 = vmatpush.msrb.mxu2 %v4425_v31  ;;  %1837 = vmatpush.msrb.mxu0 %v4402_v41 }
 0x121   : > { %1178 = vmatmul.f32.gmra.mxu1 %v4470_v29  ;;  %1500 = vmatmul.f32.vlgmr.msra.gmra.mxu0 %v4514_v56 }
 0x122   : > { %2152 = vmatpush.msrb.mxu3 %v4402_v41  ;;  %1839 = vmatpush.msrb.mxu0 %v4416_v18 }
 0x123   : > { %1750 = vmatmul.f32.vlgmr.msra.gmra.mxu3 %v4505_v32  ;;  %1994 = vmatpush.msrb.mxu1 %v4488_v8 }
 0x124   : > { %1685 = vmatmul.f32.vlgmr.msra.gmra.mxu2 %v4505_v32  ;;  %2154 = vmatpush.msrb.mxu3 %v4416_v18  ;;  %v5723_v32 = vld [vmem:[#allocation41_spill] sm:$0xff] }
 0x125   : > { %2081 = vmatpush.msrb.mxu2 %v4440_v53  ;;  %2000 = vmatpush.msrb.mxu1 %v4493_v7  ;;  %v5725_v53 = vand.u32 4294901760, %v4514_v56 }
 0x126   : > { %v4737_v0 = vpop.f32.mrf.mxu0  ;;  %v4739_v29 = vpop.f32.mrf.mxu1  ;;  %2207 = vmatpush.msra.mxu0 %v5698_v5  ;;  %2494 = vmatpush.msra.mxu3 %v5713_v58  ;;  %v5726_v58 = vld [vmem:[#allocation45_spill] sm:$0xff] }
 0x127   : > { %2393 = vmatpush.msra.mxu2 %v4098_v43  ;;  %v4743_v22 = vpop.f32.mrf.mxu2  ;;  %v4745_v46 = vpop.f32.mrf.mxu3 }
 0x128   : > { %2211 = vmatpush.msra.mxu0 %v5723_v32  ;;  %2500 = vmatpush.msra.mxu3 %v5714_v6 }
 0x129   : > { %2395 = vmatpush.msra.mxu2 %v4117_v62  ;;  %1505 = vmatmul.f32.gmra.mxu0 %v5724_v1 }
 0x12a   : > { %1574 = vmatmul.f32.vlgmr.msra.gmra.mxu1 %v5725_v53  ;;  %2215 = vmatpush.msra.mxu0 %v5726_v58 }
 0x12b   : > { %2302 = vmatpush.msra.mxu1 %v4098_v43  ;;  %1754 = vmatmul.f32.gmra.mxu3 %v4524_v52 }
 0x12c   : > { %2397 = vmatpush.msra.mxu2 %v4151_v55  ;;  %2506 = vmatpush.msra.mxu3 %v5715_v37  ;;  %v5728_v37 = vand.u32 4294901760, %v5724_v1 }
 0x12d   : > { %1689 = vmatmul.f32.gmra.mxu2 %v4524_v52  ;;  %2304 = vmatpush.msra.mxu1 %v4117_v62  ;;  %v5729_v52 = vld [vmem:[#allocation51_spill] sm:$0xff] }
 0x12e   : > { %v4761_v31 = vpop.f32.mrf.mxu0  ;;  %v4763_v56 = vpop.f32.mrf.mxu1  ;;  %2399 = vmatpush.msra.mxu2 %v4163_v44  ;;  %2219 = vmatpush.msra.mxu0 %v5727_v21 }
 0x12f   : > { %2306 = vmatpush.msra.mxu1 %v4151_v55  ;;  %v4767_v53 = vpop.f32.mrf.mxu2  ;;  %v4769_v6 = vpop.f32.mrf.mxu3  ;;  %2512 = vmatpush.msra.mxu3 %v5716_v49  ;;  %v5730_v49 = vld [vmem:[#allocation54_spill] sm:$0xff] }
 0x130   : > { %2401 = vmatpush.msra.mxu2 %v4187_v35  ;;  %2223 = vmatpush.msra.mxu0 %v5729_v52 }
 0x131   : > { %2308 = vmatpush.msra.mxu1 %v4163_v44  ;;  %1510 = vmatmul.f32.gmra.mxu0 %v4560_v17 }
 0x132   : > { %1580 = vmatmul.f32.gmra.mxu1 %v5728_v37  ;;  %2518 = vmatpush.msra.mxu3 %v5717_v39  ;;  %v5731_v37 = vld [vmem:[#allocation57_spill] sm:$0xff] }
 0x133   : > { %1758 = vmatmul.f32.gmra.mxu3 %v4546_v2  ;;  %2310 = vmatpush.msra.mxu1 %v4187_v35 }
 0x134   : > { %2227 = vmatpush.msra.mxu0 %v5730_v49  ;;  %2403 = vmatpush.msra.mxu2 %v4210_v3 }
 0x135   : > { %1693 = vmatmul.f32.gmra.mxu2 %v4546_v2  ;;  %2524 = vmatpush.msra.mxu3 %v5718_v15  ;;  %v5732_v2 = vld [vmem:[#allocation60_spill] sm:$0xff]  ;;  %v5733_v15 = vand.u32 4294901760, %v4560_v17 }
 0x136   : > { %v4786_v20 = vpop.f32.mrf.mxu0  ;;  %v4788_v1 = vpop.f32.mrf.mxu1  ;;  %2312 = vmatpush.msra.mxu1 %v4210_v3  ;;  %2231 = vmatpush.msra.mxu0 %v5731_v37 }
 0x137   : > { %v4792_v39 = vpop.f32.mrf.mxu2  ;;  %v4794_v51 = vpop.f32.mrf.mxu3  ;;  %2405 = vmatpush.msra.mxu2 %v4224_v47  ;;  %2530 = vmatpush.msra.mxu3 %v5719_v9  ;;  %v5734_v9 = vld [vmem:[#allocation63_spill] sm:$0xff] }
 0x138   : > { %2314 = vmatpush.msra.mxu1 %v4224_v47  ;;  %2235 = vmatpush.msra.mxu0 %v5732_v2 }
 0x139   : > { %1515 = vmatmul.f32.gmra.mxu0 %v4584_v24  ;;  %2407 = vmatpush.msra.mxu2 %v4244_v42 }
 0x13a   : > { %1586 = vmatmul.f32.gmra.mxu1 %v5733_v15  ;;  %2536 = vmatpush.msra.mxu3 %v5720_v10  ;;  %v5735_v15 = vld [vmem:[#allocation67_spill] sm:$0xff] }
 0x13b   : > { %1762 = vmatmul.f32.gmra.mxu3 %v4570_v16  ;;  %2316 = vmatpush.msra.mxu1 %v4244_v42 }
 0x13c   : > { %2239 = vmatpush.msra.mxu0 %v5734_v9  ;;  %2409 = vmatpush.msra.mxu2 %v4267_v59 }
 0x13d   : > { %1697 = vmatmul.f32.gmra.mxu2 %v4570_v16  ;;  %2542 = vmatpush.msra.mxu3 %v4390_v61  ;;  %v5736_v61 = vand.u32 4294901760, %v4584_v24  ;;  %v5737_v16 = vld [vmem:[#allocation74_spill] sm:$0xff] }
 0x13e   : > { %v4811_v63 = vpop.f32.mrf.mxu0  ;;  %v4813_v17 = vpop.f32.mrf.mxu1  ;;  %2318 = vmatpush.msra.mxu1 %v4267_v59  ;;  %2243 = vmatpush.msra.mxu0 %v5735_v15 }
 0x13f   : > { %v4817_v10 = vpop.f32.mrf.mxu2  ;;  %v4819_v30 = vpop.f32.mrf.mxu3  ;;  %2411 = vmatpush.msra.mxu2 %v4285_v23  ;;  %2548 = vmatpush.msra.mxu3 %v5721_v40 }
 0x140   : > { %2320 = vmatpush.msra.mxu1 %v4285_v23  ;;  %2247 = vmatpush.msra.mxu0 %v5710_v19 }
 0x141   : > { %1520 = vmatmul.f32.gmra.mxu0 %v4608_v50  ;;  %2413 = vmatpush.msra.mxu2 %v4307_v27 }
 0x142   : > { %1592 = vmatmul.f32.gmra.mxu1 %v5736_v61  ;;  %2554 = vmatpush.msra.mxu3 %v5722_v12  ;;  %v5738_v61 = vld [vmem:[#allocation78_spill] sm:$0xff] }
 0x143   : > { %1766 = vmatmul.f32.gmra.mxu3 %v4594_v11  ;;  %2322 = vmatpush.msra.mxu1 %v4307_v27 }
 0x144   : > { %2251 = vmatpush.msra.mxu0 %v5737_v16  ;;  %2415 = vmatpush.msra.mxu2 %v4338_v28 }
 0x145   : > { %1701 = vmatmul.f32.gmra.mxu2 %v4594_v11  ;;  %2560 = vmatpush.msra.mxu3 %v4448_v54  ;;  %v5740_v54 = vand.u32 4294901760, %v4608_v50  ;;  %v1791_v11 = vld [vmem:[#allocation4] sm:$0xff] }
 0x146   : > { %v4836_v40 = vpop.f32.mrf.mxu0  ;;  %v4838_v24 = vpop.f32.mrf.mxu1  ;;  %2324 = vmatpush.msra.mxu1 %v4338_v28  ;;  %2255 = vmatpush.msra.mxu0 %v5738_v61  ;;  %v1793_v61 = vld [vmem:[#allocation4 + $0x10] sm:$0xff] }
 0x147   : > { %v4842_v12 = vpop.f32.mrf.mxu2  ;;  %v4844_v19 = vpop.f32.mrf.mxu3  ;;  %2417 = vmatpush.msra.mxu2 %v4361_v57  ;;  %2566 = vmatpush.msra.mxu3 %v4460_v60  ;;  %v5741_v60 = vld [vmem:[#allocation84_spill] sm:$0xff] }
 0x148   : > { %5739 = vst [vmem:[#allocation38_spill] sm:$0xff] %v4844_v19  ;;  %2326 = vmatpush.msra.mxu1 %v4361_v57  ;;  %2259 = vmatpush.msra.mxu0 %v4433_v4  ;;  %v4859_v57 = vand.u32 4294901760, %v1791_v11  ;;  %v5755_v19 = vld [vmem:[#allocation37_spill] sm:$0xff] }
 0x149   : > { %1525 = vmatmul.f32.gmra.mxu0 %v4632_v38  ;;  %2419 = vmatpush.msra.mxu2 %v4384_v33 }
 0x14a   : > { %1598 = vmatmul.f32.gmra.mxu1 %v5740_v54  ;;  %2572 = vmatpush.msra.mxu3 %v4477_v45  ;;  %v5744_v45 = vld [vmem:[#allocation85_spill] sm:$0xff] }
 0x14b   : > { %1770 = vmatmul.f32.gmra.mxu3 %v4618_v14  ;;  %2328 = vmatpush.msra.mxu1 %v4384_v33 }
 0x14c   : > { %2263 = vmatpush.msra.mxu0 %v5741_v60  ;;  %2421 = vmatpush.msra.mxu2 %v4402_v41  ;;  %v1841_v60 = vsub.f32 %v1791_v11, %v4859_v57  ;;  %v5752_v11 = vand.u32 4294901760, %v4656_v36 }
 0x14d   : > { %1705 = vmatmul.f32.gmra.mxu2 %v4618_v14  ;;  %2578 = vmatpush.msra.mxu3 %v4488_v8  ;;  %v5747_v8 = vand.u32 4294901760, %v4632_v38 }
 0x14e   : > { %v4863_v50 = vpop.f32.mrf.mxu0  ;;  %v4865_v54 = vpop.f32.mrf.mxu1  ;;  %2267 = vmatpush.msra.mxu0 %v5744_v45  ;;  %2330 = vmatpush.msra.mxu1 %v4402_v41  ;;  %v1792_v45 = vld [vmem:[#allocation4 + $0x8] sm:$0xff]  ;;  %v616_v41 = vld [vmem:[%s3843_s18] sm:$0xff] }
 0x14f   : > { %5742 = vst [vmem:[#allocation35_spill] sm:$0xff] %v4863_v50  ;;  %v4869_v33 = vpop.f32.mrf.mxu2  ;;  %v4871_v14 = vpop.f32.mrf.mxu3  ;;  %2423 = vmatpush.msra.mxu2 %v4416_v18  ;;  %2584 = vmatpush.msra.mxu3 %v4493_v7  ;;  %v4883_v4 = vand.u32 4294901760, %v1792_v45 }
 0x150   : > { %5743 = vst [vmem:[#allocation40_spill] sm:$0xff] %v4865_v54  ;;  %2332 = vmatpush.msra.mxu1 %v4416_v18  ;;  %v1794_v54 = vld [vmem:[#allocation4 + $0x18] sm:$0xff] }
 0x151   : > { %5745 = vst [vmem:[#allocation33_spill] sm:$0xff] %v4869_v33  ;;  %1530 = vmatmul.f32.gmra.mxu0 %v4656_v36  ;;  %v663_v33 = vadd.f32 %v4719_v48, %v616_v41 }
 0x152   : > { %5746 = vst [vmem:[#allocation55_spill] sm:$0xff] %v4871_v14  ;;  %1604 = vmatmul.f32.gmra.mxu1 %v5747_v8  ;;  %v1842_v14 = vand.u32 4294901760, %v1841_v60 }
 0x153   : > { %1774 = vmatmul.f32.gmra.mxu3 %v4642_v13  ;;  %v820_v28 = vadd.f32 %v4739_v29, %v663_v33  ;;  %v5754_v29 = vand.u32 4294901760, %v4680_v25 }
 0x154   : > { %v1843_v50 = vsub.f32 %v1841_v60, %v1842_v14 }
 0x155   : > { %1709 = vmatmul.f32.gmra.mxu2 %v4642_v13  ;;  %v1849_v13 = vsub.f32 %v1792_v45, %v4883_v4  ;;  %v902_v45 = vadd.f32 %v4743_v22, %v820_v28  ;;  %v618_v28 = vld [vmem:[%s3843_s18 + $0x10] sm:$0xff] }
 0x156   : > { %v4885_v7 = vpop.f32.mrf.mxu0  ;;  %v4887_v18 = vpop.f32.mrf.mxu1  ;;  %v1844_v41 = vand.u32 4294901760, %v1843_v50 }
 0x157   : > { %5748 = vst [vmem:[#allocation36_spill] sm:$0xff] %v4885_v7  ;;  %v4890_v38 = vpop.f32.mrf.mxu2  ;;  %v4892_v8 = vpop.f32.mrf.mxu3  ;;  %v617_v7 = vld [vmem:[%s3843_s18 + $0x8] sm:$0xff]  ;;  %v1850_v48 = vand.u32 4294901760, %v1849_v13 }
 0x158   : > { %5749 = vst [vmem:[#allocation43_spill] sm:$0xff] %v4887_v18 }
 0x159   : > { %5750 = vst [vmem:[#allocation46_spill] sm:$0xff] %v4890_v38  ;;  %1535 = vmatmul.f32.gmra.mxu0 %v4680_v25  ;;  %v4902_v38 = vand.u32 4294901760, %v1793_v61 }
 0x15a   : > { %5751 = vst [vmem:[#allocation49_spill] sm:$0xff] %v4892_v8  ;;  %1610 = vmatmul.f32.gmra.mxu1 %v5752_v11  ;;  %v671_v11 = vadd.f32 %v4737_v0, %v617_v7 }
 0x15b   : > { %1778 = vmatmul.f32.gmra.mxu3 %v4666_v34  ;;  %v4915_v50 = vsub.f32 %v1793_v61, %v4902_v38  ;;  %v5756_v61 = vld [vmem:[#allocation39_spill] sm:$0xff] }
 0x15c   : > { %v824_v0 = vadd.f32 %v4763_v56, %v671_v11  ;;  %v679_v56 = vadd.f32 %v4761_v31, %v618_v28  ;;  %v5757_v11 = vld [vmem:[#allocation42_spill] sm:$0xff] }
 0x15d   : > { %1713 = vmatmul.f32.gmra.mxu2 %v4666_v34  ;;  %v1851_v34 = vsub.f32 %v1849_v13, %v1850_v48  ;;  %v1858_v7 = vand.u32 4294901760, %v4915_v50 }
 0x15e   : > { %v4904_v8 = vpop.f32.mrf.mxu1  ;;  %v1086_v36 = vpop.f32.mrf.mxu0 }
 0x15f   : > { %5753 = vst [vmem:[#allocation53_spill] sm:$0xff] %v4904_v8  ;;  %v4908_v18 = vpop.f32.mrf.mxu2  ;;  %v4910_v33 = vpop.f32.mrf.mxu3  ;;  %v976_v8 = vadd.f32 %v4745_v46, %v902_v45  ;;  %v1852_v25 = vand.u32 4294901760, %v1851_v34  ;;  %v1859_v31 = vsub.f32 %v4915_v50, %v1858_v7  ;;  %v828_v45 = vadd.f32 %v4788_v1, %v679_v56  ;;  %v619_v34 = vld [vmem:[%s3843_s18 + $0x18] sm:$0xff] }
 0x160   : > { %v687_v1 = vadd.f32 %v4786_v20, %v619_v34 }
 0x161   : > { %1845 = vmatmul.f32.vlgmr.msrb.gmra.mxu0 %v1844_v41  ;;  %v1087_v22 = vadd.f32 %v1086_v36, %v976_v8  ;;  %v4923_v41 = vand.u32 4294901760, %v1794_v54  ;;  %v1860_v28 = vand.u32 4294901760, %v1859_v31  ;;  %v621_v31 = vld [vmem:[%s3843_s18 + $0x28] sm:$0xff] }
 0x162   : > { %1616 = vmatmul.f32.gmra.mxu1 %v5754_v29  ;;  %2620 = vmatpush.msrb.mxu0 %v5755_v19  ;;  %v5758_v29 = vld [vmem:[#allocation44_spill] sm:$0xff] }
 0x163   : > { %2158 = vmatmul.f32.vlgmr.msrb.gmra.mxu3 %v1842_v14 }
 0x164   : > { %2886 = vmatpush.msrb.mxu3 %v4098_v43  ;;  %2623 = vmatpush.msrb.mxu0 %v5756_v61  ;;  %v5761_v61 = vld [vmem:[#allocation52_spill] sm:$0xff] }
 0x165   : > { %2084 = vmatmul.f32.vlgmr.msrb.gmra.mxu2 %v1841_v60  ;;  %v907_v60 = vadd.f32 %v4767_v53, %v824_v0  ;;  %v1795_v53 = vld [vmem:[#allocation4 + $0x20] sm:$0xff] }
 0x166   : > { %2791 = vmatpush.msrb.mxu2 %v5698_v5  ;;  %v1090_v19 = vpop.f32.mrf.mxu0  ;;  %v1151_v46 = vpop.f32.mrf.mxu1  ;;  %2888 = vmatpush.msrb.mxu3 %v4117_v62  ;;  %v4941_v5 = vsub.f32 %v1794_v54, %v4923_v41 }
 0x167   : > { %v1152_v14 = vadd.f32 %v1151_v46, %v1087_v22  ;;  %v4930_v8 = vpop.f32.mrf.mxu2  ;;  %v4932_v36 = vpop.f32.mrf.mxu3  ;;  %2626 = vmatpush.msrb.mxu0 %v5757_v11  ;;  %v4951_v22 = vand.u32 4294901760, %v1795_v53 }
 0x168   : > { %2795 = vmatpush.msrb.mxu2 %v5723_v32  ;;  %2890 = vmatpush.msrb.mxu3 %v4151_v55  ;;  %v982_v32 = vadd.f32 %v4769_v6, %v907_v60  ;;  %v1866_v54 = vand.u32 4294901760, %v4941_v5  ;;  %v5759_v6 = vld [vmem:[#allocation47_spill] sm:$0xff] }
 0x169   : > { %1182 = vst [vmem:[%s3851_s25] sm:$0xff] %v1152_v14  ;;  %1853 = vmatmul.f32.gmra.mxu0 %v1852_v25  ;;  %v4971_v20 = vsub.f32 %v1795_v53, %v4951_v22 }
 0x16a   : > { %2002 = vmatmul.f32.vlgmr.msrb.gmra.mxu1 %v4859_v57  ;;  %2799 = vmatpush.msrb.mxu2 %v5726_v58  ;;  %v1091_v0 = vadd.f32 %v1090_v19, %v982_v32  ;;  %v620_v19 = vld [vmem:[%s3843_s18 + $0x20] sm:$0xff] }
 0x16b   : > { %2708 = vmatpush.msrb.mxu1 %v4098_v43  ;;  %2164 = vmatmul.f32.gmra.mxu3 %v1850_v48  ;;  %v1874_v60 = vand.u32 4294901760, %v4971_v20 }
 0x16c   : > { %2629 = vmatpush.msrb.mxu0 %v5758_v29  ;;  %2803 = vmatpush.msrb.mxu2 %v5727_v21  ;;  %v5760_v21 = vld [vmem:[#allocation50_spill] sm:$0xff] }
 0x16d   : > { %2089 = vmatmul.f32.gmra.mxu2 %v1849_v13  ;;  %2710 = vmatpush.msrb.mxu1 %v4117_v62  ;;  %v912_v62 = vadd.f32 %v4792_v39, %v828_v45  ;;  %v1796_v39 = vld [vmem:[#allocation4 + $0x28] sm:$0xff] }
 0x16e   : > { %2892 = vmatpush.msrb.mxu3 %v4163_v44  ;;  %v1094_v43 = vpop.f32.mrf.mxu0  ;;  %v1155_v58 = vpop.f32.mrf.mxu1  ;;  %2632 = vmatpush.msrb.mxu0 %v5759_v6  ;;  %v4982_v14 = vand.u32 4294901760, %v1796_v39 }
 0x16f   : > { %2712 = vmatpush.msrb.mxu1 %v4151_v55  ;;  %v1156_v13 = vadd.f32 %v1155_v58, %v1091_v0  ;;  %v4959_v48 = vpop.f32.mrf.mxu2  ;;  %v4961_v25 = vpop.f32.mrf.mxu3  ;;  %2807 = vmatpush.msrb.mxu2 %v5729_v52  ;;  %v1867_v55 = vsub.f32 %v4941_v5, %v1866_v54  ;;  %v988_v52 = vadd.f32 %v4794_v51, %v912_v62  ;;  %v5768_v58 = vld [vmem:[#allocation40_spill] sm:$0xff]  ;;  %v622_v62 = vld [vmem:[%s3843_s18 + $0x30] sm:$0xff] }
 0x170   : > { %2894 = vmatpush.msrb.mxu3 %v4187_v35  ;;  %2635 = vmatpush.msrb.mxu0 %v5760_v21 }
 0x171   : > { %2714 = vmatpush.msrb.mxu1 %v4163_v44  ;;  %1183 = vst [vmem:[%s3851_s25 + $0x8] sm:$0xff] %v1156_v13  ;;  %1861 = vmatmul.f32.gmra.mxu0 %v1860_v28  ;;  %v832_v44 = vadd.f32 %v4813_v17, %v687_v1  ;;  %v1095_v46 = vadd.f32 %v1094_v43, %v988_v52  ;;  %v1868_v56 = vand.u32 4294901760, %v1867_v55  ;;  %v5769_v1 = vld [vmem:[#allocation72_spill] sm:$0xff]  ;;  %v5770_v13 = vld [vmem:[#allocation65_spill] sm:$0xff] }
 0x172   : > { %2006 = vmatmul.f32.gmra.mxu1 %v4883_v4  ;;  %2811 = vmatpush.msrb.mxu2 %v5730_v49  ;;  %v695_v49 = vadd.f32 %v4811_v63, %v620_v19  ;;  %v5002_v63 = vsub.f32 %v1796_v39, %v4982_v14  ;;  %v5773_v19 = vld [vmem:[#allocation75_spill] sm:$0xff] }
 0x173   : > { %2716 = vmatpush.msrb.mxu1 %v4187_v35  ;;  %2170 = vmatmul.f32.gmra.mxu3 %v1858_v7  ;;  %v917_v17 = vadd.f32 %v4817_v10, %v832_v44  ;;  %v5763_v10 = vld [vmem:[#allocation61_spill] sm:$0xff] }
 0x174   : > { %2638 = vmatpush.msrb.mxu0 %v5761_v61  ;;  %2896 = vmatpush.msrb.mxu3 %v4210_v3  ;;  %v1882_v45 = vand.u32 4294901760, %v5002_v63  ;;  %v5772_v61 = vld [vmem:[#allocation69_spill] sm:$0xff] }
 0x175   : > { %2094 = vmatmul.f32.gmra.mxu2 %v4915_v50  ;;  %2718 = vmatpush.msrb.mxu1 %v4210_v3  ;;  %v5762_v3 = vld [vmem:[#allocation58_spill] sm:$0xff] }
 0x176   : > { %2815 = vmatpush.msrb.mxu2 %v5731_v37  ;;  %v1098_v35 = vpop.f32.mrf.mxu0  ;;  %v1159_v51 = vpop.f32.mrf.mxu1  ;;  %2898 = vmatpush.msrb.mxu3 %v4224_v47  ;;  %v1797_v37 = vld [vmem:[#allocation4 + $0x30] sm:$0xff] }
 0x177   : > { %2641 = vmatpush.msrb.mxu0 %v5706_v26  ;;  %v1160_v50 = vadd.f32 %v1159_v51, %v1095_v46  ;;  %v4990_v7 = vpop.f32.mrf.mxu2  ;;  %v4992_v11 = vpop.f32.mrf.mxu3  ;;  %2720 = vmatpush.msrb.mxu1 %v4224_v47  ;;  %v1875_v26 = vsub.f32 %v4971_v20, %v1874_v60  ;;  %v994_v47 = vadd.f32 %v4819_v30, %v917_v17  ;;  %v5013_v29 = vand.u32 4294901760, %v1797_v37  ;;  %v5776_v17 = vld [vmem:[#allocation82_spill] sm:$0xff] }
 0x178   : > { %2819 = vmatpush.msrb.mxu2 %v5732_v2  ;;  %2900 = vmatpush.msrb.mxu3 %v4244_v42  ;;  %v836_v2 = vadd.f32 %v4838_v24, %v695_v49  ;;  %v703_v24 = vadd.f32 %v4836_v40, %v621_v31  ;;  %v1883_v40 = vsub.f32 %v5002_v63, %v1882_v45  ;;  %v5781_v31 = vld [vmem:[#allocation43_spill] sm:$0xff] }
 0x179   : > { %2644 = vmatpush.msrb.mxu0 %v5762_v3  ;;  %1184 = vst [vmem:[%s3851_s25 + $0x10] sm:$0xff] %v1160_v50  ;;  %2722 = vmatpush.msrb.mxu1 %v4244_v42  ;;  %v1099_v53 = vadd.f32 %v1098_v35, %v994_v47  ;;  %v1876_v32 = vand.u32 4294901760, %v1875_v26  ;;  %v5777_v50 = vld [vmem:[#allocation73_spill] sm:$0xff]  ;;  %v5778_v3 = vld [vmem:[#allocation80_spill] sm:$0xff] }
 0x17a   : > { %1869 = vmatmul.f32.gmra.mxu0 %v1868_v56  ;;  %2010 = vmatmul.f32.gmra.mxu1 %v4902_v38  ;;  %v840_v6 = vadd.f32 %v5768_v58, %v703_v24  ;;  %v1884_v55 = vand.u32 4294901760, %v1883_v40  ;;  %v5775_v56 = vld [vmem:[#allocation33_spill] sm:$0xff]  ;;  %v5779_v47 = vld [vmem:[#allocation84_spill] sm:$0xff] }
 0x17b   : > { %2823 = vmatpush.msrb.mxu2 %v5734_v9  ;;  %2176 = vmatmul.f32.gmra.mxu3 %v1866_v54  ;;  %v5764_v9 = vld [vmem:[#allocation64_spill] sm:$0xff]  ;;  %v1798_v54 = vld [vmem:[#allocation4 + $0x38] sm:$0xff] }
 0x17c   : > { %2647 = vmatpush.msrb.mxu0 %v5763_v10  ;;  %2902 = vmatpush.msrb.mxu3 %v4267_v59  ;;  %v5044_v52 = vand.u32 4294901760, %v1798_v54 }
 0x17d   : > { %2099 = vmatmul.f32.gmra.mxu2 %v4941_v5  ;;  %2724 = vmatpush.msrb.mxu1 %v4267_v59  ;;  %v922_v5 = vadd.f32 %v4842_v12, %v836_v2  ;;  %v5765_v59 = vld [vmem:[#allocation71_spill] sm:$0xff]  ;;  %v5033_v12 = vsub.f32 %v1797_v37, %v5013_v29 }
 0x17e   : > { %2827 = vmatpush.msrb.mxu2 %v5735_v15  ;;  %v1102_v42 = vpop.f32.mrf.mxu0  ;;  %v1163_v30 = vpop.f32.mrf.mxu1  ;;  %2904 = vmatpush.msrb.mxu3 %v4285_v23  ;;  %v5766_v15 = vld [vmem:[#allocation68_spill] sm:$0xff]  ;;  %v1897_v37 = vsub.f32 %v1798_v54, %v5044_v52  ;;  %v5780_v2 = vld [vmem:[#allocation55_spill] sm:$0xff] }
 0x17f   : > { %2650 = vmatpush.msrb.mxu0 %v5764_v9  ;;  %v1164_v34 = vadd.f32 %v1163_v30, %v1099_v53  ;;  %v5021_v0 = vpop.f32.mrf.mxu2  ;;  %v5023_v28 = vpop.f32.mrf.mxu3  ;;  %2726 = vmatpush.msrb.mxu1 %v4285_v23  ;;  %v5767_v23 = vld [vmem:[#allocation38_spill] sm:$0xff]  ;;  %v1890_v39 = vand.u32 4294901760, %v5033_v12  ;;  %v5783_v30 = vld [vmem:[#allocation76_spill] sm:$0xff]  ;;  %v5785_v54 = vld [vmem:[#allocation79_spill] sm:$0xff] }
 0x180   : > { %2831 = vmatpush.msrb.mxu2 %v5765_v59  ;;  %2906 = vmatpush.msrb.mxu3 %v4307_v27  ;;  %v1000_v43 = vadd.f32 %v5767_v23, %v922_v5  ;;  %v1898_v5 = vand.u32 4294901760, %v1897_v37  ;;  %v5784_v59 = vld [vmem:[#allocation85_spill] sm:$0xff] }
 0x181   : > { %2653 = vmatpush.msrb.mxu0 %v5766_v15  ;;  %1185 = vst [vmem:[%s3851_s25 + $0x18] sm:$0xff] %v1164_v34  ;;  %2728 = vmatpush.msrb.mxu1 %v4307_v27  ;;  %v5771_v27 = vld [vmem:[#allocation78_spill] sm:$0xff]  ;;  %v1891_v26 = vsub.f32 %v5033_v12, %v1890_v39  ;;  %v2375_v34 = vld [vmem:[#allocation5] sm:$0xff] }
 0x182   : > { %1877 = vmatmul.f32.gmra.mxu0 %v1876_v32  ;;  %2014 = vmatmul.f32.gmra.mxu1 %v4923_v41  ;;  %v1103_v21 = vadd.f32 %v1102_v42, %v1000_v43  ;;  %v5782_v32 = vld [vmem:[#allocation83_spill] sm:$0xff]  ;;  %v623_v42 = vld [vmem:[%s3843_s18 + $0x38] sm:$0xff]  ;;  %v5787_v43 = vld [vmem:[#allocation46_spill] sm:$0xff] }
 0x183   : > { %2835 = vmatpush.msrb.mxu2 %v5737_v16  ;;  %2182 = vmatmul.f32.gmra.mxu3 %v1874_v60  ;;  %v927_v60 = vadd.f32 %v5775_v56, %v840_v6  ;;  %v1892_v24 = vand.u32 4294901760, %v1891_v26  ;;  %v3220_v26 = vld [vmem:[%s3843_s18 + $0x40] sm:$0xff] }
 0x184   : > { %2656 = vmatpush.msrb.mxu0 %v5769_v1  ;;  %2908 = vmatpush.msrb.mxu3 %v5770_v13 }
 0x185   : > { %2104 = vmatmul.f32.gmra.mxu2 %v4971_v20  ;;  %2730 = vmatpush.msrb.mxu1 %v5770_v13  ;;  %v5774_v20 = vld [vmem:[#allocation35_spill] sm:$0xff]  ;;  %v1006_v10 = vadd.f32 %v5780_v2, %v927_v60  ;;  %v1899_v13 = vsub.f32 %v1897_v37, %v1898_v5 }
 0x186   : > { %2839 = vmatpush.msrb.mxu2 %v5771_v27  ;;  %v1106_v16 = vpop.f32.mrf.mxu0  ;;  %v1167_v44 = vpop.f32.mrf.mxu1  ;;  %2910 = vmatpush.msrb.mxu3 %v5772_v61  ;;  %v711_v46 = vadd.f32 %v5774_v20, %v622_v62  ;;  %v5082_v62 = vand.u32 4294901760, %v2375_v34  ;;  %v5789_v27 = vld [vmem:[#allocation53_spill] sm:$0xff]  ;;  %v2376_v20 = vld [vmem:[#allocation5 + $0x8] sm:$0xff] }
 0x187   : > { %2659 = vmatpush.msrb.mxu0 %v5773_v19  ;;  %v1168_v35 = vadd.f32 %v1167_v44, %v1103_v21  ;;  %v5052_v51 = vpop.f32.mrf.mxu2  ;;  %v5054_v49 = vpop.f32.mrf.mxu3  ;;  %2732 = vmatpush.msrb.mxu1 %v5772_v61  ;;  %v1107_v9 = vadd.f32 %v1106_v16, %v1006_v10  ;;  %v5788_v21 = vld [vmem:[#allocation49_spill] sm:$0xff]  ;;  %v1900_v19 = vand.u32 4294901760, %v1899_v13 }
 0x188   : > { %2843 = vmatpush.msrb.mxu2 %v5776_v17  ;;  %2912 = vmatpush.msrb.mxu3 %v5777_v50  ;;  %v844_v53 = vadd.f32 %v5781_v31, %v711_v46  ;;  %v5090_v44 = vsub.f32 %v2375_v34, %v5082_v62  ;;  %v2377_v10 = vld [vmem:[#allocation5 + $0x10] sm:$0xff] }
 0x189   : > { %2662 = vmatpush.msrb.mxu0 %v5778_v3  ;;  %1186 = vst [vmem:[%s3851_s25 + $0x20] sm:$0xff] %v1168_v35  ;;  %2734 = vmatpush.msrb.mxu1 %v5777_v50  ;;  %v5098_v3 = vand.u32 4294901760, %v2376_v20 }
 0x18a   : > { %1885 = vmatmul.f32.gmra.mxu0 %v1884_v55  ;;  %2018 = vmatmul.f32.gmra.mxu1 %v4951_v22  ;;  %v932_v58 = vadd.f32 %v5787_v43, %v844_v53 }
 0x18b   : > { %2847 = vmatpush.msrb.mxu2 %v5779_v47  ;;  %2188 = vmatmul.f32.gmra.mxu3 %v1882_v45  ;;  %v5786_v45 = vld [vmem:[#allocation36_spill] sm:$0xff]  ;;  %v5108_v47 = vsub.f32 %v2376_v20, %v5098_v3 }
 0x18c   : > { %2665 = vmatpush.msrb.mxu0 %v5782_v32  ;;  %2914 = vmatpush.msrb.mxu3 %v5783_v30  ;;  %v719_v23 = vadd.f32 %v5786_v45, %v623_v42  ;;  %v1012_v55 = vadd.f32 %v5788_v21, %v932_v58  ;;  %v1263_v32 = vadd.f32 %v3220_v26, %v4930_v8  ;;  %v3221_v8 = vld [vmem:[%s3843_s18 + $0x48] sm:$0xff] }
 0x18d   : > { %2109 = vmatmul.f32.gmra.mxu2 %v5002_v63  ;;  %2736 = vmatpush.msrb.mxu1 %v5783_v30 }
 0x18e   : > { %2851 = vmatpush.msrb.mxu2 %v5784_v59  ;;  %v1110_v15 = vpop.f32.mrf.mxu0  ;;  %v1171_v40 = vpop.f32.mrf.mxu1  ;;  %2916 = vmatpush.msrb.mxu3 %v5785_v54  ;;  %v848_v16 = vadd.f32 %v5789_v27, %v719_v23  ;;  %v1271_v23 = vadd.f32 %v3221_v8, %v4959_v48  ;;  %v3222_v48 = vld [vmem:[%s3843_s18 + $0x50] sm:$0xff] }
 0x18f   : > { %v1172_v63 = vadd.f32 %v1171_v40, %v1107_v9  ;;  %v5077_v6 = vpop.f32.mrf.mxu2  ;;  %v5079_v1 = vpop.f32.mrf.mxu3  ;;  %2738 = vmatpush.msrb.mxu1 %v5785_v54  ;;  %v1111_v61 = vadd.f32 %v1110_v15, %v1012_v55  ;;  %v2434_v9 = vand.u32 4294901760, %v5108_v47  ;;  %v2378_v40 = vld [vmem:[#allocation5 + $0x18] sm:$0xff] }
 0x190   : > { %v937_v60 = vadd.f32 %v4908_v18, %v848_v16  ;;  %v5132_v21 = vand.u32 4294901760, %v2378_v40  ;;  %v1424_v27 = vadd.f32 %v4961_v25, %v1271_v23  ;;  %v1279_v25 = vadd.f32 %v3222_v48, %v4990_v7  ;;  %v3223_v7 = vld [vmem:[%s3843_s18 + $0x58] sm:$0xff] }
 0x191   : > { %1187 = vst [vmem:[%s3851_s25 + $0x28] sm:$0xff] %v1172_v63  ;;  %v2435_v34 = vsub.f32 %v5108_v47, %v2434_v9 }
 0x192   : > { %1893 = vmatmul.f32.gmra.mxu0 %v1892_v24  ;;  %2022 = vmatmul.f32.gmra.mxu1 %v4982_v14  ;;  %v5116_v24 = vand.u32 4294901760, %v2377_v10 }
 0x193   : > { %2194 = vmatmul.f32.gmra.mxu3 %v1890_v39  ;;  %v2426_v39 = vand.u32 4294901760, %v5090_v44  ;;  %v2436_v63 = vand.u32 4294901760, %v2435_v34 }
 0x194   : > { %v5128_v59 = vsub.f32 %v2377_v10, %v5116_v24 }
 0x195   : > { %2114 = vmatmul.f32.gmra.mxu2 %v5033_v12  ;;  %v1018_v12 = vadd.f32 %v4910_v33, %v937_v60  ;;  %v2427_v18 = vsub.f32 %v5090_v44, %v2426_v39 }
 0x196   : > { %v1114_v46 = vpop.f32.mrf.mxu0  ;;  %v1175_v56 = vpop.f32.mrf.mxu1  ;;  %v2442_v13 = vand.u32 4294901760, %v5128_v59 }
 0x197   : > { %v1176_v35 = vadd.f32 %v1175_v56, %v1111_v61  ;;  %v5093_v17 = vpop.f32.mrf.mxu2  ;;  %v5095_v50 = vpop.f32.mrf.mxu3  ;;  %v1115_v2 = vadd.f32 %v1114_v46, %v1018_v12  ;;  %v2379_v46 = vld [vmem:[#allocation5 + $0x20] sm:$0xff] }
 0x198   : > { %v2443_v61 = vsub.f32 %v5128_v59, %v2442_v13 }
 0x199   : > { %1188 = vst [vmem:[%s3851_s25 + $0x30] sm:$0xff] %v1176_v35 }
 0x19a   : > { %1901 = vmatmul.f32.gmra.mxu0 %v1900_v19  ;;  %2026 = vmatmul.f32.gmra.mxu1 %v5013_v29  ;;  %v5143_v19 = vsub.f32 %v2378_v40, %v5132_v21  ;;  %v2444_v26 = vand.u32 4294901760, %v2443_v61 }
 0x19b   : > { %2200 = vmatmul.f32.gmra.mxu3 %v1898_v5  ;;  %v1420_v5 = vadd.f32 %v4932_v36, %v1263_v32 }
 0x19d   : > { %2119 = vmatmul.f32.gmra.mxu2 %v1897_v37  ;;  %v2428_v37 = vand.u32 4294901760, %v2427_v18  ;;  %v2450_v18 = vand.u32 4294901760, %v5143_v19 }
 0x19e   : > { %v1179_v31 = vpop.f32.mrf.mxu1  ;;  %v1501_v53 = vpop.f32.mrf.mxu0 }
 0x19f   : > { %v1180_v42 = vadd.f32 %v1179_v31, %v1115_v2  ;;  %v5111_v33 = vpop.f32.mrf.mxu2  ;;  %v5113_v30 = vpop.f32.mrf.mxu3  ;;  %v1502_v15 = vadd.f32 %v1501_v53, %v1420_v5  ;;  %v5148_v2 = vand.u32 4294901760, %v2379_v46  ;;  %v1428_v31 = vadd.f32 %v4992_v11, %v1279_v25  ;;  %v2380_v5 = vld [vmem:[#allocation5 + $0x28] sm:$0xff] }
 0x1a0   : > { %v2451_v32 = vsub.f32 %v5143_v19, %v2450_v18  ;;  %v1287_v11 = vadd.f32 %v3223_v7, %v5021_v0  ;;  %v5164_v23 = vand.u32 4294901760, %v2380_v5  ;;  %v3224_v0 = vld [vmem:[%s3843_s18 + $0x60] sm:$0xff] }
 0x1a1   : > { %1189 = vst [vmem:[%s3851_s25 + $0x38] sm:$0xff] %v1180_v42  ;;  %v5159_v42 = vsub.f32 %v2379_v46, %v5148_v2 }
 0x1a2   : > { %2030 = vmatmul.f32.gmra.mxu1 %v5044_v52  ;;  %2269 = vmatmul.f32.vlgmr.msra.gmra.mxu0 %v4859_v57 }
 0x1a3   : > { %2586 = vmatmul.f32.vlgmr.msra.gmra.mxu3 %v5082_v62 }
 0x1a5   : > { %2429 = vmatmul.f32.vlgmr.msra.gmra.mxu2 %v2428_v37 }
 0x1a6   : > { %v1506_v54 = vpop.f32.mrf.mxu0 }
 0x1a7   : > { %v1575_v45 = vpop.f32.mrf.mxu1  ;;  %v1686_v36 = vpop.f32.mrf.mxu2  ;;  %v1507_v20 = vadd.f32 %v1506_v54, %v1424_v27  ;;  %v2452_v54 = vand.u32 4294901760, %v2451_v32 }
 0x1a8   : > { %v1576_v43 = vadd.f32 %v1575_v45, %v1502_v15  ;;  %v1751_v58 = vpop.f32.mrf.mxu3  ;;  %v2458_v45 = vand.u32 4294901760, %v5159_v42 }
 0x1aa   : > { %v1687_v55 = vadd.f32 %v1686_v36, %v1576_v43  ;;  %2273 = vmatmul.f32.gmra.mxu0 %v4883_v4  ;;  %2334 = vmatmul.f32.vlgmr.msra.gmra.mxu1 %v4859_v57  ;;  %v1432_v36 = vadd.f32 %v5023_v28, %v1287_v11  ;;  %v1295_v28 = vadd.f32 %v3224_v0, %v5052_v51  ;;  %v3225_v51 = vld [vmem:[%s3843_s18 + $0x68] sm:$0xff] }
 0x1ab   : > { %2590 = vmatmul.f32.gmra.mxu3 %v5098_v3 }
 0x1ac   : > { %v1752_v16 = vadd.f32 %v1751_v58, %v1687_v55  ;;  %v5175_v55 = vsub.f32 %v2380_v5, %v5164_v23 }
 0x1ad   : > { %2437 = vmatmul.f32.gmra.mxu2 %v2436_v63  ;;  %v2459_v63 = vsub.f32 %v5159_v42, %v2458_v45 }
 0x1ae   : > { %3228 = vst [vmem:[%s3851_s25 + $0x40] sm:$0xff] %v1752_v16  ;;  %v1511_v56 = vpop.f32.mrf.mxu0  ;;  %v2381_v16 = vld [vmem:[#allocation5 + $0x30] sm:$0xff] }
 0x1af   : > { %v1581_v57 = vpop.f32.mrf.mxu1  ;;  %v1512_v37 = vadd.f32 %v1511_v56, %v1428_v31  ;;  %v2460_v56 = vand.u32 4294901760, %v2459_v63  ;;  %v5180_v25 = vand.u32 4294901760, %v2381_v16 }
 0x1b0   : > { %v1582_v60 = vadd.f32 %v1581_v57, %v1507_v20  ;;  %v1690_v35 = vpop.f32.mrf.mxu2  ;;  %v1755_v12 = vpop.f32.mrf.mxu3  ;;  %v2466_v57 = vand.u32 4294901760, %v5175_v55 }
 0x1b2   : > { %v1691_v10 = vadd.f32 %v1690_v35, %v1582_v60  ;;  %2277 = vmatmul.f32.gmra.mxu0 %v4902_v38  ;;  %2338 = vmatmul.f32.gmra.mxu1 %v4883_v4  ;;  %v1436_v35 = vadd.f32 %v5054_v49, %v1295_v28  ;;  %v1303_v49 = vadd.f32 %v3225_v51, %v5077_v6  ;;  %v3226_v6 = vld [vmem:[%s3843_s18 + $0x70] sm:$0xff] }
 0x1b3   : > { %2594 = vmatmul.f32.gmra.mxu3 %v5116_v24 }
 0x1b4   : > { %v1756_v53 = vadd.f32 %v1755_v12, %v1691_v10  ;;  %v5191_v10 = vsub.f32 %v2381_v16, %v5180_v25 }
 0x1b5   : > { %2445 = vmatmul.f32.gmra.mxu2 %v2444_v26  ;;  %v2467_v26 = vsub.f32 %v5175_v55, %v2466_v57 }
 0x1b6   : > { %3229 = vst [vmem:[%s3851_s25 + $0x48] sm:$0xff] %v1756_v53  ;;  %v1516_v8 = vpop.f32.mrf.mxu0  ;;  %v2382_v53 = vld [vmem:[#allocation5 + $0x38] sm:$0xff] }
 0x1b7   : > { %v1587_v4 = vpop.f32.mrf.mxu1  ;;  %v1517_v27 = vadd.f32 %v1516_v8, %v1432_v36  ;;  %v2468_v8 = vand.u32 4294901760, %v2467_v26  ;;  %v5196_v11 = vand.u32 4294901760, %v2382_v53 }
 0x1b8   : > { %v1588_v34 = vadd.f32 %v1587_v4, %v1512_v37  ;;  %v1694_v15 = vpop.f32.mrf.mxu2  ;;  %v1759_v40 = vpop.f32.mrf.mxu3  ;;  %v2474_v4 = vand.u32 4294901760, %v5191_v10 }
 0x1ba   : > { %v1695_v43 = vadd.f32 %v1694_v15, %v1588_v34  ;;  %2281 = vmatmul.f32.gmra.mxu0 %v4923_v41  ;;  %2342 = vmatmul.f32.gmra.mxu1 %v4902_v38  ;;  %v1440_v15 = vadd.f32 %v5079_v1, %v1303_v49 }
 0x1bb   : > { %2598 = vmatmul.f32.gmra.mxu3 %v5132_v21 }
 0x1bc   : > { %v1760_v58 = vadd.f32 %v1759_v40, %v1695_v43  ;;  %v5207_v43 = vsub.f32 %v2382_v53, %v5196_v11 }
 0x1bd   : > { %2453 = vmatmul.f32.gmra.mxu2 %v2452_v54  ;;  %v2475_v54 = vsub.f32 %v5191_v10, %v2474_v4 }
 0x1be   : > { %3230 = vst [vmem:[%s3851_s25 + $0x50] sm:$0xff] %v1760_v58  ;;  %v1521_v48 = vpop.f32.mrf.mxu0 }
 0x1bf   : > { %v1593_v38 = vpop.f32.mrf.mxu1  ;;  %v1522_v31 = vadd.f32 %v1521_v48, %v1436_v35  ;;  %v2476_v16 = vand.u32 4294901760, %v2475_v54  ;;  %v2482_v48 = vand.u32 4294901760, %v5207_v43 }
 0x1c0   : > { %v1594_v61 = vadd.f32 %v1593_v38, %v1517_v27  ;;  %v1698_v20 = vpop.f32.mrf.mxu2  ;;  %v1763_v46 = vpop.f32.mrf.mxu3 }
 0x1c2   : > { %v1699_v60 = vadd.f32 %v1698_v20, %v1594_v61  ;;  %2285 = vmatmul.f32.gmra.mxu0 %v4951_v22  ;;  %2346 = vmatmul.f32.gmra.mxu1 %v4923_v41  ;;  %v3227_v20 = vld [vmem:[%s3843_s18 + $0x78] sm:$0xff] }
 0x1c3   : > { %2602 = vmatmul.f32.gmra.mxu3 %v5148_v2  ;;  %v1319_v35 = vadd.f32 %v3227_v20, %v5111_v33  ;;  %v3238_v20 = vld [vmem:[%s3843_s18 + $0x90] sm:$0xff] }
 0x1c4   : > { %v1764_v12 = vadd.f32 %v1763_v46, %v1699_v60 }
 0x1c5   : > { %2461 = vmatmul.f32.gmra.mxu2 %v2460_v56 }
 0x1c6   : > { %3231 = vst [vmem:[%s3851_s25 + $0x58] sm:$0xff] %v1764_v12  ;;  %v1526_v7 = vpop.f32.mrf.mxu0 }
 0x1c7   : > { %v1599_v41 = vpop.f32.mrf.mxu1  ;;  %v1527_v36 = vadd.f32 %v1526_v7, %v1440_v15 }
 0x1c8   : > { %v1600_v32 = vadd.f32 %v1599_v41, %v1522_v31  ;;  %v1702_v37 = vpop.f32.mrf.mxu2  ;;  %v1767_v5 = vpop.f32.mrf.mxu3  ;;  %v1448_v31 = vadd.f32 %v5113_v30, %v1319_v35 }
 0x1ca   : > { %v1703_v34 = vadd.f32 %v1702_v37, %v1600_v32  ;;  %2289 = vmatmul.f32.gmra.mxu0 %v4982_v14  ;;  %2350 = vmatmul.f32.gmra.mxu1 %v4951_v22  ;;  %v1311_v22 = vadd.f32 %v3226_v6, %v5093_v17  ;;  %v2483_v17 = vsub.f32 %v5207_v43, %v2482_v48 }
 0x1cb   : > { %2606 = vmatmul.f32.gmra.mxu3 %v5164_v23 }
 0x1cc   : > { %v1768_v40 = vadd.f32 %v1767_v5, %v1703_v34  ;;  %v1444_v28 = vadd.f32 %v5095_v50, %v1311_v22  ;;  %v2484_v50 = vand.u32 4294901760, %v2483_v17 }
 0x1cd   : > { %2469 = vmatmul.f32.gmra.mxu2 %v2468_v8 }
 0x1ce   : > { %3232 = vst [vmem:[%s3851_s25 + $0x60] sm:$0xff] %v1768_v40  ;;  %v1531_v58 = vpop.f32.mrf.mxu0 }
 0x1cf   : > { %v1605_v0 = vpop.f32.mrf.mxu1  ;;  %v1532_v46 = vadd.f32 %v1531_v58, %v1444_v28 }
 0x1d0   : > { %v1606_v1 = vadd.f32 %v1605_v0, %v1527_v36  ;;  %v1706_v63 = vpop.f32.mrf.mxu2  ;;  %v1771_v27 = vpop.f32.mrf.mxu3 }
 0x1d2   : > { %v1707_v38 = vadd.f32 %v1706_v63, %v1606_v1  ;;  %2293 = vmatmul.f32.gmra.mxu0 %v5013_v29  ;;  %2354 = vmatmul.f32.gmra.mxu1 %v4982_v14 }
 0x1d3   : > { %2610 = vmatmul.f32.gmra.mxu3 %v5180_v25 }
 0x1d4   : > { %v1772_v61 = vadd.f32 %v1771_v27, %v1707_v38 }
 0x1d5   : > { %2477 = vmatmul.f32.gmra.mxu2 %v2476_v16 }
 0x1d6   : > { %3233 = vst [vmem:[%s3851_s25 + $0x68] sm:$0xff] %v1772_v61  ;;  %v1536_v56 = vpop.f32.mrf.mxu0 }
 0x1d7   : > { %v1611_v60 = vpop.f32.mrf.mxu1  ;;  %v1537_v7 = vadd.f32 %v1536_v56, %v1448_v31 }
 0x1d8   : > { %v1612_v12 = vadd.f32 %v1611_v60, %v1532_v46  ;;  %v1710_v14 = vpop.f32.mrf.mxu2  ;;  %v1775_v51 = vpop.f32.mrf.mxu3 }
 0x1da   : > { %v1711_v26 = vadd.f32 %v1710_v14, %v1612_v12  ;;  %2297 = vmatmul.f32.gmra.mxu0 %v5044_v52  ;;  %2358 = vmatmul.f32.gmra.mxu1 %v5013_v29 }
 0x1db   : > { %2614 = vmatmul.f32.gmra.mxu3 %v5196_v11 }
 0x1dc   : > { %v1776_v53 = vadd.f32 %v1775_v51, %v1711_v26  ;;  %v3239_v51 = vld [vmem:[%s3843_s18 + $0x98] sm:$0xff] }
 0x1dd   : > { %2485 = vmatmul.f32.gmra.mxu2 %v2484_v50 }
 0x1de   : > { %3234 = vst [vmem:[%s3851_s25 + $0x70] sm:$0xff] %v1776_v53  ;;  %v1846_v33 = vpop.f32.mrf.mxu0 }
 0x1df   : > { %v1617_v41 = vpop.f32.mrf.mxu1 }
 0x1e0   : > { %v1618_v49 = vadd.f32 %v1617_v41, %v1537_v7  ;;  %v1714_v32 = vpop.f32.mrf.mxu2  ;;  %v1779_v37 = vpop.f32.mrf.mxu3 }
 0x1e2   : > { %v1715_v5 = vadd.f32 %v1714_v32, %v1618_v49  ;;  %2362 = vmatmul.f32.gmra.mxu1 %v5044_v52  ;;  %2668 = vmatmul.f32.vlgmr.msrb.gmra.mxu0 %v5090_v44 }
 0x1e3   : > { %2918 = vmatmul.f32.vlgmr.msrb.gmra.mxu3 %v5082_v62 }
 0x1e4   : > { %v1780_v29 = vadd.f32 %v1779_v37, %v1715_v5  ;;  %v3240_v5 = vld [vmem:[%s3843_s18 + $0xa0] sm:$0xff] }
 0x1e5   : > { %2853 = vmatmul.f32.vlgmr.msrb.gmra.mxu2 %v5082_v62 }
 0x1e6   : > { %3235 = vst [vmem:[%s3851_s25 + $0x78] sm:$0xff] %v1780_v29  ;;  %v1854_v30 = vpop.f32.mrf.mxu0 }
 0x1e7   : > { %v2003_v8 = vpop.f32.mrf.mxu1 }
 0x1e8   : > { %v2085_v34 = vpop.f32.mrf.mxu2  ;;  %v5232_v15 = vpop.f32.mrf.mxu3 }
 0x1ea   : > { %2673 = vmatmul.f32.gmra.mxu0 %v5108_v47  ;;  %2742 = vmatmul.f32.vlgmr.msrb.gmra.mxu1 %v2426_v39 }
 0x1eb   : > { %2922 = vmatmul.f32.gmra.mxu3 %v5098_v3 }
 0x1ed   : > { %2857 = vmatmul.f32.gmra.mxu2 %v5098_v3 }
 0x1ee   : > { %v5239_v52 = vpop.f32.mrf.mxu0 }
 0x1ef   : > { %v2007_v40 = vpop.f32.mrf.mxu1  ;;  %v1863_v56 = vadd.f32 %v3238_v20, %v5239_v52 }
 0x1f0   : > { %v5241_v6 = vpop.f32.mrf.mxu2  ;;  %v5243_v62 = vpop.f32.mrf.mxu3 }
 0x1f2   : > { %2678 = vmatmul.f32.gmra.mxu0 %v5128_v59  ;;  %2748 = vmatmul.f32.gmra.mxu1 %v2434_v9 }
 0x1f3   : > { %2926 = vmatmul.f32.gmra.mxu3 %v5116_v24 }
 0x1f5   : > { %2861 = vmatmul.f32.gmra.mxu2 %v5116_v24 }
 0x1f7   : > { %v5250_v44 = vpop.f32.mrf.mxu0  ;;  %v5252_v39 = vpop.f32.mrf.mxu1 }
 0x1f8   : > { %v5254_v3 = vpop.f32.mrf.mxu2  ;;  %v5256_v54 = vpop.f32.mrf.mxu3  ;;  %v1871_v53 = vadd.f32 %v3239_v51, %v5250_v44 }
 0x1fa   : > { %2683 = vmatmul.f32.gmra.mxu0 %v5143_v19  ;;  %2754 = vmatmul.f32.gmra.mxu1 %v2442_v13 }
 0x1fb   : > { %2930 = vmatmul.f32.gmra.mxu3 %v5132_v21 }
 0x1fd   : > { %2865 = vmatmul.f32.gmra.mxu2 %v5132_v21 }
 0x1ff   : > { %v5263_v47 = vpop.f32.mrf.mxu0  ;;  %v5265_v9 = vpop.f32.mrf.mxu1 }
 0x200   : > { %v5267_v24 = vpop.f32.mrf.mxu2  ;;  %v5269_v36 = vpop.f32.mrf.mxu3  ;;  %v2016_v37 = vadd.f32 %v5265_v9, %v1871_v53 }
 0x202   : > { %2688 = vmatmul.f32.gmra.mxu0 %v5159_v42  ;;  %2760 = vmatmul.f32.gmra.mxu1 %v2450_v18  ;;  %v3236_v42 = vld [vmem:[%s3843_s18 + $0x80] sm:$0xff] }
 0x203   : > { %2934 = vmatmul.f32.gmra.mxu3 %v5148_v2  ;;  %v1847_v22 = vadd.f32 %v3236_v42, %v1846_v33 }
 0x205   : > { %2869 = vmatmul.f32.gmra.mxu2 %v5148_v2 }
 0x207   : > { %v5276_v59 = vpop.f32.mrf.mxu0  ;;  %v5278_v13 = vpop.f32.mrf.mxu1 }
 0x208   : > { %v5280_v21 = vpop.f32.mrf.mxu2  ;;  %v5282_v58 = vpop.f32.mrf.mxu3 }
 0x20a   : > { %2693 = vmatmul.f32.gmra.mxu0 %v5175_v55  ;;  %2766 = vmatmul.f32.gmra.mxu1 %v2458_v45  ;;  %v2004_v55 = vadd.f32 %v2003_v8, %v1847_v22 }
 0x20b   : > { %2938 = vmatmul.f32.gmra.mxu3 %v5164_v23 }
 0x20c   : > { %v2086_v38 = vadd.f32 %v2085_v34, %v2004_v55  ;;  %v1879_v34 = vadd.f32 %v3240_v5, %v5263_v47 }
 0x20d   : > { %2873 = vmatmul.f32.gmra.mxu2 %v5164_v23 }
 0x20e   : > { %v2020_v44 = vadd.f32 %v5278_v13, %v1879_v34 }
 0x20f   : > { %v5289_v19 = vpop.f32.mrf.mxu0  ;;  %v5291_v18 = vpop.f32.mrf.mxu1 }
 0x210   : > { %v5293_v2 = vpop.f32.mrf.mxu2  ;;  %v5295_v0 = vpop.f32.mrf.mxu3 }
 0x212   : > { %2698 = vmatmul.f32.gmra.mxu0 %v5191_v10  ;;  %2772 = vmatmul.f32.gmra.mxu1 %v2466_v57  ;;  %v3237_v57 = vld [vmem:[%s3843_s18 + $0x88] sm:$0xff]  ;;  %v2160_v10 = vadd.f32 %v5232_v15, %v2086_v38  ;;  %v2101_v15 = vadd.f32 %v5267_v24, %v2016_v37  ;;  %v2106_v24 = vadd.f32 %v5280_v21, %v2020_v44 }
 0x213   : > { %2942 = vmatmul.f32.gmra.mxu3 %v5180_v25  ;;  %v1855_v16 = vadd.f32 %v3237_v57, %v1854_v30  ;;  %v3242_v57 = vld [vmem:[%s3843_s18 + $0xb0] sm:$0xff] }
 0x215   : > { %2877 = vmatmul.f32.gmra.mxu2 %v5180_v25 }
 0x217   : > { %v5303_v45 = vpop.f32.mrf.mxu0  ;;  %v5305_v23 = vpop.f32.mrf.mxu1 }
 0x218   : > { %v5307_v1 = vpop.f32.mrf.mxu2  ;;  %v5309_v63 = vpop.f32.mrf.mxu3 }
 0x21a   : > { %2703 = vmatmul.f32.gmra.mxu0 %v5207_v43  ;;  %2778 = vmatmul.f32.gmra.mxu1 %v2474_v4  ;;  %v2008_v4 = vadd.f32 %v2007_v40, %v1855_v16 }
 0x21b   : > { %2946 = vmatmul.f32.gmra.mxu3 %v5196_v11 }
 0x21c   : > { %v2091_v60 = vadd.f32 %v5241_v6, %v2008_v4 }
 0x21d   : > { %2881 = vmatmul.f32.gmra.mxu2 %v5196_v11 }
 0x21e   : > { %v2166_v43 = vadd.f32 %v5243_v62, %v2091_v60  ;;  %v2178_v62 = vadd.f32 %v5269_v36, %v2101_v15  ;;  %v2184_v36 = vadd.f32 %v5282_v58, %v2106_v24 }
 0x21f   : > { %v5317_v25 = vpop.f32.mrf.mxu1  ;;  %v2270_v27 = vpop.f32.mrf.mxu0 }
 0x220   : > { %v5319_v28 = vpop.f32.mrf.mxu2  ;;  %v5321_v61 = vpop.f32.mrf.mxu3  ;;  %v2271_v17 = vadd.f32 %v2270_v27, %v2160_v10 }
 0x222   : > { %2784 = vmatmul.f32.gmra.mxu1 %v2482_v48  ;;  %v2012_v48 = vadd.f32 %v5252_v39, %v1863_v56  ;;  %v3241_v39 = vld [vmem:[%s3843_s18 + $0xa8] sm:$0xff] }
 0x223   : > { %v1887_v47 = vadd.f32 %v3241_v39, %v5276_v59  ;;  %v1895_v59 = vadd.f32 %v3242_v57, %v5289_v19 }
 0x224   : > { %v2096_v7 = vadd.f32 %v5254_v3, %v2012_v48 }
 0x225   : > { %v2024_v13 = vadd.f32 %v5291_v18, %v1887_v47  ;;  %v2028_v58 = vadd.f32 %v5305_v23, %v1895_v59  ;;  %v3243_v18 = vld [vmem:[%s3843_s18 + $0xb8] sm:$0xff] }
 0x226   : > { %v2172_v32 = vadd.f32 %v5256_v54, %v2096_v7  ;;  %v1903_v19 = vadd.f32 %v3243_v18, %v5303_v45  ;;  %v3252_v7 = vld [vmem:[%s3843_s18 + $0xc0] sm:$0xff] }
 0x227   : > { %v2274_v11 = vpop.f32.mrf.mxu0  ;;  %v2335_v46 = vpop.f32.mrf.mxu1  ;;  %v2111_v21 = vadd.f32 %v5293_v2, %v2024_v13  ;;  %v2116_v2 = vadd.f32 %v5307_v1, %v2028_v58 }
 0x228   : > { %v2336_v35 = vadd.f32 %v2335_v46, %v2271_v17  ;;  %v5329_v12 = vpop.f32.mrf.mxu2  ;;  %v5331_v14 = vpop.f32.mrf.mxu3  ;;  %v2275_v50 = vadd.f32 %v2274_v11, %v2166_v43  ;;  %v2032_v23 = vadd.f32 %v5317_v25, %v1903_v19 }
 0x229   : > { %v2190_v17 = vadd.f32 %v5295_v0, %v2111_v21  ;;  %v2196_v0 = vadd.f32 %v5309_v63, %v2116_v2  ;;  %v2431_v25 = vadd.f32 %v3252_v7, %v5329_v12 }
 0x22a   : > { %3244 = vst [vmem:[%s3851_s25 + $0x80] sm:$0xff] %v2336_v35 }
 0x22f   : > { %v2278_v26 = vpop.f32.mrf.mxu0  ;;  %v2339_v31 = vpop.f32.mrf.mxu1 }
 0x230   : > { %v2340_v41 = vadd.f32 %v2339_v31, %v2275_v50  ;;  %v5339_v33 = vpop.f32.mrf.mxu2  ;;  %v5341_v49 = vpop.f32.mrf.mxu3  ;;  %v2279_v29 = vadd.f32 %v2278_v26, %v2172_v32  ;;  %v2121_v26 = vadd.f32 %v5319_v28, %v2032_v23 }
 0x232   : > { %3245 = vst [vmem:[%s3851_s25 + $0x88] sm:$0xff] %v2340_v41  ;;  %v2202_v53 = vadd.f32 %v5321_v61, %v2121_v26 }
 0x237   : > { %v2282_v30 = vpop.f32.mrf.mxu0  ;;  %v2343_v8 = vpop.f32.mrf.mxu1 }
 0x238   : > { %v2344_v52 = vadd.f32 %v2343_v8, %v2279_v29  ;;  %v5349_v40 = vpop.f32.mrf.mxu2  ;;  %v5351_v6 = vpop.f32.mrf.mxu3  ;;  %v2283_v3 = vadd.f32 %v2282_v30, %v2178_v62  ;;  %v2588_v29 = vadd.f32 %v5331_v14, %v2431_v25  ;;  %v3253_v30 = vld [vmem:[%s3843_s18 + $0xc8] sm:$0xff] }
 0x239   : > { %v2439_v15 = vadd.f32 %v3253_v30, %v5339_v33 }
 0x23a   : > { %3246 = vst [vmem:[%s3851_s25 + $0x90] sm:$0xff] %v2344_v52 }
 0x23b   : > { %v2592_v39 = vadd.f32 %v5341_v49, %v2439_v15 }
 0x23f   : > { %v2286_v54 = vpop.f32.mrf.mxu0  ;;  %v2347_v9 = vpop.f32.mrf.mxu1 }
 0x240   : > { %v2348_v42 = vadd.f32 %v2347_v9, %v2283_v3  ;;  %v5359_v22 = vpop.f32.mrf.mxu2  ;;  %v5361_v55 = vpop.f32.mrf.mxu3  ;;  %v2287_v27 = vadd.f32 %v2286_v54, %v2184_v36  ;;  %v3254_v54 = vld [vmem:[%s3843_s18 + $0xd0] sm:$0xff] }
 0x241   : > { %v2447_v24 = vadd.f32 %v3254_v54, %v5349_v40 }
 0x242   : > { %3247 = vst [vmem:[%s3851_s25 + $0x98] sm:$0xff] %v2348_v42 }
 0x243   : > { %v2596_v57 = vadd.f32 %v5351_v6, %v2447_v24 }
 0x247   : > { %v2290_v16 = vpop.f32.mrf.mxu0  ;;  %v2351_v38 = vpop.f32.mrf.mxu1 }
 0x248   : > { %v2352_v10 = vadd.f32 %v2351_v38, %v2287_v27  ;;  %v5369_v4 = vpop.f32.mrf.mxu2  ;;  %v5371_v20 = vpop.f32.mrf.mxu3  ;;  %v2291_v11 = vadd.f32 %v2290_v16, %v2190_v17  ;;  %v3255_v16 = vld [vmem:[%s3843_s18 + $0xd8] sm:$0xff] }
 0x249   : > { %v2455_v21 = vadd.f32 %v3255_v16, %v5359_v22 }
 0x24a   : > { %3248 = vst [vmem:[%s3851_s25 + $0xa0] sm:$0xff] %v2352_v10 }
 0x24b   : > { %v2600_v18 = vadd.f32 %v5361_v55, %v2455_v21 }
 0x24f   : > { %v2294_v46 = vpop.f32.mrf.mxu0  ;;  %v2355_v56 = vpop.f32.mrf.mxu1 }
 0x250   : > { %v2356_v60 = vadd.f32 %v2355_v56, %v2291_v11  ;;  %v5379_v35 = vpop.f32.mrf.mxu2  ;;  %v5381_v43 = vpop.f32.mrf.mxu3  ;;  %v2295_v48 = vadd.f32 %v2294_v46, %v2196_v0  ;;  %v3256_v46 = vld [vmem:[%s3843_s18 + $0xe0] sm:$0xff] }
 0x251   : > { %v2463_v2 = vadd.f32 %v3256_v46, %v5369_v4 }
 0x252   : > { %3249 = vst [vmem:[%s3851_s25 + $0xa8] sm:$0xff] %v2356_v60 }
 0x257   : > { %v2298_v51 = vpop.f32.mrf.mxu0  ;;  %v2359_v50 = vpop.f32.mrf.mxu1 }
 0x258   : > { %v2360_v45 = vadd.f32 %v2359_v50, %v2295_v48  ;;  %v5387_v1 = vpop.f32.mrf.mxu2  ;;  %v5389_v31 = vpop.f32.mrf.mxu3  ;;  %v2299_v41 = vadd.f32 %v2298_v51, %v2202_v53  ;;  %v2604_v48 = vadd.f32 %v5371_v20, %v2463_v2  ;;  %v3257_v50 = vld [vmem:[%s3843_s18 + $0xe8] sm:$0xff] }
 0x259   : > { %v2471_v53 = vadd.f32 %v3257_v50, %v5379_v35 }
 0x25a   : > { %3250 = vst [vmem:[%s3851_s25 + $0xb0] sm:$0xff] %v2360_v45 }
 0x25f   : > { %v2363_v63 = vpop.f32.mrf.mxu1  ;;  %v2669_v32 = vpop.f32.mrf.mxu0 }
 0x260   : > { %v2364_v37 = vadd.f32 %v2363_v63, %v2299_v41  ;;  %v5395_v5 = vpop.f32.mrf.mxu2  ;;  %v5397_v28 = vpop.f32.mrf.mxu3  ;;  %v2670_v8 = vadd.f32 %v2669_v32, %v2588_v29  ;;  %v2608_v32 = vadd.f32 %v5381_v43, %v2471_v53 }
 0x262   : > { %3251 = vst [vmem:[%s3851_s25 + $0xb8] sm:$0xff] %v2364_v37  ;;  %v3258_v37 = vld [vmem:[%s3843_s18 + $0xf0] sm:$0xff] }
 0x263   : > { %v2479_v30 = vadd.f32 %v3258_v37, %v5387_v1 }
 0x267   : > { %v2674_v34 = vpop.f32.mrf.mxu0  ;;  %v2743_v61 = vpop.f32.mrf.mxu1 }
 0x268   : > { %v2744_v52 = vadd.f32 %v2743_v61, %v2670_v8  ;;  %v2854_v62 = vpop.f32.mrf.mxu2  ;;  %v2919_v44 = vpop.f32.mrf.mxu3  ;;  %v2675_v9 = vadd.f32 %v2674_v34, %v2592_v39 }
 0x26a   : > { %v2855_v12 = vadd.f32 %v2854_v62, %v2744_v52  ;;  %v2612_v52 = vadd.f32 %v5389_v31, %v2479_v30 }
 0x26c   : > { %v2920_v3 = vadd.f32 %v2919_v44, %v2855_v12  ;;  %v3259_v44 = vld [vmem:[%s3843_s18 + $0xf8] sm:$0xff] }
 0x26d   : > { %v2487_v39 = vadd.f32 %v3259_v44, %v5395_v5 }
 0x26e   : > { %3260 = vst [vmem:[%s3851_s25 + $0xc0] sm:$0xff] %v2920_v3 }
 0x26f   : > { %v2679_v47 = vpop.f32.mrf.mxu0  ;;  %v2749_v14 = vpop.f32.mrf.mxu1 }
 0x270   : > { %v2750_v42 = vadd.f32 %v2749_v14, %v2675_v9  ;;  %v2858_v36 = vpop.f32.mrf.mxu2  ;;  %v2923_v13 = vpop.f32.mrf.mxu3  ;;  %v2680_v49 = vadd.f32 %v2679_v47, %v2596_v57  ;;  %v2616_v14 = vadd.f32 %v5397_v28, %v2487_v39 }
 0x272   : > { %v2859_v33 = vadd.f32 %v2858_v36, %v2750_v42 }
 0x274   : > { %v2924_v27 = vadd.f32 %v2923_v13, %v2859_v33 }
 0x276   : > { %3261 = vst [vmem:[%s3851_s25 + $0xc8] sm:$0xff] %v2924_v27 }
 0x277   : > { %v2684_v38 = vpop.f32.mrf.mxu0  ;;  %v2755_v59 = vpop.f32.mrf.mxu1 }
 0x278   : > { %v2756_v10 = vadd.f32 %v2755_v59, %v2680_v49  ;;  %v2862_v17 = vpop.f32.mrf.mxu2  ;;  %v2927_v58 = vpop.f32.mrf.mxu3  ;;  %v2685_v6 = vadd.f32 %v2684_v38, %v2600_v18 }
 0x27a   : > { %v2863_v40 = vadd.f32 %v2862_v17, %v2756_v10 }
 0x27c   : > { %v2928_v11 = vadd.f32 %v2927_v58, %v2863_v40 }
 0x27e   : > { %3262 = vst [vmem:[%s3851_s25 + $0xd0] sm:$0xff] %v2928_v11 }
 0x27f   : > { %v2689_v56 = vpop.f32.mrf.mxu0  ;;  %v2761_v19 = vpop.f32.mrf.mxu1 }
 0x280   : > { %v2762_v60 = vadd.f32 %v2761_v19, %v2685_v6  ;;  %v2866_v0 = vpop.f32.mrf.mxu2  ;;  %v2931_v23 = vpop.f32.mrf.mxu3  ;;  %v2690_v55 = vadd.f32 %v2689_v56, %v2604_v48 }
 0x282   : > { %v2867_v22 = vadd.f32 %v2866_v0, %v2762_v60 }
 0x284   : > { %v2932_v51 = vadd.f32 %v2931_v23, %v2867_v22 }
 0x286   : > { %3263 = vst [vmem:[%s3851_s25 + $0xd8] sm:$0xff] %v2932_v51 }
 0x287   : > { %v2694_v26 = vpop.f32.mrf.mxu0  ;;  %v2767_v45 = vpop.f32.mrf.mxu1 }
 0x288   : > { %v2768_v7 = vadd.f32 %v2767_v45, %v2690_v55  ;;  %v2870_v41 = vpop.f32.mrf.mxu2  ;;  %v2935_v63 = vpop.f32.mrf.mxu3  ;;  %v2695_v20 = vadd.f32 %v2694_v26, %v2608_v32 }
 0x28a   : > { %v2871_v4 = vadd.f32 %v2870_v41, %v2768_v7 }
 0x28c   : > { %v2936_v25 = vadd.f32 %v2935_v63, %v2871_v4 }
 0x28e   : > { %3264 = vst [vmem:[%s3851_s25 + $0xe0] sm:$0xff] %v2936_v25 }
 0x28f   : > { %v2773_v29 = vpop.f32.mrf.mxu1  ;;  %v2699_v15 = vpop.f32.mrf.mxu0 }
 0x290   : > { %v2774_v8 = vadd.f32 %v2773_v29, %v2695_v20  ;;  %v2874_v34 = vpop.f32.mrf.mxu2  ;;  %v2939_v61 = vpop.f32.mrf.mxu3  ;;  %v2700_v12 = vadd.f32 %v2699_v15, %v2612_v52 }
 0x292   : > { %v2875_v35 = vadd.f32 %v2874_v34, %v2774_v8 }
 0x294   : > { %v2940_v62 = vadd.f32 %v2939_v61, %v2875_v35 }
 0x296   : > { %3265 = vst [vmem:[%s3851_s25 + $0xe8] sm:$0xff] %v2940_v62 }
 0x297   : > { %v2779_v43 = vpop.f32.mrf.mxu1  ;;  %v2704_v47 = vpop.f32.mrf.mxu0 }
 0x298   : > { %v2780_v3 = vadd.f32 %v2779_v43, %v2700_v12  ;;  %v2878_v54 = vpop.f32.mrf.mxu2  ;;  %v2943_v1 = vpop.f32.mrf.mxu3  ;;  %v2705_v42 = vadd.f32 %v2704_v47, %v2616_v14 }
 0x29a   : > { %v2879_v9 = vadd.f32 %v2878_v54, %v2780_v3 }
 0x29c   : > { %v2944_v24 = vadd.f32 %v2943_v1, %v2879_v9 }
 0x29e   : > { %3266 = vst [vmem:[%s3851_s25 + $0xf0] sm:$0xff] %v2944_v24 }
 0x29f   : > { %v2785_v31 = vpop.f32.mrf.mxu1 }
 0x2a0   : > { %v2786_v36 = vadd.f32 %v2785_v31, %v2705_v42  ;;  %v2882_v13 = vpop.f32.mrf.mxu2  ;;  %v2947_v33 = vpop.f32.mrf.mxu3 }
 0x2a2   : > { %v2883_v57 = vadd.f32 %v2882_v13, %v2786_v36 }
 0x2a4   : > { %v2948_v27 = vadd.f32 %v2947_v33, %v2883_v57 }
 0x2a6   : > { %3267 = vst [vmem:[%s3851_s25 + $0xf8] sm:$0xff] %v2948_v27 }
 0x2a7   : > { %s2971_s20 = scalar_lea.hbm %s5475_s7, %s3184_s2  ;;  %s2982_s10 = sshll.u32 %s3851_s25, 4  ;;  %s2983_s10 = int_to_ptr.vmem [resolvable:$true] %s2982_s10 }
 0x2a8   : > { %s2984_s23 = sshll.u32 %s2971_s20, 4  ;;  %s3637_s13 = smov 1024   ;;  %s2985_s23 = int_to_ptr.hbm [resolvable:$true] %s2984_s23 }
 0x2a9   : > { %3307 = sst [smem:[#allocation23]] (%p3738_p11), %s3637_s13  ;;  %s3638_s8 = smov 4096  }
 0x2aa   : > { %3308 = sst [smem:[#allocation23 + $0x1]] (%p3738_p11), %s3638_s8  ;;  %s3639_s9 = smov 8  }
 0x2ab   : > { %3309 = sst [smem:[#allocation23 + $0x2]] (%p3738_p11), %s3639_s9  ;;  %s3640_s27 = smov 128  }
 0x2ac   : > { %3310 = sst [smem:[#allocation23 + $0x3]] (%p3738_p11), %s3640_s27  ;;  %s3641_s2 = smov [#allocation22]  }
 0x2ad   : > { %3311 = sst [smem:[#allocation23 + $0x4]] (%p3738_p11), %s3640_s27  ;;  %s3642_s25 = smov 0  }
 0x2ae   : > { %3312 = sst [smem:[#allocation23 + $0x5]] (%p3738_p11), %s3639_s9 }
 0x2af   : > { %3313 = dma.general (%p3738_p11), %s2983_s10, 4096, %s2985_s23, %s2960_s11, %s3641_s2, [#allocation23], %s3642_s25, 0  }
 0x2b0 PF: > { %p3340_p5 = scmp.ge.s32.totalorder %s3617_s0, 2  ;;  %s3012_s4 = sand.u32 1, %s3605_s28  }
 0x2b1   : > { %s3013_s12 = scalar_lea.sflag [#allocation10], %s3012_s4 }
 0x2b2   : > { %p3329_p6 = pnand %p3340_p5, %p3742_p12 }
 0x2b4   : > { %p3330_p13 = pneg %p3329_p6 }
 0x2b6   : > { %3600 = dma.done.wait (%p3330_p13), %s3013_s12, 4096  }
 0x2b7   : > { %3602 = vsyncadd (%p3330_p13), %s3013_s12, 4294963200  ;;  %s5790_s0 = sld [smem:[#allocation31_spill]]  ;;  %s5792_s28 = smov %s3609_s29 }
 0x2b8   : > { %s5791_s19 = sld [smem:[#allocation32_spill]]  ;;  %s5793_s29 = smov %s3613_s30 }
 0x2bd   : > { %p33_p2 = scmp.ge.s32.totalorder %s5790_s0, 6  }
 0x2be   : > { %s5794_s30 = smov %s5791_s19 }
 0x2bf   :  { %35 = sbr.rel (!%p33_p2) target bundleno = 16 (0x10), region = 164 }
 0x2c4   :  { %3019 = vsyncpa [#allocation9], 1 }
 0x2c5   :  { %3021 = vsyncpa [#allocation9 + $0x1], 1 }
 0x2c6   :  { %3022 = vsyncpa [#allocation12], 1 }
 0x2c7   :  { %3023 = vsyncpa [#allocation15], 1 }
 0x2c8   :  { %3024 = vsyncpa [#allocation18], 1 }
 0x2c9   :  { %3026 = vsyncpa [#allocation18 + $0x1], 1 }
 0x2ca   :  { %3027 = vsyncpa [#allocation10], 1 }
 0x2cb   :  { %3029 = vsyncpa [#allocation10 + $0x1], 1 }

</bundles_post_ra>
